<compile_context>
chip_gen: v7x
topology: tpu7x:2x2x1
jax: 0.10.0
libtpu: 0.0.40
codegen_flags: <defaults>
</compile_context>

<pallas_src>
import functools

import jax
import jax.numpy as jnp
from jax import lax
from jax.experimental import pallas as pl
from jax.experimental.pallas import tpu as pltpu

_VMEM_LIMIT = 32 * 1024 * 1024  # explicit scoped-VMEM cap: safe on v5e/v6e/v7x


# ---------------------------------------------------------------------------
# Pallas kernels
# ---------------------------------------------------------------------------
def _xw_kernel(x_ref, w_ref, o_ref):
    """o = X @ W for one row tile (W fully resident)."""
    o_ref[...] = jnp.dot(x_ref[...], w_ref[...],
                         preferred_element_type=jnp.float32).astype(o_ref.dtype)


def _gcn_proj_kernel(a_ref, z_ref, b_ref, wn_ref, o_ref, acc_ref):
    """o = relu(A @ Z + b) @ W_next, accumulated over the K grid axis."""
    k = pl.program_id(1)

    @pl.when(k == 0)
    def _():
        acc_ref[...] = jnp.zeros_like(acc_ref)

    acc_ref[...] += jnp.dot(a_ref[...], z_ref[...],
                            preferred_element_type=jnp.float32)

    @pl.when(k == pl.num_programs(1) - 1)
    def _():
        h = jnp.maximum(acc_ref[...] + b_ref[...], 0.0)
        o_ref[...] = jnp.dot(h.astype(wn_ref.dtype), wn_ref[...],
                             preferred_element_type=jnp.float32
                             ).astype(o_ref.dtype)


def _gcn_plain_kernel(a_ref, z_ref, b_ref, o_ref, acc_ref):
    """o = relu(A @ Z + b), accumulated over the K grid axis."""
    k = pl.program_id(1)

    @pl.when(k == 0)
    def _():
        acc_ref[...] = jnp.zeros_like(acc_ref)

    acc_ref[...] += jnp.dot(a_ref[...], z_ref[...],
                            preferred_element_type=jnp.float32)

    @pl.when(k == pl.num_programs(1) - 1)
    def _():
        o_ref[...] = jnp.maximum(acc_ref[...] + b_ref[...], 0.0
                                 ).astype(o_ref.dtype)


def _gcn_split_proj_kernel(a_ref, z_ref, b_ref, wn_ref, z4_ref, s_ref, acc_ref):
    """Fused AttributeDecoder.gc1 + StructureDecoder.gc1 (one A pass):
       y = relu(A @ Z + b_cat); s = y[:, H:]; z4 = y[:, :H] @ Wa2."""
    k = pl.program_id(1)

    @pl.when(k == 0)
    def _():
        acc_ref[...] = jnp.zeros_like(acc_ref)

    acc_ref[...] += jnp.dot(a_ref[...], z_ref[...],
                            preferred_element_type=jnp.float32)

    @pl.when(k == pl.num_programs(1) - 1)
    def _():
        y = jnp.maximum(acc_ref[...] + b_ref[...], 0.0)
        hp = s_ref.shape[-1]                       # 128-aligned split, cheap
        s_ref[...] = y[:, hp:].astype(s_ref.dtype)
        z4_ref[...] = jnp.dot(y[:, :hp].astype(wn_ref.dtype), wn_ref[...],
                              preferred_element_type=jnp.float32
                              ).astype(z4_ref.dtype)


def _xxt_kernel(si_ref, sj_ref, o_ref):
    """o[i, j] = S_i @ S_j^T via dot_general contracting axis 1 of both."""
    o_ref[...] = lax.dot_general(
        si_ref[...], sj_ref[...],
        dimension_numbers=(((1,), (1,)), ((), ())),
        preferred_element_type=jnp.float32).astype(o_ref.dtype)


# ---------------------------------------------------------------------------
# pallas_call wrappers
# ---------------------------------------------------------------------------
def _cparams(sem):
    return pltpu.CompilerParams(dimension_semantics=sem,
                                vmem_limit_bytes=_VMEM_LIMIT)


def _xw(x, w, tm):
    n, cin = x.shape
    cout = w.shape[1]
    return pl.pallas_call(
        _xw_kernel,
        out_shape=jax.ShapeDtypeStruct((n, cout), x.dtype),
        grid=(n // tm,),
        in_specs=[pl.BlockSpec((tm, cin), lambda i: (i, 0)),
                  pl.BlockSpec((cin, cout), lambda i: (0, 0))],
        out_specs=pl.BlockSpec((tm, cout), lambda i: (i, 0)),
        compiler_params=_cparams(("parallel",)),
        cost_estimate=pl.CostEstimate(
            flops=2 * n * cin * cout, transcendentals=0,
            bytes_accessed=(n * cin + cin * cout + n * cout) * x.dtype.itemsize),
    )(x, w)


def _gcn_proj(a, z, b, wn, tm, tk):
    n = a.shape[0]
    c = z.shape[1]
    cn = wn.shape[1]
    return pl.pallas_call(
        _gcn_proj_kernel,
        out_shape=jax.ShapeDtypeStruct((n, cn), z.dtype),
        grid=(n // tm, n // tk),
        in_specs=[pl.BlockSpec((tm, tk), lambda i, k: (i, k)),   # A tile
                  pl.BlockSpec((tk, c), lambda i, k: (k, 0)),    # Z tile
                  pl.BlockSpec((1, c), lambda i, k: (0, 0)),     # bias (full)
                  pl.BlockSpec((c, cn), lambda i, k: (0, 0))],   # W_next (full)
        out_specs=pl.BlockSpec((tm, cn), lambda i, k: (i, 0)),
        scratch_shapes=[pltpu.VMEM((tm, c), jnp.float32)],
        compiler_params=_cparams(("parallel", "arbitrary")),
        cost_estimate=pl.CostEstimate(
            flops=2 * n * n * c + 2 * n * c * cn, transcendentals=0,
            bytes_accessed=n * n * a.dtype.itemsize
            + (n * c + c * cn + n * cn) * z.dtype.itemsize),
    )(a, z, b, wn)


def _gcn_plain(a, z, b, tm, tk):
    n = a.shape[0]
    c = z.shape[1]
    return pl.pallas_call(
        _gcn_plain_kernel,
        out_shape=jax.ShapeDtypeStruct((n, c), jnp.float32),
        grid=(n // tm, n // tk),
        in_specs=[pl.BlockSpec((tm, tk), lambda i, k: (i, k)),
                  pl.BlockSpec((tk, c), lambda i, k: (k, 0)),
                  pl.BlockSpec((1, c), lambda i, k: (0, 0))],
        out_specs=pl.BlockSpec((tm, c), lambda i, k: (i, 0)),
        scratch_shapes=[pltpu.VMEM((tm, c), jnp.float32)],
        compiler_params=_cparams(("parallel", "arbitrary")),
        cost_estimate=pl.CostEstimate(
            flops=2 * n * n * c, transcendentals=0,
            bytes_accessed=n * n * a.dtype.itemsize
            + n * c * z.dtype.itemsize + n * c * 4),
    )(a, z, b)


def _gcn_split_proj(a, z, b, wn, hp, tm, tk):
    n = a.shape[0]
    c = z.shape[1]            # 2 * hp
    fp = wn.shape[1]
    return pl.pallas_call(
        _gcn_split_proj_kernel,
        out_shape=(jax.ShapeDtypeStruct((n, fp), z.dtype),   # Z4 = xh @ Wa2
                   jax.ShapeDtypeStruct((n, hp), z.dtype)),  # S
        grid=(n // tm, n // tk),
        in_specs=[pl.BlockSpec((tm, tk), lambda i, k: (i, k)),
                  pl.BlockSpec((tk, c), lambda i, k: (k, 0)),
                  pl.BlockSpec((1, c), lambda i, k: (0, 0)),
                  pl.BlockSpec((hp, fp), lambda i, k: (0, 0))],
        out_specs=(pl.BlockSpec((tm, fp), lambda i, k: (i, 0)),
                   pl.BlockSpec((tm, hp), lambda i, k: (i, 0))),
        scratch_shapes=[pltpu.VMEM((tm, c), jnp.float32)],
        compiler_params=_cparams(("parallel", "arbitrary")),
        cost_estimate=pl.CostEstimate(
            flops=2 * n * n * c + 2 * n * hp * fp, transcendentals=0,
            bytes_accessed=n * n * a.dtype.itemsize
            + (n * c + hp * fp + n * fp + n * hp) * z.dtype.itemsize),
    )(a, z, b, wn)


def _xxt(s, tm):
    n, c = s.shape
    return pl.pallas_call(
        _xxt_kernel,
        out_shape=jax.ShapeDtypeStruct((n, n), jnp.float32),
        grid=(n // tm, n // tm),
        in_specs=[pl.BlockSpec((tm, c), lambda i, j: (i, 0)),
                  pl.BlockSpec((tm, c), lambda i, j: (j, 0))],
        out_specs=pl.BlockSpec((tm, tm), lambda i, j: (i, j)),
        compiler_params=_cparams(("parallel", "parallel")),
        cost_estimate=pl.CostEstimate(
            flops=2 * n * n * c, transcendentals=0,
            bytes_accessed=2 * n * c * s.dtype.itemsize + n * n * 4),
    )(s, s)


# ---------------------------------------------------------------------------
# Glue: padding, parameters, normalized adjacency, forward wrapper
# ---------------------------------------------------------------------------
def _round_up(x, m):
    return ((x + m - 1) // m) * m


def _pad2d(a, rows, cols, dtype):
    pr, pc = rows - a.shape[0], cols - a.shape[1]
    if pr or pc:
        a = jnp.pad(a, ((0, pr), (0, pc)))
    return a.astype(dtype)


def _pad_bias(b, cols):
    return jnp.pad(b, (0, cols - b.shape[0])).reshape(1, cols).astype(jnp.float32)


def _pick_tile(n, prefs):
    for t in prefs:
        if n % t == 0:
            return t
    return 128


def glorot(key, fan_in, fan_out):
    limit = jnp.sqrt(6.0 / (fan_in + fan_out))
    return jax.random.uniform(key, (fan_in, fan_out), jnp.float32, -limit, limit)


def init_params(key, feat_size, hidden_size):
    ks = jax.random.split(key, 5)
    return {
        "enc_w1": glorot(ks[0], feat_size, hidden_size),
        "enc_b1": jnp.zeros((hidden_size,), jnp.float32),
        "enc_w2": glorot(ks[1], hidden_size, hidden_size),
        "enc_b2": jnp.zeros((hidden_size,), jnp.float32),
        "att_w1": glorot(ks[2], hidden_size, hidden_size),
        "att_b1": jnp.zeros((hidden_size,), jnp.float32),
        "att_w2": glorot(ks[3], hidden_size, feat_size),
        "att_b2": jnp.zeros((feat_size,), jnp.float32),
        "str_w1": glorot(ks[4], hidden_size, hidden_size),
        "str_b1": jnp.zeros((hidden_size,), jnp.float32),
    }


def normalized_adjacency(edge_index, num_nodes):
    """Dense D^-1/2 (A + I) D^-1/2 as in torch_geometric GCNConv (plain JAX glue)."""
    src, dst = edge_index
    adj = jnp.zeros((num_nodes, num_nodes), jnp.float32).at[src, dst].set(1.0)
    adj = adj + jnp.eye(num_nodes, dtype=jnp.float32)
    deg = jnp.sum(adj, axis=1)
    d_inv_sqrt = jnp.where(deg > 0, 1.0 / jnp.sqrt(deg), 0.0)
    return d_inv_sqrt[:, None] * adj * d_inv_sqrt[None, :]


def dominant_forward(params, x, a_norm, *, tm=None, tk=None,
                     matmul_dtype=jnp.float32):
    """Returns (struct_reconstructed, x_hat), matching Dominant.forward (eval)."""
    n, feat = x.shape
    hid = params["enc_w1"].shape[1]
    hp = _round_up(hid, 128)          # lane-dense hidden dim
    fp = _round_up(feat, 128)         # lane-dense feature dim

    np_ = _round_up(n, 128)
    if tm is None:
        tm = _pick_tile(np_, (256, 128))
    if tk is None:
        tk = _pick_tile(np_, (512, 256, 128))
    np_ = _round_up(_round_up(np_, tm), tk)
    assert np_ % tm == 0 and np_ % tk == 0

    # zero-padding is exact: padded channels stay identically zero, padded
    # node rows never touch real rows (their A columns are zero) and are
    # sliced off at the end.
    a_p = _pad2d(a_norm, np_, np_, matmul_dtype)
    x_p = _pad2d(x, np_, fp, matmul_dtype)

    w1 = _pad2d(params["enc_w1"], fp, hp, matmul_dtype)
    b1 = _pad_bias(params["enc_b1"], hp)
    w2 = _pad2d(params["enc_w2"], hp, hp, matmul_dtype)
    b2 = _pad_bias(params["enc_b2"], hp)
    # AttributeDecoder.gc1 and StructureDecoder.gc1 share input h -> fuse.
    w_cat = jnp.concatenate(
        [_pad2d(params["att_w1"], hp, hp, matmul_dtype),
         _pad2d(params["str_w1"], hp, hp, matmul_dtype)], axis=1)   # (hp, 2hp)
    b_cat = jnp.concatenate(
        [_pad_bias(params["att_b1"], hp), _pad_bias(params["str_b1"], hp)],
        axis=1)                                                     # (1, 2hp)
    wa2 = _pad2d(params["att_w2"], hp, fp, matmul_dtype)
    ba2 = _pad_bias(params["att_b2"], fp)

    z1 = _xw(x_p, w1, tm)                                  # X @ W1
    z2 = _gcn_proj(a_p, z1, b1, w2, tm, tk)                # relu(A z1 + b1) @ W2
    z3 = _gcn_proj(a_p, z2, b2, w_cat, tm, tk)             # h @ [Wa1 | Ws1]
    z4, s = _gcn_split_proj(a_p, z3, b_cat, wa2, hp, tm, tk)
    x_hat = _gcn_plain(a_p, z4, ba2, tm, tk)               # relu(A z4 + ba2)
    a_hat = _xxt(s, tm)                                    # s @ s.T

    # TODO(synk): latent_value (encoder output h) host-side caching and the
    # fit()/loss_func training loop (Adam) are host-side and not translated.
    return a_hat[:n, :n], x_hat[:n, :feat]


# ---------------------------------------------------------------------------
if __name__ == "__main__":
    N = 256           # number of graph nodes (exercises a real grid at tm=tk=128)
    FEAT = 32         # feat_size
    HID = 16          # hidden_size

    key = jax.random.PRNGKey(0)
    k_x, k_p = jax.random.split(key)

    x = jax.random.normal(k_x, (N, FEAT), jnp.float32)

    # deterministic symmetric ring graph (i <-> i+1)
    src = jnp.arange(N, dtype=jnp.int32)
    dst = (src + 1) % N
    edge_index = jnp.stack(
        [jnp.concatenate([src, dst]), jnp.concatenate([dst, src])], axis=0)

    a_norm = normalized_adjacency(edge_index, N)
    params = init_params(k_p, FEAT, HID)

    fwd = jax.jit(functools.partial(dominant_forward, tm=128, tk=128))
    a_hat, x_hat = fwd(params, x, a_norm)
    jax.block_until_ready((a_hat, x_hat))

    assert a_hat.shape == (N, N) and x_hat.shape == (N, FEAT)

    # correctness check against a plain-JAX reference
    def ref_gcn(a, xx, w, b):
        return jnp.maximum(a @ (xx @ w) + b[None, :], 0.0)

    h = ref_gcn(a_norm, x, params["enc_w1"], params["enc_b1"])
    h = ref_gcn(a_norm, h, params["enc_w2"], params["enc_b2"])
    xh = ref_gcn(a_norm, h, params["att_w1"], params["att_b1"])
    x_hat_ref = ref_gcn(a_norm, xh, params["att_w2"], params["att_b2"])
    s_ref = ref_gcn(a_norm, h, params["str_w1"], params["str_b1"])
    a_hat_ref = s_ref @ s_ref.T

    assert jnp.allclose(a_hat, a_hat_ref, atol=2e-4, rtol=2e-4)
    assert jnp.allclose(x_hat, x_hat_ref, atol=2e-4, rtol=2e-4)

    print("KERNEL_OK")
</pallas_src>

<mosaic_0001>
module attributes {stable_mosaic.version = 11 : i64} {
  func.func @_xw_kernel(%arg0: i32, %arg1: memref<128x128xf32, #tpu.memory_space<vmem>>, %arg2: memref<128x128xf32, #tpu.memory_space<vmem>>, %arg3: memref<128x128xf32, #tpu.memory_space<vmem>>) attributes {dimension_semantics = [#tpu.dimension_semantics<parallel>], iteration_bounds = array<i64: 2>, scalar_prefetch = 0 : i64, scratch_operands = 0 : i64, tpu.core_type = #tpu.core_type<tc>, window_params = [{transform_indices = @transform_0, window_bounds = array<i64: 128, 128>}, {pipeline_mode = #tpu.pipeline_mode<synchronous>, transform_indices = @transform_1, window_bounds = array<i64: 128, 128>}, {transform_indices = @transform_2, window_bounds = array<i64: 128, 128>}]} {
    %c0 = arith.constant 0 : index
    %c0_0 = arith.constant 0 : index
    %0 = vector.load %arg1[%c0, %c0_0] : memref<128x128xf32, #tpu.memory_space<vmem>>, vector<128x128xf32>
    %c0_1 = arith.constant 0 : index
    %c0_2 = arith.constant 0 : index
    %1 = vector.load %arg2[%c0_1, %c0_2] : memref<128x128xf32, #tpu.memory_space<vmem>>, vector<128x128xf32>
    %cst = arith.constant dense<0.000000e+00> : vector<128x128xf32>
    %2 = tpu.matmul %0, %1, %cst {dimension_numbers = #tpu.dot_dimension_numbers<[1], [0], [0], [1], [0, 0, 1, 1], [], []>} : vector<128x128xf32>, vector<128x128xf32>, vector<128x128xf32> -> vector<128x128xf32>
    %c0_3 = arith.constant 0 : index
    %c0_4 = arith.constant 0 : index
    %3 = vector.load %arg3[%c0_3, %c0_4] : memref<128x128xf32, #tpu.memory_space<vmem>>, vector<128x128xf32>
    tpu.vector_store %arg3[%c0_3, %c0_4], %2 {strides = array<i32>} : memref<128x128xf32, #tpu.memory_space<vmem>>, vector<128x128xf32>,
    return
  }
  func.func @transform_0(%arg0: i32) -> (i32, i32) {
    %c0_i32 = arith.constant 0 : i32
    %c0_i32_0 = arith.constant 0 : i32
    return %arg0, %c0_i32 : i32, i32
  }
  func.func @transform_1(%arg0: i32) -> (i32, i32) {
    %c0_i32 = arith.constant 0 : i32
    %c0_i32_0 = arith.constant 0 : i32
    %c0_i32_1 = arith.constant 0 : i32
    return %c0_i32, %c0_i32_0 : i32, i32
  }
  func.func @transform_2(%arg0: i32) -> (i32, i32) {
    %c0_i32 = arith.constant 0 : i32
    %c0_i32_0 = arith.constant 0 : i32
    return %arg0, %c0_i32 : i32, i32
  }
}

module attributes {stable_mosaic.version = 11 : i64} {
  func.func @_gcn_proj_kernel(%arg0: i32, %arg1: i32, %arg2: memref<128x128xf32, #tpu.memory_space<vmem>>, %arg3: memref<128x128xf32, #tpu.memory_space<vmem>>, %arg4: memref<1x128xf32, #tpu.memory_space<vmem>>, %arg5: memref<128x128xf32, #tpu.memory_space<vmem>>, %arg6: memref<128x128xf32, #tpu.memory_space<vmem>>, %arg7: memref<128x128xf32, #tpu.memory_space<vmem>>) attributes {dimension_semantics = [#tpu.dimension_semantics<parallel>, #tpu.dimension_semantics<arbitrary>], iteration_bounds = array<i64: 2, 2>, scalar_prefetch = 0 : i64, scratch_operands = 1 : i64, tpu.core_type = #tpu.core_type<tc>, window_params = [{transform_indices = @transform_0, window_bounds = array<i64: 128, 128>}, {transform_indices = @transform_1, window_bounds = array<i64: 128, 128>}, {pipeline_mode = #tpu.pipeline_mode<synchronous>, transform_indices = @transform_2, window_bounds = array<i64: 1, 128>}, {pipeline_mode = #tpu.pipeline_mode<synchronous>, transform_indices = @transform_3, window_bounds = array<i64: 128, 128>}, {transform_indices = @transform_4, window_bounds = array<i64: 128, 128>}]} {
    %c0_i32 = arith.constant 0 : i32
    %0 = arith.cmpi eq, %arg1, %c0_i32 : i32
    %1 = arith.extui %0 : i1 to i32
    %c0_i32_0 = arith.constant 0 : i32
    %2 = arith.cmpi ne, %1, %c0_i32_0 : i32
    scf.if %2 {
      %cst_9 = arith.constant 0.000000e+00 : f32
      %12 = vector.broadcast %cst_9 : f32 to vector<128x128xf32>
      %c0_10 = arith.constant 0 : index
      %c0_11 = arith.constant 0 : index
      %13 = vector.load %arg7[%c0_10, %c0_11] : memref<128x128xf32, #tpu.memory_space<vmem>>, vector<128x128xf32>
      tpu.vector_store %arg7[%c0_10, %c0_11], %12 {strides = array<i32>} : memref<128x128xf32, #tpu.memory_space<vmem>>, vector<128x128xf32>,
    } else {
    }
    %c0 = arith.constant 0 : index
    %c0_1 = arith.constant 0 : index
    %3 = vector.load %arg7[%c0, %c0_1] : memref<128x128xf32, #tpu.memory_space<vmem>>, vector<128x128xf32>
    %c0_2 = arith.constant 0 : index
    %c0_3 = arith.constant 0 : index
    %4 = vector.load %arg2[%c0_2, %c0_3] : memref<128x128xf32, #tpu.memory_space<vmem>>, vector<128x128xf32>
    %c0_4 = arith.constant 0 : index
    %c0_5 = arith.constant 0 : index
    %5 = vector.load %arg3[%c0_4, %c0_5] : memref<128x128xf32, #tpu.memory_space<vmem>>, vector<128x128xf32>
    %cst = arith.constant dense<0.000000e+00> : vector<128x128xf32>
    %6 = tpu.matmul %4, %5, %cst {dimension_numbers = #tpu.dot_dimension_numbers<[1], [0], [0], [1], [0, 0, 1, 1], [], []>} : vector<128x128xf32>, vector<128x128xf32>, vector<128x128xf32> -> vector<128x128xf32>
    %7 = arith.addf %3, %6 : vector<128x128xf32>
    %c0_6 = arith.constant 0 : index
    %c0_7 = arith.constant 0 : index
    %8 = vector.load %arg7[%c0_6, %c0_7] : memref<128x128xf32, #tpu.memory_space<vmem>>, vector<128x128xf32>
    tpu.vector_store %arg7[%c0_6, %c0_7], %7 {strides = array<i32>} : memref<128x128xf32, #tpu.memory_space<vmem>>, vector<128x128xf32>,
    %c1_i32 = arith.constant 1 : i32
    %9 = arith.cmpi eq, %arg1, %c1_i32 : i32
    %10 = arith.extui %9 : i1 to i32
    %c0_i32_8 = arith.constant 0 : i32
    %11 = arith.cmpi ne, %10, %c0_i32_8 : i32
    scf.if %11 {
      %c0_9 = arith.constant 0 : index
      %c0_10 = arith.constant 0 : index
      %12 = vector.load %arg7[%c0_9, %c0_10] : memref<128x128xf32, #tpu.memory_space<vmem>>, vector<128x128xf32>
      %c0_11 = arith.constant 0 : index
      %c0_12 = arith.constant 0 : index
      %13 = vector.load %arg4[%c0_11, %c0_12] : memref<1x128xf32, #tpu.memory_space<vmem>>, vector<1x128xf32>
      %14 = vector.broadcast %13 : vector<1x128xf32> to vector<128x128xf32>
      %15 = arith.addf %12, %14 : vector<128x128xf32>
      %cst_13 = arith.constant 0.000000e+00 : f32
      %16 = vector.broadcast %cst_13 : f32 to vector<128x128xf32>
      %17 = arith.maximumf %15, %16 : vector<128x128xf32>
      %c0_14 = arith.constant 0 : index
      %c0_15 = arith.constant 0 : index
      %18 = vector.load %arg5[%c0_14, %c0_15] : memref<128x128xf32, #tpu.memory_space<vmem>>, vector<128x128xf32>
      %cst_16 = arith.constant dense<0.000000e+00> : vector<128x128xf32>
      %19 = tpu.matmul %17, %18, %cst_16 {dimension_numbers = #tpu.dot_dimension_numbers<[1], [0], [0], [1], [0, 0, 1, 1], [], []>} : vector<128x128xf32>, vector<128x128xf32>, vector<128x128xf32> -> vector<128x128xf32>
      %c0_17 = arith.constant 0 : index
      %c0_18 = arith.constant 0 : index
      %20 = vector.load %arg6[%c0_17, %c0_18] : memref<128x128xf32, #tpu.memory_space<vmem>>, vector<128x128xf32>
      tpu.vector_store %arg6[%c0_17, %c0_18], %19 {strides = array<i32>} : memref<128x128xf32, #tpu.memory_space<vmem>>, vector<128x128xf32>,
    } else {
    }
    return
  }
  func.func @transform_0(%arg0: i32, %arg1: i32) -> (i32, i32) {
    %c0_i32 = arith.constant 0 : i32
    return %arg0, %arg1 : i32, i32
  }
  func.func @transform_1(%arg0: i32, %arg1: i32) -> (i32, i32) {
    %c0_i32 = arith.constant 0 : i32
    %c0_i32_0 = arith.constant 0 : i32
    return %arg1, %c0_i32 : i32, i32
  }
  func.func @transform_2(%arg0: i32, %arg1: i32) -> (i32, i32) {
    %c0_i32 = arith.constant 0 : i32
    %c0_i32_0 = arith.constant 0 : i32
    %c0_i32_1 = arith.constant 0 : i32
    return %c0_i32, %c0_i32_0 : i32, i32
  }
  func.func @transform_3(%arg0: i32, %arg1: i32) -> (i32, i32) {
    %c0_i32 = arith.constant 0 : i32
    %c0_i32_0 = arith.constant 0 : i32
    %c0_i32_1 = arith.constant 0 : i32
    return %c0_i32, %c0_i32_0 : i32, i32
  }
  func.func @transform_4(%arg0: i32, %arg1: i32) -> (i32, i32) {
    %c0_i32 = arith.constant 0 : i32
    %c0_i32_0 = arith.constant 0 : i32
    return %arg0, %c0_i32 : i32, i32
  }
}

module attributes {stable_mosaic.version = 11 : i64} {
  func.func @_gcn_proj_kernel(%arg0: i32, %arg1: i32, %arg2: memref<128x128xf32, #tpu.memory_space<vmem>>, %arg3: memref<128x128xf32, #tpu.memory_space<vmem>>, %arg4: memref<1x128xf32, #tpu.memory_space<vmem>>, %arg5: memref<128x256xf32, #tpu.memory_space<vmem>>, %arg6: memref<128x256xf32, #tpu.memory_space<vmem>>, %arg7: memref<128x128xf32, #tpu.memory_space<vmem>>) attributes {dimension_semantics = [#tpu.dimension_semantics<parallel>, #tpu.dimension_semantics<arbitrary>], iteration_bounds = array<i64: 2, 2>, scalar_prefetch = 0 : i64, scratch_operands = 1 : i64, tpu.core_type = #tpu.core_type<tc>, window_params = [{transform_indices = @transform_0, window_bounds = array<i64: 128, 128>}, {transform_indices = @transform_1, window_bounds = array<i64: 128, 128>}, {pipeline_mode = #tpu.pipeline_mode<synchronous>, transform_indices = @transform_2, window_bounds = array<i64: 1, 128>}, {pipeline_mode = #tpu.pipeline_mode<synchronous>, transform_indices = @transform_3, window_bounds = array<i64: 128, 256>}, {transform_indices = @transform_4, window_bounds = array<i64: 128, 256>}]} {
    %c0_i32 = arith.constant 0 : i32
    %0 = arith.cmpi eq, %arg1, %c0_i32 : i32
    %1 = arith.extui %0 : i1 to i32
    %c0_i32_0 = arith.constant 0 : i32
    %2 = arith.cmpi ne, %1, %c0_i32_0 : i32
    scf.if %2 {
      %cst_9 = arith.constant 0.000000e+00 : f32
      %12 = vector.broadcast %cst_9 : f32 to vector<128x128xf32>
      %c0_10 = arith.constant 0 : index
      %c0_11 = arith.constant 0 : index
      %13 = vector.load %arg7[%c0_10, %c0_11] : memref<128x128xf32, #tpu.memory_space<vmem>>, vector<128x128xf32>
      tpu.vector_store %arg7[%c0_10, %c0_11], %12 {strides = array<i32>} : memref<128x128xf32, #tpu.memory_space<vmem>>, vector<128x128xf32>,
    } else {
    }
    %c0 = arith.constant 0 : index
    %c0_1 = arith.constant 0 : index
    %3 = vector.load %arg7[%c0, %c0_1] : memref<128x128xf32, #tpu.memory_space<vmem>>, vector<128x128xf32>
    %c0_2 = arith.constant 0 : index
    %c0_3 = arith.constant 0 : index
    %4 = vector.load %arg2[%c0_2, %c0_3] : memref<128x128xf32, #tpu.memory_space<vmem>>, vector<128x128xf32>
    %c0_4 = arith.constant 0 : index
    %c0_5 = arith.constant 0 : index
    %5 = vector.load %arg3[%c0_4, %c0_5] : memref<128x128xf32, #tpu.memory_space<vmem>>, vector<128x128xf32>
    %cst = arith.constant dense<0.000000e+00> : vector<128x128xf32>
    %6 = tpu.matmul %4, %5, %cst {dimension_numbers = #tpu.dot_dimension_numbers<[1], [0], [0], [1], [0, 0, 1, 1], [], []>} : vector<128x128xf32>, vector<128x128xf32>, vector<128x128xf32> -> vector<128x128xf32>
    %7 = arith.addf %3, %6 : vector<128x128xf32>
    %c0_6 = arith.constant 0 : index
    %c0_7 = arith.constant 0 : index
    %8 = vector.load %arg7[%c0_6, %c0_7] : memref<128x128xf32, #tpu.memory_space<vmem>>, vector<128x128xf32>
    tpu.vector_store %arg7[%c0_6, %c0_7], %7 {strides = array<i32>} : memref<128x128xf32, #tpu.memory_space<vmem>>, vector<128x128xf32>,
    %c1_i32 = arith.constant 1 : i32
    %9 = arith.cmpi eq, %arg1, %c1_i32 : i32
    %10 = arith.extui %9 : i1 to i32
    %c0_i32_8 = arith.constant 0 : i32
    %11 = arith.cmpi ne, %10, %c0_i32_8 : i32
    scf.if %11 {
      %c0_9 = arith.constant 0 : index
      %c0_10 = arith.constant 0 : index
      %12 = vector.load %arg7[%c0_9, %c0_10] : memref<128x128xf32, #tpu.memory_space<vmem>>, vector<128x128xf32>
      %c0_11 = arith.constant 0 : index
      %c0_12 = arith.constant 0 : index
      %13 = vector.load %arg4[%c0_11, %c0_12] : memref<1x128xf32, #tpu.memory_space<vmem>>, vector<1x128xf32>
      %14 = vector.broadcast %13 : vector<1x128xf32> to vector<128x128xf32>
      %15 = arith.addf %12, %14 : vector<128x128xf32>
      %cst_13 = arith.constant 0.000000e+00 : f32
      %16 = vector.broadcast %cst_13 : f32 to vector<128x128xf32>
      %17 = arith.maximumf %15, %16 : vector<128x128xf32>
      %c0_14 = arith.constant 0 : index
      %c0_15 = arith.constant 0 : index
      %18 = vector.load %arg5[%c0_14, %c0_15] : memref<128x256xf32, #tpu.memory_space<vmem>>, vector<128x256xf32>
      %cst_16 = arith.constant dense<0.000000e+00> : vector<128x256xf32>
      %19 = tpu.matmul %17, %18, %cst_16 {dimension_numbers = #tpu.dot_dimension_numbers<[1], [0], [0], [1], [0, 0, 1, 1], [], []>} : vector<128x128xf32>, vector<128x256xf32>, vector<128x256xf32> -> vector<128x256xf32>
      %c0_17 = arith.constant 0 : index
      %c0_18 = arith.constant 0 : index
      %20 = vector.load %arg6[%c0_17, %c0_18] : memref<128x256xf32, #tpu.memory_space<vmem>>, vector<128x256xf32>
      tpu.vector_store %arg6[%c0_17, %c0_18], %19 {strides = array<i32>} : memref<128x256xf32, #tpu.memory_space<vmem>>, vector<128x256xf32>,
    } else {
    }
    return
  }
  func.func @transform_0(%arg0: i32, %arg1: i32) -> (i32, i32) {
    %c0_i32 = arith.constant 0 : i32
    return %arg0, %arg1 : i32, i32
  }
  func.func @transform_1(%arg0: i32, %arg1: i32) -> (i32, i32) {
    %c0_i32 = arith.constant 0 : i32
    %c0_i32_0 = arith.constant 0 : i32
    return %arg1, %c0_i32 : i32, i32
  }
  func.func @transform_2(%arg0: i32, %arg1: i32) -> (i32, i32) {
    %c0_i32 = arith.constant 0 : i32
    %c0_i32_0 = arith.constant 0 : i32
    %c0_i32_1 = arith.constant 0 : i32
    return %c0_i32, %c0_i32_0 : i32, i32
  }
  func.func @transform_3(%arg0: i32, %arg1: i32) -> (i32, i32) {
    %c0_i32 = arith.constant 0 : i32
    %c0_i32_0 = arith.constant 0 : i32
    %c0_i32_1 = arith.constant 0 : i32
    return %c0_i32, %c0_i32_0 : i32, i32
  }
  func.func @transform_4(%arg0: i32, %arg1: i32) -> (i32, i32) {
    %c0_i32 = arith.constant 0 : i32
    %c0_i32_0 = arith.constant 0 : i32
    return %arg0, %c0_i32 : i32, i32
  }
}

module attributes {stable_mosaic.version = 11 : i64} {
  func.func @_gcn_split_proj_kernel(%arg0: i32, %arg1: i32, %arg2: memref<128x128xf32, #tpu.memory_space<vmem>>, %arg3: memref<128x256xf32, #tpu.memory_space<vmem>>, %arg4: memref<1x256xf32, #tpu.memory_space<vmem>>, %arg5: memref<128x128xf32, #tpu.memory_space<vmem>>, %arg6: memref<128x128xf32, #tpu.memory_space<vmem>>, %arg7: memref<128x128xf32, #tpu.memory_space<vmem>>, %arg8: memref<128x256xf32, #tpu.memory_space<vmem>>) attributes {dimension_semantics = [#tpu.dimension_semantics<parallel>, #tpu.dimension_semantics<arbitrary>], iteration_bounds = array<i64: 2, 2>, scalar_prefetch = 0 : i64, scratch_operands = 1 : i64, tpu.core_type = #tpu.core_type<tc>, window_params = [{transform_indices = @transform_0, window_bounds = array<i64: 128, 128>}, {transform_indices = @transform_1, window_bounds = array<i64: 128, 256>}, {pipeline_mode = #tpu.pipeline_mode<synchronous>, transform_indices = @transform_2, window_bounds = array<i64: 1, 256>}, {pipeline_mode = #tpu.pipeline_mode<synchronous>, transform_indices = @transform_3, window_bounds = array<i64: 128, 128>}, {transform_indices = @transform_4, window_bounds = array<i64: 128, 128>}, {transform_indices = @transform_5, window_bounds = array<i64: 128, 128>}]} {
    %c0_i32 = arith.constant 0 : i32
    %0 = arith.cmpi eq, %arg1, %c0_i32 : i32
    %1 = arith.extui %0 : i1 to i32
    %c0_i32_0 = arith.constant 0 : i32
    %2 = arith.cmpi ne, %1, %c0_i32_0 : i32
    scf.if %2 {
      %cst_9 = arith.constant 0.000000e+00 : f32
      %12 = vector.broadcast %cst_9 : f32 to vector<128x256xf32>
      %c0_10 = arith.constant 0 : index
      %c0_11 = arith.constant 0 : index
      %13 = vector.load %arg8[%c0_10, %c0_11] : memref<128x256xf32, #tpu.memory_space<vmem>>, vector<128x256xf32>
      tpu.vector_store %arg8[%c0_10, %c0_11], %12 {strides = array<i32>} : memref<128x256xf32, #tpu.memory_space<vmem>>, vector<128x256xf32>,
    } else {
    }
    %c0 = arith.constant 0 : index
    %c0_1 = arith.constant 0 : index
    %3 = vector.load %arg8[%c0, %c0_1] : memref<128x256xf32, #tpu.memory_space<vmem>>, vector<128x256xf32>
    %c0_2 = arith.constant 0 : index
    %c0_3 = arith.constant 0 : index
    %4 = vector.load %arg2[%c0_2, %c0_3] : memref<128x128xf32, #tpu.memory_space<vmem>>, vector<128x128xf32>
    %c0_4 = arith.constant 0 : index
    %c0_5 = arith.constant 0 : index
    %5 = vector.load %arg3[%c0_4, %c0_5] : memref<128x256xf32, #tpu.memory_space<vmem>>, vector<128x256xf32>
    %cst = arith.constant dense<0.000000e+00> : vector<128x256xf32>
    %6 = tpu.matmul %4, %5, %cst {dimension_numbers = #tpu.dot_dimension_numbers<[1], [0], [0], [1], [0, 0, 1, 1], [], []>} : vector<128x128xf32>, vector<128x256xf32>, vector<128x256xf32> -> vector<128x256xf32>
    %7 = arith.addf %3, %6 : vector<128x256xf32>
    %c0_6 = arith.constant 0 : index
    %c0_7 = arith.constant 0 : index
    %8 = vector.load %arg8[%c0_6, %c0_7] : memref<128x256xf32, #tpu.memory_space<vmem>>, vector<128x256xf32>
    tpu.vector_store %arg8[%c0_6, %c0_7], %7 {strides = array<i32>} : memref<128x256xf32, #tpu.memory_space<vmem>>, vector<128x256xf32>,
    %c1_i32 = arith.constant 1 : i32
    %9 = arith.cmpi eq, %arg1, %c1_i32 : i32
    %10 = arith.extui %9 : i1 to i32
    %c0_i32_8 = arith.constant 0 : i32
    %11 = arith.cmpi ne, %10, %c0_i32_8 : i32
    scf.if %11 {
      %c0_9 = arith.constant 0 : index
      %c0_10 = arith.constant 0 : index
      %12 = vector.load %arg8[%c0_9, %c0_10] : memref<128x256xf32, #tpu.memory_space<vmem>>, vector<128x256xf32>
      %c0_11 = arith.constant 0 : index
      %c0_12 = arith.constant 0 : index
      %13 = vector.load %arg4[%c0_11, %c0_12] : memref<1x256xf32, #tpu.memory_space<vmem>>, vector<1x256xf32>
      %14 = vector.broadcast %13 : vector<1x256xf32> to vector<128x256xf32>
      %15 = arith.addf %12, %14 : vector<128x256xf32>
      %cst_13 = arith.constant 0.000000e+00 : f32
      %16 = vector.broadcast %cst_13 : f32 to vector<128x256xf32>
      %17 = arith.maximumf %15, %16 : vector<128x256xf32>
      %18 = vector.extract_strided_slice %17 {offsets = [0, 128], sizes = [128, 128], strides = [1, 1]} : vector<128x256xf32> to vector<128x128xf32>
      %c0_14 = arith.constant 0 : index
      %c0_15 = arith.constant 0 : index
      %19 = vector.load %arg7[%c0_14, %c0_15] : memref<128x128xf32, #tpu.memory_space<vmem>>, vector<128x128xf32>
      tpu.vector_store %arg7[%c0_14, %c0_15], %18 {strides = array<i32>} : memref<128x128xf32, #tpu.memory_space<vmem>>, vector<128x128xf32>,
      %20 = vector.extract_strided_slice %17 {offsets = [0, 0], sizes = [128, 128], strides = [1, 1]} : vector<128x256xf32> to vector<128x128xf32>
      %c0_16 = arith.constant 0 : index
      %c0_17 = arith.constant 0 : index
      %21 = vector.load %arg5[%c0_16, %c0_17] : memref<128x128xf32, #tpu.memory_space<vmem>>, vector<128x128xf32>
      %cst_18 = arith.constant dense<0.000000e+00> : vector<128x128xf32>
      %22 = tpu.matmul %20, %21, %cst_18 {dimension_numbers = #tpu.dot_dimension_numbers<[1], [0], [0], [1], [0, 0, 1, 1], [], []>} : vector<128x128xf32>, vector<128x128xf32>, vector<128x128xf32> -> vector<128x128xf32>
      %c0_19 = arith.constant 0 : index
      %c0_20 = arith.constant 0 : index
      %23 = vector.load %arg6[%c0_19, %c0_20] : memref<128x128xf32, #tpu.memory_space<vmem>>, vector<128x128xf32>
      tpu.vector_store %arg6[%c0_19, %c0_20], %22 {strides = array<i32>} : memref<128x128xf32, #tpu.memory_space<vmem>>, vector<128x128xf32>,
    } else {
    }
    return
  }
  func.func @transform_0(%arg0: i32, %arg1: i32) -> (i32, i32) {
    %c0_i32 = arith.constant 0 : i32
    return %arg0, %arg1 : i32, i32
  }
  func.func @transform_1(%arg0: i32, %arg1: i32) -> (i32, i32) {
    %c0_i32 = arith.constant 0 : i32
    %c0_i32_0 = arith.constant 0 : i32
    return %arg1, %c0_i32 : i32, i32
  }
  func.func @transform_2(%arg0: i32, %arg1: i32) -> (i32, i32) {
    %c0_i32 = arith.constant 0 : i32
    %c0_i32_0 = arith.constant 0 : i32
    %c0_i32_1 = arith.constant 0 : i32
    return %c0_i32, %c0_i32_0 : i32, i32
  }
  func.func @transform_3(%arg0: i32, %arg1: i32) -> (i32, i32) {
    %c0_i32 = arith.constant 0 : i32
    %c0_i32_0 = arith.constant 0 : i32
    %c0_i32_1 = arith.constant 0 : i32
    return %c0_i32, %c0_i32_0 : i32, i32
  }
  func.func @transform_4(%arg0: i32, %arg1: i32) -> (i32, i32) {
    %c0_i32 = arith.constant 0 : i32
    %c0_i32_0 = arith.constant 0 : i32
    return %arg0, %c0_i32 : i32, i32
  }
  func.func @transform_5(%arg0: i32, %arg1: i32) -> (i32, i32) {
    %c0_i32 = arith.constant 0 : i32
    %c0_i32_0 = arith.constant 0 : i32
    return %arg0, %c0_i32 : i32, i32
  }
}

module attributes {stable_mosaic.version = 11 : i64} {
  func.func @_xxt_kernel(%arg0: i32, %arg1: i32, %arg2: memref<128x128xf32, #tpu.memory_space<vmem>>, %arg3: memref<128x128xf32, #tpu.memory_space<vmem>>, %arg4: memref<128x128xf32, #tpu.memory_space<vmem>>) attributes {dimension_semantics = [#tpu.dimension_semantics<parallel>, #tpu.dimension_semantics<parallel>], iteration_bounds = array<i64: 2, 2>, scalar_prefetch = 0 : i64, scratch_operands = 0 : i64, tpu.core_type = #tpu.core_type<tc>, window_params = [{transform_indices = @transform_0, window_bounds = array<i64: 128, 128>}, {transform_indices = @transform_1, window_bounds = array<i64: 128, 128>}, {transform_indices = @transform_2, window_bounds = array<i64: 128, 128>}]} {
    %c0 = arith.constant 0 : index
    %c0_0 = arith.constant 0 : index
    %0 = vector.load %arg2[%c0, %c0_0] : memref<128x128xf32, #tpu.memory_space<vmem>>, vector<128x128xf32>
    %c0_1 = arith.constant 0 : index
    %c0_2 = arith.constant 0 : index
    %1 = vector.load %arg3[%c0_1, %c0_2] : memref<128x128xf32, #tpu.memory_space<vmem>>, vector<128x128xf32>
    %cst = arith.constant dense<0.000000e+00> : vector<128x128xf32>
    %2 = tpu.matmul %0, %1, %cst {dimension_numbers = #tpu.dot_dimension_numbers<[1], [1], [0], [0], [0, 0, 1, 0], [], []>} : vector<128x128xf32>, vector<128x128xf32>, vector<128x128xf32> -> vector<128x128xf32>
    %c0_3 = arith.constant 0 : index
    %c0_4 = arith.constant 0 : index
    %3 = vector.load %arg4[%c0_3, %c0_4] : memref<128x128xf32, #tpu.memory_space<vmem>>, vector<128x128xf32>
    tpu.vector_store %arg4[%c0_3, %c0_4], %2 {strides = array<i32>} : memref<128x128xf32, #tpu.memory_space<vmem>>, vector<128x128xf32>,
    return
  }
  func.func @transform_0(%arg0: i32, %arg1: i32) -> (i32, i32) {
    %c0_i32 = arith.constant 0 : i32
    %c0_i32_0 = arith.constant 0 : i32
    return %arg0, %c0_i32 : i32, i32
  }
  func.func @transform_1(%arg0: i32, %arg1: i32) -> (i32, i32) {
    %c0_i32 = arith.constant 0 : i32
    %c0_i32_0 = arith.constant 0 : i32
    return %arg1, %c0_i32 : i32, i32
  }
  func.func @transform_2(%arg0: i32, %arg1: i32) -> (i32, i32) {
    %c0_i32 = arith.constant 0 : i32
    return %arg0, %arg1 : i32, i32
  }
}

module attributes {stable_mosaic.version = 11 : i64} {
  func.func @_gcn_plain_kernel(%arg0: i32, %arg1: i32, %arg2: memref<128x128xf32, #tpu.memory_space<vmem>>, %arg3: memref<128x128xf32, #tpu.memory_space<vmem>>, %arg4: memref<1x128xf32, #tpu.memory_space<vmem>>, %arg5: memref<128x128xf32, #tpu.memory_space<vmem>>, %arg6: memref<128x128xf32, #tpu.memory_space<vmem>>) attributes {dimension_semantics = [#tpu.dimension_semantics<parallel>, #tpu.dimension_semantics<arbitrary>], iteration_bounds = array<i64: 2, 2>, scalar_prefetch = 0 : i64, scratch_operands = 1 : i64, tpu.core_type = #tpu.core_type<tc>, window_params = [{transform_indices = @transform_0, window_bounds = array<i64: 128, 128>}, {transform_indices = @transform_1, window_bounds = array<i64: 128, 128>}, {pipeline_mode = #tpu.pipeline_mode<synchronous>, transform_indices = @transform_2, window_bounds = array<i64: 1, 128>}, {transform_indices = @transform_3, window_bounds = array<i64: 128, 128>}]} {
    %c0_i32 = arith.constant 0 : i32
    %0 = arith.cmpi eq, %arg1, %c0_i32 : i32
    %1 = arith.extui %0 : i1 to i32
    %c0_i32_0 = arith.constant 0 : i32
    %2 = arith.cmpi ne, %1, %c0_i32_0 : i32
    scf.if %2 {
      %cst_9 = arith.constant 0.000000e+00 : f32
      %12 = vector.broadcast %cst_9 : f32 to vector<128x128xf32>
      %c0_10 = arith.constant 0 : index
      %c0_11 = arith.constant 0 : index
      %13 = vector.load %arg6[%c0_10, %c0_11] : memref<128x128xf32, #tpu.memory_space<vmem>>, vector<128x128xf32>
      tpu.vector_store %arg6[%c0_10, %c0_11], %12 {strides = array<i32>} : memref<128x128xf32, #tpu.memory_space<vmem>>, vector<128x128xf32>,
    } else {
    }
    %c0 = arith.constant 0 : index
    %c0_1 = arith.constant 0 : index
    %3 = vector.load %arg6[%c0, %c0_1] : memref<128x128xf32, #tpu.memory_space<vmem>>, vector<128x128xf32>
    %c0_2 = arith.constant 0 : index
    %c0_3 = arith.constant 0 : index
    %4 = vector.load %arg2[%c0_2, %c0_3] : memref<128x128xf32, #tpu.memory_space<vmem>>, vector<128x128xf32>
    %c0_4 = arith.constant 0 : index
    %c0_5 = arith.constant 0 : index
    %5 = vector.load %arg3[%c0_4, %c0_5] : memref<128x128xf32, #tpu.memory_space<vmem>>, vector<128x128xf32>
    %cst = arith.constant dense<0.000000e+00> : vector<128x128xf32>
    %6 = tpu.matmul %4, %5, %cst {dimension_numbers = #tpu.dot_dimension_numbers<[1], [0], [0], [1], [0, 0, 1, 1], [], []>} : vector<128x128xf32>, vector<128x128xf32>, vector<128x128xf32> -> vector<128x128xf32>
    %7 = arith.addf %3, %6 : vector<128x128xf32>
    %c0_6 = arith.constant 0 : index
    %c0_7 = arith.constant 0 : index
    %8 = vector.load %arg6[%c0_6, %c0_7] : memref<128x128xf32, #tpu.memory_space<vmem>>, vector<128x128xf32>
    tpu.vector_store %arg6[%c0_6, %c0_7], %7 {strides = array<i32>} : memref<128x128xf32, #tpu.memory_space<vmem>>, vector<128x128xf32>,
    %c1_i32 = arith.constant 1 : i32
    %9 = arith.cmpi eq, %arg1, %c1_i32 : i32
    %10 = arith.extui %9 : i1 to i32
    %c0_i32_8 = arith.constant 0 : i32
    %11 = arith.cmpi ne, %10, %c0_i32_8 : i32
    scf.if %11 {
      %c0_9 = arith.constant 0 : index
      %c0_10 = arith.constant 0 : index
      %12 = vector.load %arg6[%c0_9, %c0_10] : memref<128x128xf32, #tpu.memory_space<vmem>>, vector<128x128xf32>
      %c0_11 = arith.constant 0 : index
      %c0_12 = arith.constant 0 : index
      %13 = vector.load %arg4[%c0_11, %c0_12] : memref<1x128xf32, #tpu.memory_space<vmem>>, vector<1x128xf32>
      %14 = vector.broadcast %13 : vector<1x128xf32> to vector<128x128xf32>
      %15 = arith.addf %12, %14 : vector<128x128xf32>
      %cst_13 = arith.constant 0.000000e+00 : f32
      %16 = vector.broadcast %cst_13 : f32 to vector<128x128xf32>
      %17 = arith.maximumf %15, %16 : vector<128x128xf32>
      %c0_14 = arith.constant 0 : index
      %c0_15 = arith.constant 0 : index
      %18 = vector.load %arg5[%c0_14, %c0_15] : memref<128x128xf32, #tpu.memory_space<vmem>>, vector<128x128xf32>
      tpu.vector_store %arg5[%c0_14, %c0_15], %17 {strides = array<i32>} : memref<128x128xf32, #tpu.memory_space<vmem>>, vector<128x128xf32>,
    } else {
    }
    return
  }
  func.func @transform_0(%arg0: i32, %arg1: i32) -> (i32, i32) {
    %c0_i32 = arith.constant 0 : i32
    return %arg0, %arg1 : i32, i32
  }
  func.func @transform_1(%arg0: i32, %arg1: i32) -> (i32, i32) {
    %c0_i32 = arith.constant 0 : i32
    %c0_i32_0 = arith.constant 0 : i32
    return %arg1, %c0_i32 : i32, i32
  }
  func.func @transform_2(%arg0: i32, %arg1: i32) -> (i32, i32) {
    %c0_i32 = arith.constant 0 : i32
    %c0_i32_0 = arith.constant 0 : i32
    %c0_i32_1 = arith.constant 0 : i32
    return %c0_i32, %c0_i32_0 : i32, i32
  }
  func.func @transform_3(%arg0: i32, %arg1: i32) -> (i32, i32) {
    %c0_i32 = arith.constant 0 : i32
    %c0_i32_0 = arith.constant 0 : i32
    return %arg0, %c0_i32 : i32, i32
  }
}

</mosaic_0001>

<bundles_post_ra>
// kernel: dominant_forward.6
= control target key start
LH: loop header
LB: loop body
LE: loop exit
PB: predicated region body
PF: predicated region fallthrough
CT: control target
= control target key end

     0   :  { %s574_s9 = smov 0   ;;  %s682_s0 = inlined_call_operand.vmem [shape: f32[256,128], index: 0, kind: input, shape index: {}]   ;;  %s683_s1 = inlined_call_operand.vmem [shape: f32[128,128], index: 1, kind: input, shape index: {}]   ;;  %s684_s2 = inlined_call_operand.vmem [shape: f32[256,128], index: 2, kind: output, shape index: {}]  }
   0x1 LB: > { %s396_s10 = sadd.s32 4294967295, %s557_s9   ;;  %p400_p0 = scmp.ge.s32.totalorder %s557_s9, 1  ;;  %s557_s9 = sphi %s574_s9, %s12_s9  }
   0x2   : > { %p113_p1 = scmp.lt.s32.totalorder %s557_s9, 3 }
   0x4   : > { %p114_p2 = pnand %p400_p0, %p113_p1 }
   0x5   : > { %v163_v0 = vld [vmem:[%s683_s1] sm:$0xff] (!%p114_p2)  ;;  %v164_v1 = vld [vmem:[%s683_s1 + $0x8] sm:$0xff] (!%p114_p2)  ;;  %v165_v2 = vld [vmem:[%s683_s1 + $0x10] sm:$0xff] (!%p114_p2)  ;;  %s401_s17 = sshll.u32 (!%p114_p2), %s396_s10, 4 }
   0x6   : > { %117 = sbr.rel (%p114_p2) target bundleno = 267 (0x10b), region = 28  ;;  %v495_v3 = vpack.c.bf16 (!%p114_p2), %v164_v1, %v163_v0  ;;  %v166_v4 = vld [vmem:[%s683_s1 + $0x18] sm:$0xff] (!%p114_p2)  ;;  %p136_p3 = scmp.lt.s32.totalorder (!%p114_p2), %s401_s17, 31  ;;  %v167_v6 = vld [vmem:[%s683_s1 + $0x20] sm:$0xff] (!%p114_p2)  ;;  %v168_v7 = vld [vmem:[%s683_s1 + $0x28] sm:$0xff] (!%p114_p2) }
   0x7   : > { %v499_v5 = vpack.c.bf16 (!%p114_p2), %v166_v4, %v165_v2  ;;  %v503_v8 = vpack.c.bf16 (!%p114_p2), %v168_v7, %v167_v6  ;;  %v169_v9 = vld [vmem:[%s683_s1 + $0x30] sm:$0xff] (!%p114_p2)  ;;  %v170_v10 = vld [vmem:[%s683_s1 + $0x38] sm:$0xff] (!%p114_p2)  ;;  %v171_v14 = vld [vmem:[%s683_s1 + $0x40] sm:$0xff] (!%p114_p2) }
   0x8   : > { %496 = vmatprep.subr.bf16.mxu0 (!%p114_p2), %v495_v3  ;;  %527 = vmatprep.subr.bf16.mxu1 (!%p114_p2), %v495_v3  ;;  %v507_v13 = vpack.c.bf16 (!%p114_p2), %v170_v10, %v169_v9  ;;  %v172_v15 = vld [vmem:[%s683_s1 + $0x48] sm:$0xff] (!%p114_p2)  ;;  %v173_v17 = vld [vmem:[%s683_s1 + $0x50] sm:$0xff] (!%p114_p2)  ;;  %v174_v18 = vld [vmem:[%s683_s1 + $0x58] sm:$0xff] (!%p114_p2) }
   0x9   : > { %498 = vmatpush3.bf16.msra.mxu0 (!%p114_p2), %v495_v3  ;;  %535 = vmatpush3.bf16.msra.mxu1 (!%p114_p2), %v495_v3  ;;  %v511_v16 = vpack.c.bf16 (!%p114_p2), %v172_v15, %v171_v14  ;;  %v515_v19 = vpack.c.bf16 (!%p114_p2), %v174_v18, %v173_v17  ;;  %v175_v20 = vld [vmem:[%s683_s1 + $0x60] sm:$0xff] (!%p114_p2)  ;;  %v176_v21 = vld [vmem:[%s683_s1 + $0x68] sm:$0xff] (!%p114_p2)  ;;  %v177_v23 = vld [vmem:[%s683_s1 + $0x70] sm:$0xff] (!%p114_p2) }
   0xa   : > { %500 = vmatprep.subr.bf16.mxu0 (!%p114_p2), %v499_v5  ;;  %528 = vmatprep.subr.bf16.mxu1 (!%p114_p2), %v499_v5  ;;  %v519_v22 = vpack.c.bf16 (!%p114_p2), %v176_v21, %v175_v20  ;;  %v178_v24 = vld [vmem:[%s683_s1 + $0x78] sm:$0xff] (!%p114_p2) }
   0xb   : > { %v523_v25 = vpack.c.bf16 (!%p114_p2), %v178_v24, %v177_v23 }
   0xd   : > { %s686_s17 = smov (!%p136_p3, %s401_s17), 31  ;;  %502 = vmatpush3.bf16.msra.mxu0 %v499_v5  ;;  %536 = vmatpush3.bf16.msra.mxu1 %v499_v5 }
   0xe   : > { %s402_s24 = sshll.u32 %s686_s17, 3  ;;  %504 = vmatprep.subr.bf16.mxu0 %v503_v8  ;;  %529 = vmatprep.subr.bf16.mxu1 %v503_v8 }
   0xf   : > { %s614_s3 = scalar_lea.vmem %s682_s0, %s402_s24  ;;  %s661_s25 = scalar_lea.vmem %s684_s2, %s402_s24 }
  0x10   : > { %v147_v11 = vld [vmem:[%s614_s3] sm:$0xff]  ;;  %v148_v26 = vld [vmem:[%s614_s3 + $0x8] sm:$0xff]  ;;  %v149_v28 = vld [vmem:[%s614_s3 + $0x10] sm:$0xff] }
  0x11   : > { %v155_v12 = vld [vmem:[%s614_s3 + $0x40] sm:$0xff]  ;;  %471 = vmatprep.mubr.f32.mxu0 %v147_v11  ;;  %506 = vmatpush3.bf16.msra.mxu0 %v503_v8  ;;  %v156_v27 = vld [vmem:[%s614_s3 + $0x48] sm:$0xff]  ;;  %v157_v29 = vld [vmem:[%s614_s3 + $0x50] sm:$0xff] }
  0x12   : > { %483 = vmatprep.mubr.f32.mxu1 %v155_v12  ;;  %537 = vmatpush3.bf16.msra.mxu1 %v503_v8  ;;  %v150_v30 = vld [vmem:[%s614_s3 + $0x18] sm:$0xff]  ;;  %v151_v32 = vld [vmem:[%s614_s3 + $0x20] sm:$0xff]  ;;  %v152_v34 = vld [vmem:[%s614_s3 + $0x28] sm:$0xff] }
  0x13   : > { %508 = vmatprep.subr.bf16.mxu0 %v507_v13  ;;  %530 = vmatprep.subr.bf16.mxu1 %v507_v13  ;;  %v158_v31 = vld [vmem:[%s614_s3 + $0x58] sm:$0xff]  ;;  %v159_v33 = vld [vmem:[%s614_s3 + $0x60] sm:$0xff]  ;;  %v160_v35 = vld [vmem:[%s614_s3 + $0x68] sm:$0xff] }
  0x14   : > { %v153_v36 = vld [vmem:[%s614_s3 + $0x30] sm:$0xff]  ;;  %v154_v38 = vld [vmem:[%s614_s3 + $0x38] sm:$0xff] }
  0x15   : > { %510 = vmatpush3.bf16.msra.mxu0 %v507_v13  ;;  %v161_v37 = vld [vmem:[%s614_s3 + $0x70] sm:$0xff]  ;;  %v162_v39 = vld [vmem:[%s614_s3 + $0x78] sm:$0xff] }
  0x16   : > { %538 = vmatpush3.bf16.msra.mxu1 %v507_v13  ;;  %512 = vmatprep.subr.bf16.mxu0 %v511_v16 }
  0x17   : > { %531 = vmatprep.subr.bf16.mxu1 %v511_v16 }
  0x19   : > { %514 = vmatpush3.bf16.msra.mxu0 %v511_v16 }
  0x1a   : > { %539 = vmatpush3.bf16.msra.mxu1 %v511_v16  ;;  %516 = vmatprep.subr.bf16.mxu0 %v515_v19 }
  0x1b   : > { %532 = vmatprep.subr.bf16.mxu1 %v515_v19 }
  0x1d   : > { %518 = vmatpush3.bf16.msra.mxu0 %v515_v19 }
  0x1e   : > { %540 = vmatpush3.bf16.msra.mxu1 %v515_v19  ;;  %520 = vmatprep.subr.bf16.mxu0 %v519_v22 }
  0x1f   : > { %533 = vmatprep.subr.bf16.mxu1 %v519_v22 }
  0x21   : > { %522 = vmatpush3.bf16.msra.mxu0 %v519_v22 }
  0x22   : > { %541 = vmatpush3.bf16.msra.mxu1 %v519_v22  ;;  %524 = vmatprep.subr.bf16.mxu0 %v523_v25 }
  0x23   : > { %534 = vmatprep.subr.bf16.mxu1 %v523_v25 }
  0x25   : > { %526 = vmatpush3.bf16.msra.mxu0 %v523_v25 }
  0x26   : > { %542 = vmatpush3.bf16.msra.mxu1 %v523_v25 }
  0x28   : > { %472 = vmatmul.mubr.f32.vlgmr.msra.gmra.mrb[0].mxu0 %v148_v26 }
  0x29   : > { %484 = vmatmul.mubr.f32.vlgmr.msra.gmra.mrb[0].mxu1 %v156_v27  ;;  %474 = vmatprep.mubr.f32.mxu0 %v149_v28 }
  0x2a   : > { %486 = vmatprep.mubr.f32.mxu1 %v157_v29 }
  0x2c   : > { %475 = vmatmul.mubr.f32.gmra.mrb[2].mxu0 %v150_v30 }
  0x2d   : > { %487 = vmatmul.mubr.f32.gmra.mrb[2].mxu1 %v158_v31  ;;  %477 = vmatprep.mubr.f32.mxu0 %v151_v32 }
  0x2e   : > { %489 = vmatprep.mubr.f32.mxu1 %v159_v33 }
  0x30   : > { %478 = vmatmul.mubr.f32.gmra.mrb[4].mxu0 %v152_v34 }
  0x31   : > { %490 = vmatmul.mubr.f32.gmra.mrb[4].mxu1 %v160_v35  ;;  %480 = vmatprep.mubr.f32.mxu0 %v153_v36 }
  0x32   : > { %492 = vmatprep.mubr.f32.mxu1 %v161_v37 }
  0x34   : > { %481 = vmatmul.mubr.f32.gmra.mrb[6].mxu0 %v154_v38 }
  0x35   : > { %493 = vmatmul.mubr.f32.gmra.mrb[6].mxu1 %v162_v39 }
  0xfb   : > { %v473_v40 = vpop.f32.mrb[0].mxu0 }
  0xfc   : > { %v485_v41 = vpop.f32.mrb[0].mxu1  ;;  %325 = vst [vmem:[%s661_s25 + $0x8] sm:$0xff] %v473_v40  ;;  %v245_v42 = vpop.f32.mrb[1].mxu0 }
  0xfd   : > { %333 = vst [vmem:[%s661_s25 + $0x48] sm:$0xff] %v485_v41  ;;  %v285_v43 = vpop.f32.mrb[1].mxu1  ;;  %324 = vst [vmem:[%s661_s25] sm:$0xff] %v245_v42 }
  0xfe   : > { %332 = vst [vmem:[%s661_s25 + $0x40] sm:$0xff] %v285_v43 }
  0xff   : > { %v476_v44 = vpop.f32.mrb[2].mxu0 }
 0x100   : > { %v488_v45 = vpop.f32.mrb[2].mxu1  ;;  %327 = vst [vmem:[%s661_s25 + $0x18] sm:$0xff] %v476_v44  ;;  %v255_v46 = vpop.f32.mrb[3].mxu0 }
 0x101   : > { %335 = vst [vmem:[%s661_s25 + $0x58] sm:$0xff] %v488_v45  ;;  %v295_v47 = vpop.f32.mrb[3].mxu1  ;;  %326 = vst [vmem:[%s661_s25 + $0x10] sm:$0xff] %v255_v46 }
 0x102   : > { %334 = vst [vmem:[%s661_s25 + $0x50] sm:$0xff] %v295_v47 }
 0x103   : > { %v479_v48 = vpop.f32.mrb[4].mxu0 }
 0x104   : > { %v491_v49 = vpop.f32.mrb[4].mxu1  ;;  %329 = vst [vmem:[%s661_s25 + $0x28] sm:$0xff] %v479_v48  ;;  %v265_v50 = vpop.f32.mrb[5].mxu0 }
 0x105   : > { %337 = vst [vmem:[%s661_s25 + $0x68] sm:$0xff] %v491_v49  ;;  %v305_v51 = vpop.f32.mrb[5].mxu1  ;;  %328 = vst [vmem:[%s661_s25 + $0x20] sm:$0xff] %v265_v50 }
 0x106   : > { %336 = vst [vmem:[%s661_s25 + $0x60] sm:$0xff] %v305_v51 }
 0x107   : > { %v482_v52 = vpop.f32.mrb[6].mxu0 }
 0x108   : > { %v494_v53 = vpop.f32.mrb[6].mxu1  ;;  %331 = vst [vmem:[%s661_s25 + $0x38] sm:$0xff] %v482_v52  ;;  %v275_v54 = vpop.f32.mrb[7].mxu0 }
 0x109   : > { %339 = vst [vmem:[%s661_s25 + $0x78] sm:$0xff] %v494_v53  ;;  %v315_v55 = vpop.f32.mrb[7].mxu1  ;;  %330 = vst [vmem:[%s661_s25 + $0x30] sm:$0xff] %v275_v54 }
 0x10a   : > { %338 = vst [vmem:[%s661_s25 + $0x70] sm:$0xff] %v315_v55 }
 0x10b PF: > { %s12_s9 = sadd.s32 1, %s557_s9  }
 0x10c   : > { %p9_p4 = scmp.ge.s32.totalorder %s12_s9, 4  }
 0x10e   :  { %11 = sbr.rel (!%p9_p4) target bundleno = 1 (0x1), region = 58 }

// kernel: dominant_forward.7
= control target key start
LH: loop header
LB: loop body
LE: loop exit
PB: predicated region body
PF: predicated region fallthrough
CT: control target
= control target key end

     0   :  { %s1333_s15 = smov 0   ;;  %s1335_s16 = smov 0   ;;  %s1568_s0 = inlined_call_operand.vmem [shape: f32[256,256], index: 0, kind: input, shape index: {}]   ;;  %s1569_s1 = inlined_call_operand.vmem [shape: f32[256,128], index: 1, kind: input, shape index: {}]   ;;  %s1570_s2 = inlined_call_operand.vmem [shape: f32[1,128], index: 2, kind: input, shape index: {}]   ;;  %s1571_s3 = inlined_call_operand.vmem [shape: f32[128,128], index: 3, kind: input, shape index: {}]   ;;  %s1572_s4 = inlined_call_operand.vmem [shape: f32[256,128], index: 4, kind: output, shape index: {}]  }
   0x1   :  { %s1337_s17 = smov 0   ;;  %s1339_s18 = smov 0  }
   0x2   :  { %s1341_s19 = smov 0   ;;  %s1343_s20 = smov 0  }
   0x3   :  { %s1345_s21 = smov 0  }
   0x4 LB: > { %s23_s22 = sadd.s32 1, %s1297_s19  ;;  %s26_s23 = sadd.s32 1, %s1301_s20  ;;  %s1305_s21 = sphi %s1345_s21, %s14_s21   ;;  %s1301_s20 = sphi %s1343_s20, %s1578_s20   ;;  %s1297_s19 = sphi %s1341_s19, %s1577_s19   ;;  %s1293_s18 = sphi %s1339_s18, %s1576_s18   ;;  %s1289_s17 = sphi %s1337_s17, %s1575_s17   ;;  %s1285_s16 = sphi %s1335_s16, %s1574_s16   ;;  %s1281_s15 = sphi %s1333_s15, %s1573_s15  }
   0x5   : > { %p24_p0 = scmp.ge.s32.totalorder %s23_s22, 2  ;;  %p42_p1 = scmp.ne.s32.totalorder %s1285_s16, %s1281_s15 }
   0x6   : > { %p43_p2 = scmp.eq.s32.totalorder %s1305_s21, 0  ;;  %s35_s27 = sadd.s32 1, %s1285_s16 }
   0x7   : > { %s1580_s22 = smov (%p24_p0, %s23_s22), 0  ;;  %s1582_s23 = smov (!%p24_p0, %s26_s23), %s1301_s20 }
   0x8   : > { %p44_p3 = por %p43_p2, %p42_p1  ;;  %p28_p4 = scmp.ge.s32.totalorder %s1582_s23, 2 }
   0x9   : > { %s31_s24 = ssub.s32 %s1297_s19, %s1580_s22  ;;  %p905_p6 = scmp.ge.s32.totalorder %s1305_s21, 4 }
   0xa   : > { %s1584_s23 = smov (%p28_p4, %s1582_s23), 0 }
   0xb   : > { %s30_s25 = ssub.s32 %s1301_s20, %s1584_s23  ;;  %168 = sbr.rel (%p905_p6) target bundleno = 32 (0x20), region = 24 }
   0xc   : > { %s32_s26 = sor.u32 %s31_s24, %s30_s25 }
   0xd   : > { %p33_p5 = scmp.eq.s32.totalorder %s32_s26, 0 }
   0xf   : > { %s1384_s28 = scalar_select %p33_p5, %s1285_s16, %s35_s27  }
  0x12   : > { %171 = sbr.rel (!%p44_p3) target bundleno = 32 (0x20), region = 28  ;;  %s173_s29 = sand.u32 (%p44_p3), 1, %s1285_s16  }
  0x13   : > { %s921_s30 = sshll.u32 (%p44_p3), %s1301_s20, 5  ;;  %s906_s5 = sshll.u32 (%p44_p3), %s173_s29, 7 }
  0x14   : > { %s178_s6 = sadd.s32 (%p44_p3), %s1297_s19, %s921_s30  ;;  %s175_s11 = scalar_lea.vmem (%p44_p3), [#allocation3], %s906_s5 }
  0x15   : > { %s909_s7 = sshll.u32 (%p44_p3), %s178_s6, 3 }
  0x16   : > { %s1393_s10 = scalar_lea.vmem (%p44_p3), %s1568_s0, %s909_s7 }
  0x17   : > { %v238_v0 = vld [vmem:[%s1393_s10] sm:$0xff] (%p44_p3)  ;;  %v240_v1 = vld [vmem:[%s1393_s10 + $0x10] sm:$0xff] (%p44_p3) }
  0x18   : > { %v242_v2 = vld [vmem:[%s1393_s10 + $0x20] sm:$0xff] (%p44_p3)  ;;  %239 = vst [vmem:[%s175_s11] sm:$0xff] (%p44_p3), %v238_v0  ;;  %241 = vst [vmem:[%s175_s11 + $0x8] sm:$0xff] (%p44_p3), %v240_v1  ;;  %v244_v3 = vld [vmem:[%s1393_s10 + $0x30] sm:$0xff] (%p44_p3) }
  0x19   : > { %243 = vst [vmem:[%s175_s11 + $0x10] sm:$0xff] %v242_v2  ;;  %v246_v4 = vld [vmem:[%s1393_s10 + $0x40] sm:$0xff]  ;;  %v248_v5 = vld [vmem:[%s1393_s10 + $0x50] sm:$0xff]  ;;  %245 = vst [vmem:[%s175_s11 + $0x18] sm:$0xff] %v244_v3 }
  0x1a   : > { %247 = vst [vmem:[%s175_s11 + $0x20] sm:$0xff] %v246_v4  ;;  %249 = vst [vmem:[%s175_s11 + $0x28] sm:$0xff] %v248_v5  ;;  %v250_v6 = vld [vmem:[%s1393_s10 + $0x60] sm:$0xff]  ;;  %v252_v7 = vld [vmem:[%s1393_s10 + $0x70] sm:$0xff] }
  0x1b   : > { %v254_v8 = vld [vmem:[%s1393_s10 + $0x80] sm:$0xff]  ;;  %251 = vst [vmem:[%s175_s11 + $0x30] sm:$0xff] %v250_v6  ;;  %253 = vst [vmem:[%s175_s11 + $0x38] sm:$0xff] %v252_v7  ;;  %v256_v9 = vld [vmem:[%s1393_s10 + $0x90] sm:$0xff] }
  0x1c   : > { %255 = vst [vmem:[%s175_s11 + $0x40] sm:$0xff] %v254_v8  ;;  %v258_v10 = vld [vmem:[%s1393_s10 + $0xa0] sm:$0xff]  ;;  %v260_v11 = vld [vmem:[%s1393_s10 + $0xb0] sm:$0xff]  ;;  %257 = vst [vmem:[%s175_s11 + $0x48] sm:$0xff] %v256_v9 }
  0x1d   : > { %259 = vst [vmem:[%s175_s11 + $0x50] sm:$0xff] %v258_v10  ;;  %261 = vst [vmem:[%s175_s11 + $0x58] sm:$0xff] %v260_v11  ;;  %v262_v12 = vld [vmem:[%s1393_s10 + $0xc0] sm:$0xff]  ;;  %v264_v13 = vld [vmem:[%s1393_s10 + $0xd0] sm:$0xff] }
  0x1e   : > { %v266_v14 = vld [vmem:[%s1393_s10 + $0xe0] sm:$0xff]  ;;  %263 = vst [vmem:[%s175_s11 + $0x60] sm:$0xff] %v262_v12  ;;  %265 = vst [vmem:[%s175_s11 + $0x68] sm:$0xff] %v264_v13  ;;  %v268_v15 = vld [vmem:[%s1393_s10 + $0xf0] sm:$0xff] }
  0x1f   : > { %267 = vst [vmem:[%s175_s11 + $0x70] sm:$0xff] %v266_v14  ;;  %269 = vst [vmem:[%s175_s11 + $0x78] sm:$0xff] %v268_v15 }
  0x20 PF: > { %p910_p7 = scmp.ge.s32.totalorder %s1305_s21, 1  ;;  %p283_p8 = scmp.lt.s32.totalorder %s1305_s21, 5 }
  0x22   : > { %p284_p9 = pnand %p910_p7, %p283_p8 }
  0x23   : > { %s290_s12 = sand.u32 (!%p284_p9), 1, %s1281_s15   ;;  %s912_s13 = sshll.u32 (!%p284_p9), %s1289_s17, 4 }
  0x24   : > { %287 = sbr.rel (%p284_p9) target bundleno = 549 (0x225), region = 70  ;;  %s911_s14 = sshll.u32 (!%p284_p9), %s290_s12, 7 }
  0x25   : > { %p322_p10 = scmp.lt.s32.totalorder (!%p284_p9), %s912_s13, 31  ;;  %s914_s24 = sshll.u32 (!%p284_p9), %s1293_s18, 4 }
  0x26   : > { %p328_p11 = scmp.lt.s32.totalorder (!%p284_p9), %s914_s24, 31  ;;  %s1426_s15 = scalar_lea.vmem (!%p284_p9), [#allocation3], %s911_s14 }
  0x27   : > { %p916_p12 = scmp.ne.s32.totalorder (!%p284_p9), %s1289_s17, 0 }
  0x2b   : > { %s1586_s13 = smov (!%p322_p10, %s912_s13), 31  ;;  %s1588_s24 = smov (!%p328_p11, %s914_s24), 31 }
  0x2c   : > { %s913_s25 = sshll.u32 %s1586_s13, 3  ;;  %s915_s30 = sshll.u32 %s1588_s24, 3  ;;  %v1307_v16 = vmov (!%p916_p12), 0.0  }
  0x2d   : > { %s1419_s29 = scalar_lea.vmem %s1569_s1, %s913_s25  ;;  %s1424_s7 = scalar_lea.vmem %s1572_s4, %s915_s30  ;;  %337 = vst [vmem:[#allocation2] sm:$0xff] (!%p916_p12), %v1307_v16  ;;  %338 = vst [vmem:[#allocation2 + $0x8] sm:$0xff] (!%p916_p12), %v1307_v16 }
  0x2e   : > { %336 = sbr.rel (%p916_p12) target bundleno = 53 (0x35), region = 78  ;;  %339 = vst [vmem:[#allocation2 + $0x10] sm:$0xff] (!%p916_p12), %v1307_v16  ;;  %340 = vst [vmem:[#allocation2 + $0x18] sm:$0xff] (!%p916_p12), %v1307_v16 }
  0x2f   : > { %341 = vst [vmem:[#allocation2 + $0x20] sm:$0xff] (!%p916_p12), %v1307_v16  ;;  %342 = vst [vmem:[#allocation2 + $0x28] sm:$0xff] (!%p916_p12), %v1307_v16 }
  0x30   : > { %343 = vst [vmem:[#allocation2 + $0x30] sm:$0xff] (!%p916_p12), %v1307_v16  ;;  %344 = vst [vmem:[#allocation2 + $0x38] sm:$0xff] (!%p916_p12), %v1307_v16 }
  0x31   : > { %345 = vst [vmem:[#allocation2 + $0x40] sm:$0xff] (!%p916_p12), %v1307_v16  ;;  %346 = vst [vmem:[#allocation2 + $0x48] sm:$0xff] (!%p916_p12), %v1307_v16 }
  0x32   : > { %347 = vst [vmem:[#allocation2 + $0x50] sm:$0xff] (!%p916_p12), %v1307_v16  ;;  %348 = vst [vmem:[#allocation2 + $0x58] sm:$0xff] (!%p916_p12), %v1307_v16 }
  0x33   : > { %349 = vst [vmem:[#allocation2 + $0x60] sm:$0xff] (!%p916_p12), %v1307_v16  ;;  %350 = vst [vmem:[#allocation2 + $0x68] sm:$0xff] (!%p916_p12), %v1307_v16 }
  0x34   : > { %351 = vst [vmem:[#allocation2 + $0x70] sm:$0xff] (!%p916_p12), %v1307_v16  ;;  %352 = vst [vmem:[#allocation2 + $0x78] sm:$0xff] (!%p916_p12), %v1307_v16 }
  0x35 PF: > { %v385_v17 = vld [vmem:[%s1419_s29] sm:$0xff]  ;;  %v386_v18 = vld [vmem:[%s1419_s29 + $0x8] sm:$0xff]  ;;  %v387_v19 = vld [vmem:[%s1419_s29 + $0x10] sm:$0xff]  ;;  %p917_p13 = scmp.ne.s32.totalorder %s1289_s17, 1 }
  0x36   : > { %v1098_v20 = vpack.c.bf16 %v386_v18, %v385_v17  ;;  %v388_v21 = vld [vmem:[%s1419_s29 + $0x18] sm:$0xff]  ;;  %v389_v23 = vld [vmem:[%s1419_s29 + $0x20] sm:$0xff]  ;;  %v390_v24 = vld [vmem:[%s1419_s29 + $0x28] sm:$0xff] }
  0x37   : > { %v1102_v22 = vpack.c.bf16 %v388_v21, %v387_v19  ;;  %v1106_v25 = vpack.c.bf16 %v390_v24, %v389_v23  ;;  %v369_v26 = vld [vmem:[%s1426_s15] sm:$0xff]  ;;  %v391_v28 = vld [vmem:[%s1419_s29 + $0x30] sm:$0xff]  ;;  %v392_v29 = vld [vmem:[%s1419_s29 + $0x38] sm:$0xff] }
  0x38   : > { %1099 = vmatprep.subr.bf16.mxu0 %v1098_v20  ;;  %1162 = vmatprep.subr.bf16.mxu1 %v1098_v20  ;;  %v377_v27 = vld [vmem:[%s1426_s15 + $0x40] sm:$0xff]  ;;  %v1110_v30 = vpack.c.bf16 %v392_v29, %v391_v28  ;;  %v394_v32 = vld [vmem:[%s1419_s29 + $0x48] sm:$0xff]  ;;  %v395_v34 = vld [vmem:[%s1419_s29 + $0x50] sm:$0xff] }
  0x39   : > { %1101 = vmatpush3.bf16.msra.mxu0 %v1098_v20  ;;  %1170 = vmatpush3.bf16.msra.mxu1 %v1098_v20  ;;  %v393_v31 = vld [vmem:[%s1419_s29 + $0x40] sm:$0xff]  ;;  %v396_v35 = vld [vmem:[%s1419_s29 + $0x58] sm:$0xff]  ;;  %v398_v38 = vld [vmem:[%s1419_s29 + $0x68] sm:$0xff] }
  0x3a   : > { %1103 = vmatprep.subr.bf16.mxu0 %v1102_v22  ;;  %1163 = vmatprep.subr.bf16.mxu1 %v1102_v22  ;;  %v1114_v33 = vpack.c.bf16 %v394_v32, %v393_v31  ;;  %v1118_v36 = vpack.c.bf16 %v396_v35, %v395_v34  ;;  %v397_v37 = vld [vmem:[%s1419_s29 + $0x60] sm:$0xff]  ;;  %v399_v40 = vld [vmem:[%s1419_s29 + $0x70] sm:$0xff]  ;;  %v400_v41 = vld [vmem:[%s1419_s29 + $0x78] sm:$0xff] }
  0x3b   : > { %1018 = vmatprep.mubr.f32.mxu0 %v369_v26  ;;  %1030 = vmatprep.mubr.f32.mxu1 %v377_v27  ;;  %v1122_v39 = vpack.c.bf16 %v398_v38, %v397_v37  ;;  %v1126_v42 = vpack.c.bf16 %v400_v41, %v399_v40  ;;  %v370_v43 = vld [vmem:[%s1426_s15 + $0x8] sm:$0xff]  ;;  %v371_v45 = vld [vmem:[%s1426_s15 + $0x10] sm:$0xff]  ;;  %v372_v47 = vld [vmem:[%s1426_s15 + $0x18] sm:$0xff] }
  0x3c   : > { %v378_v44 = vld [vmem:[%s1426_s15 + $0x48] sm:$0xff]  ;;  %v379_v46 = vld [vmem:[%s1426_s15 + $0x50] sm:$0xff]  ;;  %v380_v48 = vld [vmem:[%s1426_s15 + $0x58] sm:$0xff] }
  0x3d   : > { %1105 = vmatpush3.bf16.msra.mxu0 %v1102_v22  ;;  %1171 = vmatpush3.bf16.msra.mxu1 %v1102_v22  ;;  %v373_v49 = vld [vmem:[%s1426_s15 + $0x20] sm:$0xff]  ;;  %v374_v51 = vld [vmem:[%s1426_s15 + $0x28] sm:$0xff]  ;;  %v375_v53 = vld [vmem:[%s1426_s15 + $0x30] sm:$0xff] }
  0x3e   : > { %1107 = vmatprep.subr.bf16.mxu0 %v1106_v25  ;;  %1164 = vmatprep.subr.bf16.mxu1 %v1106_v25  ;;  %v381_v50 = vld [vmem:[%s1426_s15 + $0x60] sm:$0xff]  ;;  %v382_v52 = vld [vmem:[%s1426_s15 + $0x68] sm:$0xff]  ;;  %v383_v54 = vld [vmem:[%s1426_s15 + $0x70] sm:$0xff] }
  0x3f   : > { %v376_v55 = vld [vmem:[%s1426_s15 + $0x38] sm:$0xff]  ;;  %v354_v57 = vld [vmem:[#allocation2 + $0x8] sm:$0xff]  ;;  %v353_v59 = vld [vmem:[#allocation2] sm:$0xff] }
  0x40   : > { %v384_v56 = vld [vmem:[%s1426_s15 + $0x78] sm:$0xff]  ;;  %v362_v58 = vld [vmem:[#allocation2 + $0x48] sm:$0xff]  ;;  %v361_v60 = vld [vmem:[#allocation2 + $0x40] sm:$0xff] }
  0x41   : > { %1109 = vmatpush3.bf16.msra.mxu0 %v1106_v25  ;;  %1172 = vmatpush3.bf16.msra.mxu1 %v1106_v25  ;;  %v356_v5 = vld [vmem:[#allocation2 + $0x18] sm:$0xff]  ;;  %v355_v7 = vld [vmem:[#allocation2 + $0x10] sm:$0xff]  ;;  %v358_v17 = vld [vmem:[#allocation2 + $0x28] sm:$0xff] }
  0x42   : > { %1111 = vmatprep.subr.bf16.mxu0 %v1110_v30  ;;  %1165 = vmatprep.subr.bf16.mxu1 %v1110_v30  ;;  %v364_v6 = vld [vmem:[#allocation2 + $0x58] sm:$0xff]  ;;  %v363_v8 = vld [vmem:[#allocation2 + $0x50] sm:$0xff]  ;;  %v366_v18 = vld [vmem:[#allocation2 + $0x68] sm:$0xff] }
  0x43   : > { %v357_v19 = vld [vmem:[#allocation2 + $0x20] sm:$0xff]  ;;  %v360_v29 = vld [vmem:[#allocation2 + $0x38] sm:$0xff]  ;;  %v359_v31 = vld [vmem:[#allocation2 + $0x30] sm:$0xff] }
  0x44   : > { %v365_v20 = vld [vmem:[#allocation2 + $0x60] sm:$0xff]  ;;  %v367_v32 = vld [vmem:[#allocation2 + $0x70] sm:$0xff] }
  0x45   : > { %1113 = vmatpush3.bf16.msra.mxu0 %v1110_v30  ;;  %1173 = vmatpush3.bf16.msra.mxu1 %v1110_v30  ;;  %v368_v30 = vld [vmem:[#allocation2 + $0x78] sm:$0xff]  ;;  %v637_v41 = vld [vmem:[%s1571_s3] sm:$0xff] (!%p917_p13) }
  0x46   : > { %1115 = vmatprep.subr.bf16.mxu0 %v1114_v33  ;;  %1166 = vmatprep.subr.bf16.mxu1 %v1114_v33 }
  0x49   : > { %1117 = vmatpush3.bf16.msra.mxu0 %v1114_v33  ;;  %1174 = vmatpush3.bf16.msra.mxu1 %v1114_v33 }
  0x4a   : > { %1119 = vmatprep.subr.bf16.mxu0 %v1118_v36  ;;  %1167 = vmatprep.subr.bf16.mxu1 %v1118_v36 }
  0x4d   : > { %1121 = vmatpush3.bf16.msra.mxu0 %v1118_v36  ;;  %1175 = vmatpush3.bf16.msra.mxu1 %v1118_v36 }
  0x4e   : > { %1123 = vmatprep.subr.bf16.mxu0 %v1122_v39  ;;  %1168 = vmatprep.subr.bf16.mxu1 %v1122_v39 }
  0x51   : > { %1125 = vmatpush3.bf16.msra.mxu0 %v1122_v39  ;;  %1176 = vmatpush3.bf16.msra.mxu1 %v1122_v39 }
  0x52   : > { %1127 = vmatprep.subr.bf16.mxu0 %v1126_v42  ;;  %1169 = vmatprep.subr.bf16.mxu1 %v1126_v42 }
  0x55   : > { %1129 = vmatpush3.bf16.msra.mxu0 %v1126_v42  ;;  %1177 = vmatpush3.bf16.msra.mxu1 %v1126_v42  ;;  %v638_v42 = vld [vmem:[%s1571_s3 + $0x8] sm:$0xff] (!%p917_p13) }
  0x58   : > { %1019 = vmatmul.mubr.f32.vlgmr.msra.gmra.mrb[0].mxu0 %v370_v43  ;;  %1031 = vmatmul.mubr.f32.vlgmr.msra.gmra.mrb[0].mxu1 %v378_v44  ;;  %v639_v43 = vld [vmem:[%s1571_s3 + $0x10] sm:$0xff] (!%p917_p13)  ;;  %v1130_v44 = vpack.c.bf16 (!%p917_p13), %v638_v42, %v637_v41 }
  0x59   : > { %1021 = vmatprep.mubr.f32.mxu0 %v371_v45  ;;  %1033 = vmatprep.mubr.f32.mxu1 %v379_v46  ;;  %v640_v45 = vld [vmem:[%s1571_s3 + $0x18] sm:$0xff] (!%p917_p13) }
  0x5a   : > { %v1134_v46 = vpack.c.bf16 (!%p917_p13), %v640_v45, %v639_v43  ;;  %1131 = vmatprep.subr.bf16.mxu0 (!%p917_p13), %v1130_v44  ;;  %1178 = vmatprep.subr.bf16.mxu1 (!%p917_p13), %v1130_v44 }
  0x5b   : > { %1133 = vmatpush3.bf16.msra.mxu0 (!%p917_p13), %v1130_v44  ;;  %1186 = vmatpush3.bf16.msra.mxu1 (!%p917_p13), %v1130_v44 }
  0x5c   : > { %1022 = vmatmul.mubr.f32.gmra.mrb[2].mxu0 %v372_v47  ;;  %1034 = vmatmul.mubr.f32.gmra.mrb[2].mxu1 %v380_v48  ;;  %v641_v47 = vld [vmem:[%s1571_s3 + $0x20] sm:$0xff] (!%p917_p13)  ;;  %v642_v48 = vld [vmem:[%s1571_s3 + $0x28] sm:$0xff] (!%p917_p13) }
  0x5d   : > { %1024 = vmatprep.mubr.f32.mxu0 %v373_v49  ;;  %1036 = vmatprep.mubr.f32.mxu1 %v381_v50  ;;  %v1138_v49 = vpack.c.bf16 (!%p917_p13), %v642_v48, %v641_v47 }
  0x5e   : > { %1135 = vmatprep.subr.bf16.mxu0 (!%p917_p13), %v1134_v46  ;;  %1179 = vmatprep.subr.bf16.mxu1 (!%p917_p13), %v1134_v46 }
  0x5f   : > { %1137 = vmatpush3.bf16.msra.mxu0 (!%p917_p13), %v1134_v46  ;;  %1187 = vmatpush3.bf16.msra.mxu1 (!%p917_p13), %v1134_v46 }
  0x60   : > { %1025 = vmatmul.mubr.f32.gmra.mrb[4].mxu0 %v374_v51  ;;  %1037 = vmatmul.mubr.f32.gmra.mrb[4].mxu1 %v382_v52  ;;  %v1483_v51 = vld [vmem:[%s1570_s2] ss:$0 sm:$0xff] (!%p917_p13)  ;;  %v643_v52 = vld [vmem:[%s1571_s3 + $0x30] sm:$0xff] (!%p917_p13) }
  0x61   : > { %1027 = vmatprep.mubr.f32.mxu0 %v375_v53  ;;  %1039 = vmatprep.mubr.f32.mxu1 %v383_v54  ;;  %v644_v53 = vld [vmem:[%s1571_s3 + $0x38] sm:$0xff] (!%p917_p13) }
  0x62   : > { %1139 = vmatprep.subr.bf16.mxu0 (!%p917_p13), %v1138_v49  ;;  %1180 = vmatprep.subr.bf16.mxu1 (!%p917_p13), %v1138_v49 }
  0x63   : > { %1141 = vmatpush3.bf16.msra.mxu0 (!%p917_p13), %v1138_v49  ;;  %1188 = vmatpush3.bf16.msra.mxu1 (!%p917_p13), %v1138_v49 }
  0x64   : > { %1028 = vmatmul.mubr.f32.gmra.mrb[6].mxu0 %v376_v55  ;;  %1040 = vmatmul.mubr.f32.gmra.mrb[6].mxu1 %v384_v56 }
 0x12b   : > { %v1020_v61 = vpop.f32.mrb[0].mxu0  ;;  %v1032_v62 = vpop.f32.mrb[0].mxu1 }
 0x12c   : > { %v547_v63 = vadd.f32 %v1020_v61, %v354_v57  ;;  %v555_v0 = vadd.f32 %v1032_v62, %v362_v58  ;;  %v467_v1 = vpop.f32.mrb[1].mxu0  ;;  %v507_v2 = vpop.f32.mrb[1].mxu1  ;;  %v1142_v58 = vpack.c.bf16 (!%p917_p13), %v644_v53, %v643_v52  ;;  %v646_v61 = vld [vmem:[%s1571_s3 + $0x48] sm:$0xff] (!%p917_p13) }
 0x12d   : > { %v546_v3 = vadd.f32 %v467_v1, %v353_v59  ;;  %v554_v4 = vadd.f32 %v507_v2, %v361_v60  ;;  %v645_v60 = vld [vmem:[%s1571_s3 + $0x40] sm:$0xff] (!%p917_p13) }
 0x12e   : > { %563 = vst [vmem:[#allocation2 + $0x8] sm:$0xff] %v547_v63  ;;  %571 = vst [vmem:[#allocation2 + $0x48] sm:$0xff] %v555_v0  ;;  %1143 = vmatprep.subr.bf16.mxu0 (!%p917_p13), %v1142_v58  ;;  %1181 = vmatprep.subr.bf16.mxu1 (!%p917_p13), %v1142_v58  ;;  %v1146_v62 = vpack.c.bf16 (!%p917_p13), %v646_v61, %v645_v60  ;;  %v647_v63 = vld [vmem:[%s1571_s3 + $0x50] sm:$0xff] (!%p917_p13)  ;;  %v648_v0 = vld [vmem:[%s1571_s3 + $0x58] sm:$0xff] (!%p917_p13) }
 0x12f   : > { %562 = vst [vmem:[#allocation2] sm:$0xff] %v546_v3  ;;  %570 = vst [vmem:[#allocation2 + $0x40] sm:$0xff] %v554_v4  ;;  %v1023_v9 = vpop.f32.mrb[2].mxu0  ;;  %v1035_v10 = vpop.f32.mrb[2].mxu1  ;;  %1145 = vmatpush3.bf16.msra.mxu0 (!%p917_p13), %v1142_v58  ;;  %1189 = vmatpush3.bf16.msra.mxu1 (!%p917_p13), %v1142_v58  ;;  %v1150_v1 = vpack.c.bf16 (!%p917_p13), %v648_v0, %v647_v63  ;;  %v649_v2 = vld [vmem:[%s1571_s3 + $0x60] sm:$0xff] (!%p917_p13)  ;;  %v650_v3 = vld [vmem:[%s1571_s3 + $0x68] sm:$0xff] (!%p917_p13) }
 0x130   : > { %v549_v11 = vadd.f32 %v1023_v9, %v356_v5  ;;  %v557_v12 = vadd.f32 %v1035_v10, %v364_v6  ;;  %v477_v13 = vpop.f32.mrb[3].mxu0  ;;  %v517_v14 = vpop.f32.mrb[3].mxu1  ;;  %1147 = vmatprep.subr.bf16.mxu0 (!%p917_p13), %v1146_v62  ;;  %1182 = vmatprep.subr.bf16.mxu1 (!%p917_p13), %v1146_v62  ;;  %v1154_v4 = vpack.c.bf16 (!%p917_p13), %v650_v3, %v649_v2  ;;  %v651_v5 = vld [vmem:[%s1571_s3 + $0x70] sm:$0xff] (!%p917_p13)  ;;  %v652_v6 = vld [vmem:[%s1571_s3 + $0x78] sm:$0xff] (!%p917_p13) }
 0x131   : > { %v548_v15 = vadd.f32 %v477_v13, %v355_v7  ;;  %v556_v16 = vadd.f32 %v517_v14, %v363_v8  ;;  %v1158_v9 = vpack.c.bf16 (!%p917_p13), %v652_v6, %v651_v5 }
 0x132   : > { %565 = vst [vmem:[#allocation2 + $0x18] sm:$0xff] %v549_v11  ;;  %573 = vst [vmem:[#allocation2 + $0x58] sm:$0xff] %v557_v12 }
 0x133   : > { %564 = vst [vmem:[#allocation2 + $0x10] sm:$0xff] %v548_v15  ;;  %572 = vst [vmem:[#allocation2 + $0x50] sm:$0xff] %v556_v16  ;;  %v1026_v21 = vpop.f32.mrb[4].mxu0  ;;  %v1038_v22 = vpop.f32.mrb[4].mxu1  ;;  %1149 = vmatpush3.bf16.msra.mxu0 (!%p917_p13), %v1146_v62  ;;  %1190 = vmatpush3.bf16.msra.mxu1 (!%p917_p13), %v1146_v62 }
 0x134   : > { %v551_v23 = vadd.f32 %v1026_v21, %v358_v17  ;;  %v559_v24 = vadd.f32 %v1038_v22, %v366_v18  ;;  %v487_v25 = vpop.f32.mrb[5].mxu0  ;;  %v527_v26 = vpop.f32.mrb[5].mxu1  ;;  %1151 = vmatprep.subr.bf16.mxu0 (!%p917_p13), %v1150_v1  ;;  %1183 = vmatprep.subr.bf16.mxu1 (!%p917_p13), %v1150_v1 }
 0x135   : > { %v550_v27 = vadd.f32 %v487_v25, %v357_v19  ;;  %v558_v28 = vadd.f32 %v527_v26, %v365_v20  ;;  %581 = sbr.rel (%p917_p13) target bundleno = 549 (0x225), region = 82  ;;  %v583_v7 = vld [vmem:[#allocation2 + $0x8] sm:$0xff] (!%p917_p13) }
 0x136   : > { %567 = vst [vmem:[#allocation2 + $0x28] sm:$0xff] %v551_v23  ;;  %575 = vst [vmem:[#allocation2 + $0x68] sm:$0xff] %v559_v24  ;;  %v582_v50 = vld [vmem:[#allocation2] sm:$0xff] (!%p917_p13)  ;;  %v591_v8 = vld [vmem:[#allocation2 + $0x48] sm:$0xff] (!%p917_p13)  ;;  %v606_v12 = vadd.f32 (!%p917_p13), %v1483_v51, %v583_v7 }
 0x137   : > { %566 = vst [vmem:[#allocation2 + $0x20] sm:$0xff] %v550_v27  ;;  %574 = vst [vmem:[#allocation2 + $0x60] sm:$0xff] %v558_v28  ;;  %v1029_v33 = vpop.f32.mrb[6].mxu0  ;;  %v1041_v34 = vpop.f32.mrb[6].mxu1  ;;  %v605_v54 = vadd.f32 (!%p917_p13), %v1483_v51, %v582_v50  ;;  %v590_v55 = vld [vmem:[#allocation2 + $0x40] sm:$0xff] (!%p917_p13)  ;;  %1153 = vmatpush3.bf16.msra.mxu0 (!%p917_p13), %v1150_v1  ;;  %1191 = vmatpush3.bf16.msra.mxu1 (!%p917_p13), %v1150_v1  ;;  %v614_v13 = vadd.f32 (!%p917_p13), %v1483_v51, %v591_v8 }
 0x138   : > { %v553_v35 = vadd.f32 %v1029_v33, %v360_v29  ;;  %v561_v36 = vadd.f32 %v1041_v34, %v368_v30  ;;  %v497_v37 = vpop.f32.mrb[7].mxu0  ;;  %v537_v38 = vpop.f32.mrb[7].mxu1  ;;  %v613_v56 = vadd.f32 (!%p917_p13), %v1483_v51, %v590_v55  ;;  %1155 = vmatprep.subr.bf16.mxu0 (!%p917_p13), %v1154_v4  ;;  %1184 = vmatprep.subr.bf16.mxu1 (!%p917_p13), %v1154_v4  ;;  %v622_v20 = vmax.f32 (!%p917_p13), %v606_v12, 0.0 }
 0x139   : > { %v552_v39 = vadd.f32 %v497_v37, %v359_v31  ;;  %v560_v40 = vadd.f32 %v537_v38, %v367_v32  ;;  %v621_v57 = vmax.f32 (!%p917_p13), %v605_v54, 0.0  ;;  %v585_v16 = vld [vmem:[#allocation2 + $0x18] sm:$0xff] (!%p917_p13)  ;;  %v630_v21 = vmax.f32 (!%p917_p13), %v614_v13, 0.0 }
 0x13a   : > { %569 = vst [vmem:[#allocation2 + $0x38] sm:$0xff] %v553_v35  ;;  %577 = vst [vmem:[#allocation2 + $0x78] sm:$0xff] %v561_v36  ;;  %v629_v59 = vmax.f32 (!%p917_p13), %v613_v56, 0.0  ;;  %v584_v10 = vld [vmem:[#allocation2 + $0x10] sm:$0xff] (!%p917_p13)  ;;  %v593_v17 = vld [vmem:[#allocation2 + $0x58] sm:$0xff] (!%p917_p13)  ;;  %v608_v22 = vadd.f32 (!%p917_p13), %v1483_v51, %v585_v16 }
 0x13b   : > { %568 = vst [vmem:[#allocation2 + $0x30] sm:$0xff] %v552_v39  ;;  %576 = vst [vmem:[#allocation2 + $0x70] sm:$0xff] %v560_v40  ;;  %1074 = vmatprep.mubr.f32.mxu0 (!%p917_p13), %v621_v57  ;;  %v592_v11 = vld [vmem:[#allocation2 + $0x50] sm:$0xff] (!%p917_p13)  ;;  %1157 = vmatpush3.bf16.msra.mxu0 (!%p917_p13), %v1154_v4  ;;  %v607_v14 = vadd.f32 (!%p917_p13), %v1483_v51, %v584_v10  ;;  %v616_v23 = vadd.f32 (!%p917_p13), %v1483_v51, %v593_v17 }
 0x13c   : > { %1086 = vmatprep.mubr.f32.mxu1 %v629_v59  ;;  %1192 = vmatpush3.bf16.msra.mxu1 %v1154_v4  ;;  %v615_v15 = vadd.f32 %v1483_v51, %v592_v11  ;;  %v624_v32 = vmax.f32 %v608_v22, 0.0 }
 0x13d   : > { %1159 = vmatprep.subr.bf16.mxu0 %v1158_v9  ;;  %1185 = vmatprep.subr.bf16.mxu1 %v1158_v9  ;;  %v623_v24 = vmax.f32 %v607_v14, 0.0  ;;  %v587_v28 = vld [vmem:[#allocation2 + $0x28] sm:$0xff]  ;;  %v632_v33 = vmax.f32 %v616_v23, 0.0 }
 0x13e   : > { %v586_v18 = vld [vmem:[#allocation2 + $0x20] sm:$0xff]  ;;  %v631_v25 = vmax.f32 %v615_v15, 0.0  ;;  %v595_v29 = vld [vmem:[#allocation2 + $0x68] sm:$0xff]  ;;  %v610_v34 = vadd.f32 %v1483_v51, %v587_v28 }
 0x13f   : > { %v594_v19 = vld [vmem:[#allocation2 + $0x60] sm:$0xff]  ;;  %1161 = vmatpush3.bf16.msra.mxu0 %v1158_v9  ;;  %v609_v26 = vadd.f32 %v1483_v51, %v586_v18  ;;  %v618_v35 = vadd.f32 %v1483_v51, %v595_v29 }
 0x140   : > { %1193 = vmatpush3.bf16.msra.mxu1 %v1158_v9  ;;  %v617_v27 = vadd.f32 %v1483_v51, %v594_v19  ;;  %v626_v42 = vmax.f32 %v610_v34, 0.0 }
 0x141   : > { %v625_v36 = vmax.f32 %v609_v26, 0.0  ;;  %v589_v40 = vld [vmem:[#allocation2 + $0x38] sm:$0xff]  ;;  %v634_v43 = vmax.f32 %v618_v35, 0.0 }
 0x142   : > { %v588_v30 = vld [vmem:[#allocation2 + $0x30] sm:$0xff]  ;;  %1075 = vmatmul.mubr.f32.vlgmr.msra.gmra.mrb[0].mxu0 %v622_v20  ;;  %v633_v37 = vmax.f32 %v617_v27, 0.0  ;;  %v597_v41 = vld [vmem:[#allocation2 + $0x78] sm:$0xff]  ;;  %v612_v44 = vadd.f32 %v1483_v51, %v589_v40 }
 0x143   : > { %v596_v31 = vld [vmem:[#allocation2 + $0x70] sm:$0xff]  ;;  %1087 = vmatmul.mubr.f32.vlgmr.msra.gmra.mrb[0].mxu1 %v630_v21  ;;  %1077 = vmatprep.mubr.f32.mxu0 %v623_v24  ;;  %v611_v38 = vadd.f32 %v1483_v51, %v588_v30  ;;  %v620_v45 = vadd.f32 %v1483_v51, %v597_v41 }
 0x144   : > { %1089 = vmatprep.mubr.f32.mxu1 %v631_v25  ;;  %v619_v39 = vadd.f32 %v1483_v51, %v596_v31  ;;  %v628_v48 = vmax.f32 %v612_v44, 0.0 }
 0x145   : > { %v627_v46 = vmax.f32 %v611_v38, 0.0  ;;  %v636_v49 = vmax.f32 %v620_v45, 0.0 }
 0x146   : > { %1078 = vmatmul.mubr.f32.gmra.mrb[2].mxu0 %v624_v32  ;;  %v635_v47 = vmax.f32 %v619_v39, 0.0 }
 0x147   : > { %1090 = vmatmul.mubr.f32.gmra.mrb[2].mxu1 %v632_v33  ;;  %1080 = vmatprep.mubr.f32.mxu0 %v625_v36 }
 0x148   : > { %1092 = vmatprep.mubr.f32.mxu1 %v633_v37 }
 0x14a   : > { %1081 = vmatmul.mubr.f32.gmra.mrb[4].mxu0 %v626_v42 }
 0x14b   : > { %1093 = vmatmul.mubr.f32.gmra.mrb[4].mxu1 %v634_v43  ;;  %1083 = vmatprep.mubr.f32.mxu0 %v627_v46 }
 0x14c   : > { %1095 = vmatprep.mubr.f32.mxu1 %v635_v47 }
 0x14e   : > { %1084 = vmatmul.mubr.f32.gmra.mrb[6].mxu0 %v628_v48 }
 0x14f   : > { %1096 = vmatmul.mubr.f32.gmra.mrb[6].mxu1 %v636_v49 }
 0x215   : > { %v1076_v50 = vpop.f32.mrb[0].mxu0 }
 0x216   : > { %v1088_v51 = vpop.f32.mrb[0].mxu1  ;;  %799 = vst [vmem:[%s1424_s7 + $0x8] sm:$0xff] %v1076_v50  ;;  %v719_v52 = vpop.f32.mrb[1].mxu0 }
 0x217   : > { %807 = vst [vmem:[%s1424_s7 + $0x48] sm:$0xff] %v1088_v51  ;;  %v759_v53 = vpop.f32.mrb[1].mxu1  ;;  %798 = vst [vmem:[%s1424_s7] sm:$0xff] %v719_v52 }
 0x218   : > { %806 = vst [vmem:[%s1424_s7 + $0x40] sm:$0xff] %v759_v53 }
 0x219   : > { %v1079_v54 = vpop.f32.mrb[2].mxu0 }
 0x21a   : > { %v1091_v55 = vpop.f32.mrb[2].mxu1  ;;  %801 = vst [vmem:[%s1424_s7 + $0x18] sm:$0xff] %v1079_v54  ;;  %v729_v56 = vpop.f32.mrb[3].mxu0 }
 0x21b   : > { %809 = vst [vmem:[%s1424_s7 + $0x58] sm:$0xff] %v1091_v55  ;;  %v769_v57 = vpop.f32.mrb[3].mxu1  ;;  %800 = vst [vmem:[%s1424_s7 + $0x10] sm:$0xff] %v729_v56 }
 0x21c   : > { %808 = vst [vmem:[%s1424_s7 + $0x50] sm:$0xff] %v769_v57 }
 0x21d   : > { %v1082_v58 = vpop.f32.mrb[4].mxu0 }
 0x21e   : > { %v1094_v59 = vpop.f32.mrb[4].mxu1  ;;  %803 = vst [vmem:[%s1424_s7 + $0x28] sm:$0xff] %v1082_v58  ;;  %v739_v60 = vpop.f32.mrb[5].mxu0 }
 0x21f   : > { %811 = vst [vmem:[%s1424_s7 + $0x68] sm:$0xff] %v1094_v59  ;;  %v779_v61 = vpop.f32.mrb[5].mxu1  ;;  %802 = vst [vmem:[%s1424_s7 + $0x20] sm:$0xff] %v739_v60 }
 0x220   : > { %810 = vst [vmem:[%s1424_s7 + $0x60] sm:$0xff] %v779_v61 }
 0x221   : > { %v1085_v62 = vpop.f32.mrb[6].mxu0 }
 0x222   : > { %v1097_v63 = vpop.f32.mrb[6].mxu1  ;;  %805 = vst [vmem:[%s1424_s7 + $0x38] sm:$0xff] %v1085_v62  ;;  %v749_v0 = vpop.f32.mrb[7].mxu0 }
 0x223   : > { %813 = vst [vmem:[%s1424_s7 + $0x78] sm:$0xff] %v1097_v63  ;;  %v789_v1 = vpop.f32.mrb[7].mxu1  ;;  %804 = vst [vmem:[%s1424_s7 + $0x30] sm:$0xff] %v749_v0 }
 0x224   : > { %812 = vst [vmem:[%s1424_s7 + $0x70] sm:$0xff] %v789_v1 }
 0x225 PF: > { %s14_s21 = sadd.s32 1, %s1305_s21   ;;  %s1573_s15 = smov %s1285_s16 }
 0x226   : > { %p11_p0 = scmp.ge.s32.totalorder %s14_s21, 6   ;;  %s1574_s16 = smov %s1384_s28 }
 0x227   : > { %s1575_s17 = smov %s1297_s19  ;;  %s1576_s18 = smov %s1301_s20 }
 0x228   : > { %s1577_s19 = smov %s1580_s22  ;;  %s1578_s20 = smov %s1584_s23 }
 0x229   :  { %13 = sbr.rel (!%p11_p0) target bundleno = 4 (0x4), region = 120 }

// kernel: dominant_forward.8
= control target key start
LH: loop header
LB: loop body
LE: loop exit
PB: predicated region body
PF: predicated region fallthrough
CT: control target
= control target key end

     0   :  { %s1301_s15 = smov 0   ;;  %s1303_s16 = smov 0   ;;  %s1616_s0 = inlined_call_operand.vmem [shape: f32[256,256], index: 0, kind: input, shape index: {}]   ;;  %s1617_s1 = inlined_call_operand.vmem [shape: f32[256,128], index: 1, kind: input, shape index: {}]   ;;  %s1618_s2 = inlined_call_operand.vmem [shape: f32[1,128], index: 2, kind: input, shape index: {}]   ;;  %s1619_s3 = inlined_call_operand.vmem [shape: f32[128,256], index: 3, kind: input, shape index: {}]   ;;  %s1620_s4 = inlined_call_operand.vmem [shape: f32[256,256], index: 4, kind: output, shape index: {}]  }
   0x1   :  { %s1305_s17 = smov 0   ;;  %s1307_s18 = smov 0  }
   0x2   :  { %s1309_s19 = smov 0   ;;  %s1311_s20 = smov 0  }
   0x3   :  { %s1313_s21 = smov 0  }
   0x4 LB: > { %s23_s22 = sadd.s32 1, %s1264_s19  ;;  %s26_s23 = sadd.s32 1, %s1268_s20  ;;  %s1272_s21 = sphi %s1313_s21, %s14_s21   ;;  %s1268_s20 = sphi %s1311_s20, %s1626_s20   ;;  %s1264_s19 = sphi %s1309_s19, %s1625_s19   ;;  %s1260_s18 = sphi %s1307_s18, %s1624_s18   ;;  %s1256_s17 = sphi %s1305_s17, %s1623_s17   ;;  %s1252_s16 = sphi %s1303_s16, %s1622_s16   ;;  %s1248_s15 = sphi %s1301_s15, %s1621_s15  }
   0x5   : > { %p24_p0 = scmp.ge.s32.totalorder %s23_s22, 2  ;;  %p42_p1 = scmp.ne.s32.totalorder %s1252_s16, %s1248_s15 }
   0x6   : > { %p43_p2 = scmp.eq.s32.totalorder %s1272_s21, 0  ;;  %s35_s27 = sadd.s32 1, %s1252_s16 }
   0x7   : > { %s1628_s22 = smov (%p24_p0, %s23_s22), 0  ;;  %s1630_s23 = smov (!%p24_p0, %s26_s23), %s1268_s20 }
   0x8   : > { %p44_p3 = por %p43_p2, %p42_p1  ;;  %p28_p4 = scmp.ge.s32.totalorder %s1630_s23, 2 }
   0x9   : > { %s31_s24 = ssub.s32 %s1264_s19, %s1628_s22  ;;  %p957_p6 = scmp.ge.s32.totalorder %s1272_s21, 4 }
   0xa   : > { %s1632_s23 = smov (%p28_p4, %s1630_s23), 0 }
   0xb   : > { %s30_s25 = ssub.s32 %s1268_s20, %s1632_s23  ;;  %168 = sbr.rel (%p957_p6) target bundleno = 32 (0x20), region = 24 }
   0xc   : > { %s32_s26 = sor.u32 %s31_s24, %s30_s25 }
   0xd   : > { %p33_p5 = scmp.eq.s32.totalorder %s32_s26, 0 }
   0xf   : > { %s1352_s28 = scalar_select %p33_p5, %s1252_s16, %s35_s27  }
  0x12   : > { %171 = sbr.rel (!%p44_p3) target bundleno = 32 (0x20), region = 28  ;;  %s173_s29 = sand.u32 (%p44_p3), 1, %s1252_s16  }
  0x13   : > { %s974_s30 = sshll.u32 (%p44_p3), %s1268_s20, 5  ;;  %s958_s5 = sshll.u32 (%p44_p3), %s173_s29, 7 }
  0x14   : > { %s178_s6 = sadd.s32 (%p44_p3), %s1264_s19, %s974_s30  ;;  %s175_s11 = scalar_lea.vmem (%p44_p3), [#allocation3], %s958_s5 }
  0x15   : > { %s961_s7 = sshll.u32 (%p44_p3), %s178_s6, 3 }
  0x16   : > { %s1361_s10 = scalar_lea.vmem (%p44_p3), %s1616_s0, %s961_s7 }
  0x17   : > { %v238_v0 = vld [vmem:[%s1361_s10] sm:$0xff] (%p44_p3)  ;;  %v240_v1 = vld [vmem:[%s1361_s10 + $0x10] sm:$0xff] (%p44_p3) }
  0x18   : > { %v242_v2 = vld [vmem:[%s1361_s10 + $0x20] sm:$0xff] (%p44_p3)  ;;  %239 = vst [vmem:[%s175_s11] sm:$0xff] (%p44_p3), %v238_v0  ;;  %241 = vst [vmem:[%s175_s11 + $0x8] sm:$0xff] (%p44_p3), %v240_v1  ;;  %v244_v3 = vld [vmem:[%s1361_s10 + $0x30] sm:$0xff] (%p44_p3) }
  0x19   : > { %243 = vst [vmem:[%s175_s11 + $0x10] sm:$0xff] %v242_v2  ;;  %v246_v4 = vld [vmem:[%s1361_s10 + $0x40] sm:$0xff]  ;;  %v248_v5 = vld [vmem:[%s1361_s10 + $0x50] sm:$0xff]  ;;  %245 = vst [vmem:[%s175_s11 + $0x18] sm:$0xff] %v244_v3 }
  0x1a   : > { %247 = vst [vmem:[%s175_s11 + $0x20] sm:$0xff] %v246_v4  ;;  %249 = vst [vmem:[%s175_s11 + $0x28] sm:$0xff] %v248_v5  ;;  %v250_v6 = vld [vmem:[%s1361_s10 + $0x60] sm:$0xff]  ;;  %v252_v7 = vld [vmem:[%s1361_s10 + $0x70] sm:$0xff] }
  0x1b   : > { %v254_v8 = vld [vmem:[%s1361_s10 + $0x80] sm:$0xff]  ;;  %251 = vst [vmem:[%s175_s11 + $0x30] sm:$0xff] %v250_v6  ;;  %253 = vst [vmem:[%s175_s11 + $0x38] sm:$0xff] %v252_v7  ;;  %v256_v9 = vld [vmem:[%s1361_s10 + $0x90] sm:$0xff] }
  0x1c   : > { %255 = vst [vmem:[%s175_s11 + $0x40] sm:$0xff] %v254_v8  ;;  %v258_v10 = vld [vmem:[%s1361_s10 + $0xa0] sm:$0xff]  ;;  %v260_v11 = vld [vmem:[%s1361_s10 + $0xb0] sm:$0xff]  ;;  %257 = vst [vmem:[%s175_s11 + $0x48] sm:$0xff] %v256_v9 }
  0x1d   : > { %259 = vst [vmem:[%s175_s11 + $0x50] sm:$0xff] %v258_v10  ;;  %261 = vst [vmem:[%s175_s11 + $0x58] sm:$0xff] %v260_v11  ;;  %v262_v12 = vld [vmem:[%s1361_s10 + $0xc0] sm:$0xff]  ;;  %v264_v13 = vld [vmem:[%s1361_s10 + $0xd0] sm:$0xff] }
  0x1e   : > { %v266_v14 = vld [vmem:[%s1361_s10 + $0xe0] sm:$0xff]  ;;  %263 = vst [vmem:[%s175_s11 + $0x60] sm:$0xff] %v262_v12  ;;  %265 = vst [vmem:[%s175_s11 + $0x68] sm:$0xff] %v264_v13  ;;  %v268_v15 = vld [vmem:[%s1361_s10 + $0xf0] sm:$0xff] }
  0x1f   : > { %267 = vst [vmem:[%s175_s11 + $0x70] sm:$0xff] %v266_v14  ;;  %269 = vst [vmem:[%s175_s11 + $0x78] sm:$0xff] %v268_v15 }
  0x20 PF: > { %p962_p7 = scmp.ge.s32.totalorder %s1272_s21, 1  ;;  %p283_p8 = scmp.lt.s32.totalorder %s1272_s21, 5 }
  0x22   : > { %p284_p9 = pnand %p962_p7, %p283_p8 }
  0x23   : > { %s290_s12 = sand.u32 (!%p284_p9), 1, %s1248_s15   ;;  %s964_s13 = sshll.u32 (!%p284_p9), %s1256_s17, 4 }
  0x24   : > { %287 = sbr.rel (%p284_p9) target bundleno = 568 (0x238), region = 70  ;;  %s963_s14 = sshll.u32 (!%p284_p9), %s290_s12, 7 }
  0x25   : > { %p323_p10 = scmp.lt.s32.totalorder (!%p284_p9), %s964_s13, 31  ;;  %s966_s24 = sshll.u32 (!%p284_p9), %s1260_s18, 4 }
  0x26   : > { %p329_p11 = scmp.lt.s32.totalorder (!%p284_p9), %s966_s24, 31  ;;  %s1394_s15 = scalar_lea.vmem (!%p284_p9), [#allocation3], %s963_s14 }
  0x27   : > { %p969_p12 = scmp.ne.s32.totalorder (!%p284_p9), %s1256_s17, 0 }
  0x2b   : > { %s1634_s13 = smov (!%p323_p10, %s964_s13), 31  ;;  %s1636_s24 = smov (!%p329_p11, %s966_s24), 31 }
  0x2c   : > { %s965_s25 = sshll.u32 %s1634_s13, 3  ;;  %s975_s30 = sshll.u32 %s1636_s24, 4  ;;  %v1274_v16 = vmov (!%p969_p12), 0.0  }
  0x2d   : > { %s1387_s29 = scalar_lea.vmem %s1617_s1, %s965_s25  ;;  %s1392_s7 = scalar_lea.vmem %s1620_s4, %s975_s30  ;;  %339 = vst [vmem:[#allocation2] sm:$0xff] (!%p969_p12), %v1274_v16  ;;  %340 = vst [vmem:[#allocation2 + $0x8] sm:$0xff] (!%p969_p12), %v1274_v16 }
  0x2e   : > { %338 = sbr.rel (%p969_p12) target bundleno = 53 (0x35), region = 78  ;;  %341 = vst [vmem:[#allocation2 + $0x10] sm:$0xff] (!%p969_p12), %v1274_v16  ;;  %342 = vst [vmem:[#allocation2 + $0x18] sm:$0xff] (!%p969_p12), %v1274_v16 }
  0x2f   : > { %343 = vst [vmem:[#allocation2 + $0x20] sm:$0xff] (!%p969_p12), %v1274_v16  ;;  %344 = vst [vmem:[#allocation2 + $0x28] sm:$0xff] (!%p969_p12), %v1274_v16 }
  0x30   : > { %345 = vst [vmem:[#allocation2 + $0x30] sm:$0xff] (!%p969_p12), %v1274_v16  ;;  %346 = vst [vmem:[#allocation2 + $0x38] sm:$0xff] (!%p969_p12), %v1274_v16 }
  0x31   : > { %347 = vst [vmem:[#allocation2 + $0x40] sm:$0xff] (!%p969_p12), %v1274_v16  ;;  %348 = vst [vmem:[#allocation2 + $0x48] sm:$0xff] (!%p969_p12), %v1274_v16 }
  0x32   : > { %349 = vst [vmem:[#allocation2 + $0x50] sm:$0xff] (!%p969_p12), %v1274_v16  ;;  %350 = vst [vmem:[#allocation2 + $0x58] sm:$0xff] (!%p969_p12), %v1274_v16 }
  0x33   : > { %351 = vst [vmem:[#allocation2 + $0x60] sm:$0xff] (!%p969_p12), %v1274_v16  ;;  %352 = vst [vmem:[#allocation2 + $0x68] sm:$0xff] (!%p969_p12), %v1274_v16 }
  0x34   : > { %353 = vst [vmem:[#allocation2 + $0x70] sm:$0xff] (!%p969_p12), %v1274_v16  ;;  %354 = vst [vmem:[#allocation2 + $0x78] sm:$0xff] (!%p969_p12), %v1274_v16 }
  0x35 PF: > { %v387_v17 = vld [vmem:[%s1387_s29] sm:$0xff]  ;;  %v388_v18 = vld [vmem:[%s1387_s29 + $0x8] sm:$0xff]  ;;  %v389_v19 = vld [vmem:[%s1387_s29 + $0x10] sm:$0xff]  ;;  %p970_p13 = scmp.ne.s32.totalorder %s1256_s17, 1 }
  0x36   : > { %v1064_v20 = vpack.c.bf16 %v388_v18, %v387_v17  ;;  %v390_v21 = vld [vmem:[%s1387_s29 + $0x18] sm:$0xff]  ;;  %v391_v23 = vld [vmem:[%s1387_s29 + $0x20] sm:$0xff]  ;;  %v392_v24 = vld [vmem:[%s1387_s29 + $0x28] sm:$0xff] }
  0x37   : > { %v1068_v22 = vpack.c.bf16 %v390_v21, %v389_v19  ;;  %v1072_v25 = vpack.c.bf16 %v392_v24, %v391_v23  ;;  %v371_v26 = vld [vmem:[%s1394_s15] sm:$0xff]  ;;  %v393_v28 = vld [vmem:[%s1387_s29 + $0x30] sm:$0xff]  ;;  %v394_v29 = vld [vmem:[%s1387_s29 + $0x38] sm:$0xff] }
  0x38   : > { %1065 = vmatprep.subr.bf16.mxu0 %v1064_v20  ;;  %1128 = vmatprep.subr.bf16.mxu1 %v1064_v20  ;;  %v379_v27 = vld [vmem:[%s1394_s15 + $0x40] sm:$0xff]  ;;  %v1076_v30 = vpack.c.bf16 %v394_v29, %v393_v28  ;;  %v396_v32 = vld [vmem:[%s1387_s29 + $0x48] sm:$0xff]  ;;  %v397_v34 = vld [vmem:[%s1387_s29 + $0x50] sm:$0xff] }
  0x39   : > { %1067 = vmatpush3.bf16.msra.mxu0 %v1064_v20  ;;  %1136 = vmatpush3.bf16.msra.mxu1 %v1064_v20  ;;  %v395_v31 = vld [vmem:[%s1387_s29 + $0x40] sm:$0xff]  ;;  %v398_v35 = vld [vmem:[%s1387_s29 + $0x58] sm:$0xff]  ;;  %v400_v38 = vld [vmem:[%s1387_s29 + $0x68] sm:$0xff] }
  0x3a   : > { %1069 = vmatprep.subr.bf16.mxu0 %v1068_v22  ;;  %1129 = vmatprep.subr.bf16.mxu1 %v1068_v22  ;;  %v1080_v33 = vpack.c.bf16 %v396_v32, %v395_v31  ;;  %v1084_v36 = vpack.c.bf16 %v398_v35, %v397_v34  ;;  %v399_v37 = vld [vmem:[%s1387_s29 + $0x60] sm:$0xff]  ;;  %v401_v40 = vld [vmem:[%s1387_s29 + $0x70] sm:$0xff]  ;;  %v402_v41 = vld [vmem:[%s1387_s29 + $0x78] sm:$0xff] }
  0x3b   : > { %1040 = vmatprep.mubr.f32.mxu0 %v371_v26  ;;  %1052 = vmatprep.mubr.f32.mxu1 %v379_v27  ;;  %v1088_v39 = vpack.c.bf16 %v400_v38, %v399_v37  ;;  %v1092_v42 = vpack.c.bf16 %v402_v41, %v401_v40  ;;  %v372_v43 = vld [vmem:[%s1394_s15 + $0x8] sm:$0xff]  ;;  %v373_v45 = vld [vmem:[%s1394_s15 + $0x10] sm:$0xff]  ;;  %v374_v47 = vld [vmem:[%s1394_s15 + $0x18] sm:$0xff] }
  0x3c   : > { %v380_v44 = vld [vmem:[%s1394_s15 + $0x48] sm:$0xff]  ;;  %v381_v46 = vld [vmem:[%s1394_s15 + $0x50] sm:$0xff]  ;;  %v382_v48 = vld [vmem:[%s1394_s15 + $0x58] sm:$0xff] }
  0x3d   : > { %1071 = vmatpush3.bf16.msra.mxu0 %v1068_v22  ;;  %1137 = vmatpush3.bf16.msra.mxu1 %v1068_v22  ;;  %v375_v49 = vld [vmem:[%s1394_s15 + $0x20] sm:$0xff]  ;;  %v376_v51 = vld [vmem:[%s1394_s15 + $0x28] sm:$0xff]  ;;  %v377_v53 = vld [vmem:[%s1394_s15 + $0x30] sm:$0xff] }
  0x3e   : > { %1073 = vmatprep.subr.bf16.mxu0 %v1072_v25  ;;  %1130 = vmatprep.subr.bf16.mxu1 %v1072_v25  ;;  %v383_v50 = vld [vmem:[%s1394_s15 + $0x60] sm:$0xff]  ;;  %v384_v52 = vld [vmem:[%s1394_s15 + $0x68] sm:$0xff]  ;;  %v385_v54 = vld [vmem:[%s1394_s15 + $0x70] sm:$0xff] }
  0x3f   : > { %v378_v55 = vld [vmem:[%s1394_s15 + $0x38] sm:$0xff]  ;;  %v356_v57 = vld [vmem:[#allocation2 + $0x8] sm:$0xff]  ;;  %v355_v59 = vld [vmem:[#allocation2] sm:$0xff] }
  0x40   : > { %v386_v56 = vld [vmem:[%s1394_s15 + $0x78] sm:$0xff]  ;;  %v364_v58 = vld [vmem:[#allocation2 + $0x48] sm:$0xff]  ;;  %v363_v60 = vld [vmem:[#allocation2 + $0x40] sm:$0xff] }
  0x41   : > { %1075 = vmatpush3.bf16.msra.mxu0 %v1072_v25  ;;  %1138 = vmatpush3.bf16.msra.mxu1 %v1072_v25  ;;  %v358_v5 = vld [vmem:[#allocation2 + $0x18] sm:$0xff]  ;;  %v357_v7 = vld [vmem:[#allocation2 + $0x10] sm:$0xff]  ;;  %v360_v17 = vld [vmem:[#allocation2 + $0x28] sm:$0xff] }
  0x42   : > { %1077 = vmatprep.subr.bf16.mxu0 %v1076_v30  ;;  %1131 = vmatprep.subr.bf16.mxu1 %v1076_v30  ;;  %v366_v6 = vld [vmem:[#allocation2 + $0x58] sm:$0xff]  ;;  %v365_v8 = vld [vmem:[#allocation2 + $0x50] sm:$0xff]  ;;  %v368_v18 = vld [vmem:[#allocation2 + $0x68] sm:$0xff] }
  0x43   : > { %v359_v19 = vld [vmem:[#allocation2 + $0x20] sm:$0xff]  ;;  %v362_v29 = vld [vmem:[#allocation2 + $0x38] sm:$0xff]  ;;  %v361_v31 = vld [vmem:[#allocation2 + $0x30] sm:$0xff] }
  0x44   : > { %v367_v20 = vld [vmem:[#allocation2 + $0x60] sm:$0xff]  ;;  %v369_v32 = vld [vmem:[#allocation2 + $0x70] sm:$0xff]  ;;  %v640_v41 = vld [vmem:[%s1619_s3 + $0x8] sm:$0xff] (!%p970_p13) }
  0x45   : > { %1079 = vmatpush3.bf16.msra.mxu0 %v1076_v30  ;;  %1139 = vmatpush3.bf16.msra.mxu1 %v1076_v30  ;;  %v370_v30 = vld [vmem:[#allocation2 + $0x78] sm:$0xff] }
  0x46   : > { %1081 = vmatprep.subr.bf16.mxu0 %v1080_v33  ;;  %1132 = vmatprep.subr.bf16.mxu1 %v1080_v33 }
  0x49   : > { %1083 = vmatpush3.bf16.msra.mxu0 %v1080_v33  ;;  %1140 = vmatpush3.bf16.msra.mxu1 %v1080_v33 }
  0x4a   : > { %1085 = vmatprep.subr.bf16.mxu0 %v1084_v36  ;;  %1133 = vmatprep.subr.bf16.mxu1 %v1084_v36 }
  0x4d   : > { %1087 = vmatpush3.bf16.msra.mxu0 %v1084_v36  ;;  %1141 = vmatpush3.bf16.msra.mxu1 %v1084_v36 }
  0x4e   : > { %1089 = vmatprep.subr.bf16.mxu0 %v1088_v39  ;;  %1134 = vmatprep.subr.bf16.mxu1 %v1088_v39 }
  0x51   : > { %1091 = vmatpush3.bf16.msra.mxu0 %v1088_v39  ;;  %1142 = vmatpush3.bf16.msra.mxu1 %v1088_v39 }
  0x52   : > { %1093 = vmatprep.subr.bf16.mxu0 %v1092_v42  ;;  %1135 = vmatprep.subr.bf16.mxu1 %v1092_v42 }
  0x55   : > { %1095 = vmatpush3.bf16.msra.mxu0 %v1092_v42  ;;  %1143 = vmatpush3.bf16.msra.mxu1 %v1092_v42  ;;  %v642_v42 = vld [vmem:[%s1619_s3 + $0x18] sm:$0xff] (!%p970_p13) }
  0x58   : > { %1041 = vmatmul.mubr.f32.vlgmr.msra.gmra.mrb[0].mxu0 %v372_v43  ;;  %1053 = vmatmul.mubr.f32.vlgmr.msra.gmra.mrb[0].mxu1 %v380_v44  ;;  %v639_v43 = vld [vmem:[%s1619_s3] sm:$0xff] (!%p970_p13)  ;;  %v1096_v44 = vpack.c.bf16 (!%p970_p13), %v642_v42, %v640_v41 }
  0x59   : > { %1043 = vmatprep.mubr.f32.mxu0 %v373_v45  ;;  %1055 = vmatprep.mubr.f32.mxu1 %v381_v46  ;;  %v641_v45 = vld [vmem:[%s1619_s3 + $0x10] sm:$0xff] (!%p970_p13)  ;;  %v644_v46 = vld [vmem:[%s1619_s3 + $0x28] sm:$0xff] (!%p970_p13) }
  0x5a   : > { %1097 = vmatprep.subr.bf16.mxu0 (!%p970_p13), %v1096_v44  ;;  %1144 = vmatprep.subr.bf16.mxu1 (!%p970_p13), %v1096_v44 }
  0x5c   : > { %1044 = vmatmul.mubr.f32.gmra.mrb[2].mxu0 %v374_v47  ;;  %1056 = vmatmul.mubr.f32.gmra.mrb[2].mxu1 %v382_v48  ;;  %v646_v47 = vld [vmem:[%s1619_s3 + $0x38] sm:$0xff] (!%p970_p13)  ;;  %v1275_v48 = vmov (!%p970_p13), 0.0  }
  0x5d   : > { %1046 = vmatprep.mubr.f32.mxu0 %v375_v49  ;;  %1058 = vmatprep.mubr.f32.mxu1 %v383_v50  ;;  %v1098_v49 = vpack.c.bf16 (!%p970_p13), %v641_v45, %v639_v43  ;;  %v1100_v50 = vpack.c.bf16 (!%p970_p13), %v646_v47, %v644_v46 }
  0x5f   : > { %1099 = vmatpush1.bf16.msra.mxu0 (!%p970_p13), %v1098_v49  ;;  %1152 = vmatpush1.bf16.msra.mxu1 (!%p970_p13), %v1098_v49 }
  0x60   : > { %1047 = vmatmul.mubr.f32.gmra.mrb[4].mxu0 %v376_v51  ;;  %1059 = vmatmul.mubr.f32.gmra.mrb[4].mxu1 %v384_v52  ;;  %v643_v51 = vld [vmem:[%s1619_s3 + $0x20] sm:$0xff] (!%p970_p13)  ;;  %v645_v52 = vld [vmem:[%s1619_s3 + $0x30] sm:$0xff] (!%p970_p13) }
  0x61   : > { %1049 = vmatprep.mubr.f32.mxu0 %v377_v53  ;;  %1061 = vmatprep.mubr.f32.mxu1 %v385_v54  ;;  %v648_v53 = vld [vmem:[%s1619_s3 + $0x48] sm:$0xff] (!%p970_p13)  ;;  %v650_v54 = vld [vmem:[%s1619_s3 + $0x58] sm:$0xff] (!%p970_p13) }
  0x62   : > { %1101 = vmatprep.subr.bf16.mxu0 (!%p970_p13), %v1100_v50  ;;  %1145 = vmatprep.subr.bf16.mxu1 (!%p970_p13), %v1100_v50 }
  0x64   : > { %1050 = vmatmul.mubr.f32.gmra.mrb[6].mxu0 %v378_v55  ;;  %1062 = vmatmul.mubr.f32.gmra.mrb[6].mxu1 %v386_v56  ;;  %v1102_v55 = vpack.c.bf16 (!%p970_p13), %v645_v52, %v643_v51  ;;  %v1104_v56 = vpack.c.bf16 (!%p970_p13), %v650_v54, %v648_v53 }
  0x65   : > { %735 = vmatprep.mubr.f32.mxu0 (!%p970_p13), %v1275_v48  ;;  %783 = vmatprep.mubr.f32.mxu1 (!%p970_p13), %v1275_v48 }
  0x66   : > { %1103 = vmatpush1.bf16.msra.mxu0 (!%p970_p13), %v1102_v55  ;;  %1153 = vmatpush1.bf16.msra.mxu1 (!%p970_p13), %v1102_v55 }
  0x67   : > { %1105 = vmatprep.subr.bf16.mxu0 (!%p970_p13), %v1104_v56  ;;  %1146 = vmatprep.subr.bf16.mxu1 (!%p970_p13), %v1104_v56 }
 0x12b   : > { %v1042_v61 = vpop.f32.mrb[0].mxu0  ;;  %v1054_v62 = vpop.f32.mrb[0].mxu1 }
 0x12c   : > { %v549_v63 = vadd.f32 %v1042_v61, %v356_v57  ;;  %v557_v0 = vadd.f32 %v1054_v62, %v364_v58  ;;  %v469_v1 = vpop.f32.mrb[1].mxu0  ;;  %v509_v2 = vpop.f32.mrb[1].mxu1  ;;  %v647_v57 = vld [vmem:[%s1619_s3 + $0x40] sm:$0xff] (!%p970_p13)  ;;  %v649_v58 = vld [vmem:[%s1619_s3 + $0x50] sm:$0xff] (!%p970_p13) }
 0x12d   : > { %v548_v3 = vadd.f32 %v469_v1, %v355_v59  ;;  %v556_v4 = vadd.f32 %v509_v2, %v363_v60  ;;  %v652_v59 = vld [vmem:[%s1619_s3 + $0x68] sm:$0xff] (!%p970_p13)  ;;  %v654_v60 = vld [vmem:[%s1619_s3 + $0x78] sm:$0xff] (!%p970_p13)  ;;  %v1106_v61 = vpack.c.bf16 (!%p970_p13), %v649_v58, %v647_v57 }
 0x12e   : > { %565 = vst [vmem:[#allocation2 + $0x8] sm:$0xff] %v549_v63  ;;  %573 = vst [vmem:[#allocation2 + $0x48] sm:$0xff] %v557_v0  ;;  %v1108_v62 = vpack.c.bf16 (!%p970_p13), %v654_v60, %v652_v59  ;;  %v651_v63 = vld [vmem:[%s1619_s3 + $0x60] sm:$0xff] (!%p970_p13)  ;;  %v653_v0 = vld [vmem:[%s1619_s3 + $0x70] sm:$0xff] (!%p970_p13) }
 0x12f   : > { %564 = vst [vmem:[#allocation2] sm:$0xff] %v548_v3  ;;  %572 = vst [vmem:[#allocation2 + $0x40] sm:$0xff] %v556_v4  ;;  %v1045_v9 = vpop.f32.mrb[2].mxu0  ;;  %v1057_v10 = vpop.f32.mrb[2].mxu1  ;;  %v656_v1 = vld [vmem:[%s1619_s3 + $0x88] sm:$0xff] (!%p970_p13)  ;;  %v658_v2 = vld [vmem:[%s1619_s3 + $0x98] sm:$0xff] (!%p970_p13)  ;;  %1107 = vmatpush1.bf16.msra.mxu0 (!%p970_p13), %v1106_v61  ;;  %1154 = vmatpush1.bf16.msra.mxu1 (!%p970_p13), %v1106_v61  ;;  %v1110_v3 = vpack.c.bf16 (!%p970_p13), %v653_v0, %v651_v63 }
 0x130   : > { %v551_v11 = vadd.f32 %v1045_v9, %v358_v5  ;;  %v559_v12 = vadd.f32 %v1057_v10, %v366_v6  ;;  %v479_v13 = vpop.f32.mrb[3].mxu0  ;;  %v519_v14 = vpop.f32.mrb[3].mxu1  ;;  %1109 = vmatprep.subr.bf16.mxu0 (!%p970_p13), %v1108_v62  ;;  %1147 = vmatprep.subr.bf16.mxu1 (!%p970_p13), %v1108_v62  ;;  %v1112_v4 = vpack.c.bf16 (!%p970_p13), %v658_v2, %v656_v1  ;;  %v655_v5 = vld [vmem:[%s1619_s3 + $0x80] sm:$0xff] (!%p970_p13)  ;;  %v657_v6 = vld [vmem:[%s1619_s3 + $0x90] sm:$0xff] (!%p970_p13) }
 0x131   : > { %v550_v15 = vadd.f32 %v479_v13, %v357_v7  ;;  %v558_v16 = vadd.f32 %v519_v14, %v365_v8  ;;  %v660_v7 = vld [vmem:[%s1619_s3 + $0xa8] sm:$0xff] (!%p970_p13)  ;;  %v662_v8 = vld [vmem:[%s1619_s3 + $0xb8] sm:$0xff] (!%p970_p13)  ;;  %v1114_v9 = vpack.c.bf16 (!%p970_p13), %v657_v6, %v655_v5 }
 0x132   : > { %567 = vst [vmem:[#allocation2 + $0x18] sm:$0xff] %v551_v11  ;;  %575 = vst [vmem:[#allocation2 + $0x58] sm:$0xff] %v559_v12  ;;  %v1116_v10 = vpack.c.bf16 (!%p970_p13), %v662_v8, %v660_v7  ;;  %v659_v11 = vld [vmem:[%s1619_s3 + $0xa0] sm:$0xff] (!%p970_p13)  ;;  %v661_v12 = vld [vmem:[%s1619_s3 + $0xb0] sm:$0xff] (!%p970_p13) }
 0x133   : > { %566 = vst [vmem:[#allocation2 + $0x10] sm:$0xff] %v550_v15  ;;  %574 = vst [vmem:[#allocation2 + $0x50] sm:$0xff] %v558_v16  ;;  %v1048_v21 = vpop.f32.mrb[4].mxu0  ;;  %v1060_v22 = vpop.f32.mrb[4].mxu1  ;;  %1111 = vmatpush1.bf16.msra.mxu0 (!%p970_p13), %v1110_v3  ;;  %1155 = vmatpush1.bf16.msra.mxu1 (!%p970_p13), %v1110_v3  ;;  %v664_v13 = vld [vmem:[%s1619_s3 + $0xc8] sm:$0xff] (!%p970_p13)  ;;  %v666_v14 = vld [vmem:[%s1619_s3 + $0xd8] sm:$0xff] (!%p970_p13)  ;;  %v1118_v15 = vpack.c.bf16 (!%p970_p13), %v661_v12, %v659_v11 }
 0x134   : > { %v553_v23 = vadd.f32 %v1048_v21, %v360_v17  ;;  %v561_v24 = vadd.f32 %v1060_v22, %v368_v18  ;;  %v489_v25 = vpop.f32.mrb[5].mxu0  ;;  %v529_v26 = vpop.f32.mrb[5].mxu1  ;;  %1113 = vmatprep.subr.bf16.mxu0 (!%p970_p13), %v1112_v4  ;;  %1148 = vmatprep.subr.bf16.mxu1 (!%p970_p13), %v1112_v4  ;;  %v1120_v16 = vpack.c.bf16 (!%p970_p13), %v666_v14, %v664_v13  ;;  %v663_v17 = vld [vmem:[%s1619_s3 + $0xc0] sm:$0xff] (!%p970_p13)  ;;  %v665_v18 = vld [vmem:[%s1619_s3 + $0xd0] sm:$0xff] (!%p970_p13) }
 0x135   : > { %v552_v27 = vadd.f32 %v489_v25, %v359_v19  ;;  %v560_v28 = vadd.f32 %v529_v26, %v367_v20  ;;  %583 = sbr.rel (%p970_p13) target bundleno = 568 (0x238), region = 82  ;;  %v668_v19 = vld [vmem:[%s1619_s3 + $0xe8] sm:$0xff] (!%p970_p13)  ;;  %v670_v20 = vld [vmem:[%s1619_s3 + $0xf8] sm:$0xff] (!%p970_p13)  ;;  %v1122_v21 = vpack.c.bf16 (!%p970_p13), %v665_v18, %v663_v17  ;;  %v667_v26 = vld [vmem:[%s1619_s3 + $0xe0] sm:$0xff] (!%p970_p13) }
 0x136   : > { %569 = vst [vmem:[#allocation2 + $0x28] sm:$0xff] %v553_v23  ;;  %577 = vst [vmem:[#allocation2 + $0x68] sm:$0xff] %v561_v24  ;;  %v584_v22 = vld [vmem:[#allocation2] sm:$0xff] (!%p970_p13)  ;;  %v1124_v25 = vpack.c.bf16 (!%p970_p13), %v670_v20, %v668_v19 }
 0x137   : > { %568 = vst [vmem:[#allocation2 + $0x20] sm:$0xff] %v552_v27  ;;  %576 = vst [vmem:[#allocation2 + $0x60] sm:$0xff] %v560_v28  ;;  %v1051_v33 = vpop.f32.mrb[6].mxu0  ;;  %v1063_v34 = vpop.f32.mrb[6].mxu1  ;;  %1115 = vmatpush1.bf16.msra.mxu0 (!%p970_p13), %v1114_v9  ;;  %1156 = vmatpush1.bf16.msra.mxu1 (!%p970_p13), %v1114_v9  ;;  %v1525_v23 = vld [vmem:[%s1618_s2] ss:$0 sm:$0xff] (!%p970_p13) }
 0x138   : > { %v555_v35 = vadd.f32 %v1051_v33, %v362_v29  ;;  %v563_v36 = vadd.f32 %v1063_v34, %v370_v30  ;;  %v499_v37 = vpop.f32.mrb[7].mxu0  ;;  %v539_v38 = vpop.f32.mrb[7].mxu1  ;;  %1117 = vmatprep.subr.bf16.mxu0 (!%p970_p13), %v1116_v10  ;;  %1149 = vmatprep.subr.bf16.mxu1 (!%p970_p13), %v1116_v10  ;;  %v592_v24 = vld [vmem:[#allocation2 + $0x40] sm:$0xff] (!%p970_p13)  ;;  %v669_v27 = vld [vmem:[%s1619_s3 + $0xf0] sm:$0xff] (!%p970_p13)  ;;  %v607_v28 = vadd.f32 (!%p970_p13), %v1525_v23, %v584_v22 }
 0x139   : > { %v554_v39 = vadd.f32 %v499_v37, %v361_v31  ;;  %v562_v40 = vadd.f32 %v539_v38, %v369_v32  ;;  %v615_v29 = vadd.f32 (!%p970_p13), %v1525_v23, %v592_v24  ;;  %v1126_v30 = vpack.c.bf16 (!%p970_p13), %v669_v27, %v667_v26  ;;  %v585_v31 = vld [vmem:[#allocation2 + $0x8] sm:$0xff] (!%p970_p13)  ;;  %v587_v43 = vld [vmem:[#allocation2 + $0x18] sm:$0xff] (!%p970_p13) }
 0x13a   : > { %571 = vst [vmem:[#allocation2 + $0x38] sm:$0xff] %v555_v35  ;;  %579 = vst [vmem:[#allocation2 + $0x78] sm:$0xff] %v563_v36  ;;  %v593_v32 = vld [vmem:[#allocation2 + $0x48] sm:$0xff] (!%p970_p13)  ;;  %v623_v33 = vmax.f32 (!%p970_p13), %v607_v28, 0.0  ;;  %v608_v35 = vadd.f32 (!%p970_p13), %v1525_v23, %v585_v31  ;;  %v586_v37 = vld [vmem:[#allocation2 + $0x10] sm:$0xff] (!%p970_p13)  ;;  %v610_v47 = vadd.f32 (!%p970_p13), %v1525_v23, %v587_v43 }
 0x13b   : > { %570 = vst [vmem:[#allocation2 + $0x30] sm:$0xff] %v554_v39  ;;  %578 = vst [vmem:[#allocation2 + $0x70] sm:$0xff] %v562_v40  ;;  %1119 = vmatpush1.bf16.msra.mxu0 (!%p970_p13), %v1118_v15  ;;  %1157 = vmatpush1.bf16.msra.mxu1 (!%p970_p13), %v1118_v15  ;;  %v631_v34 = vmax.f32 (!%p970_p13), %v615_v29, 0.0  ;;  %v616_v36 = vadd.f32 (!%p970_p13), %v1525_v23, %v593_v32  ;;  %v594_v38 = vld [vmem:[#allocation2 + $0x50] sm:$0xff] (!%p970_p13)  ;;  %v609_v41 = vadd.f32 (!%p970_p13), %v1525_v23, %v586_v37  ;;  %v595_v44 = vld [vmem:[#allocation2 + $0x58] sm:$0xff] (!%p970_p13) }
 0x13c   : > { %1121 = vmatprep.subr.bf16.mxu0 %v1120_v16  ;;  %1150 = vmatprep.subr.bf16.mxu1 %v1120_v16  ;;  %v624_v39 = vmax.f32 %v608_v35, 0.0  ;;  %v617_v42 = vadd.f32 %v1525_v23, %v594_v38  ;;  %v618_v49 = vadd.f32 %v1525_v23, %v595_v44  ;;  %v626_v52 = vmax.f32 %v610_v47, 0.0 }
 0x13d   : > { %v632_v40 = vmax.f32 %v616_v36, 0.0  ;;  %v625_v45 = vmax.f32 %v609_v41, 0.0  ;;  %v589_v56 = vld [vmem:[#allocation2 + $0x28] sm:$0xff] }
 0x13e   : > { %v633_v46 = vmax.f32 %v617_v42, 0.0  ;;  %v588_v50 = vld [vmem:[#allocation2 + $0x20] sm:$0xff]  ;;  %v634_v53 = vmax.f32 %v618_v49, 0.0  ;;  %v597_v57 = vld [vmem:[#allocation2 + $0x68] sm:$0xff]  ;;  %v612_v60 = vadd.f32 %v1525_v23, %v589_v56 }
 0x13f   : > { %1123 = vmatpush1.bf16.msra.mxu0 %v1122_v21  ;;  %1158 = vmatpush1.bf16.msra.mxu1 %v1122_v21  ;;  %v596_v51 = vld [vmem:[#allocation2 + $0x60] sm:$0xff]  ;;  %v611_v54 = vadd.f32 %v1525_v23, %v588_v50  ;;  %v620_v61 = vadd.f32 %v1525_v23, %v597_v57 }
 0x140   : > { %1125 = vmatprep.subr.bf16.mxu0 %v1124_v25  ;;  %1151 = vmatprep.subr.bf16.mxu1 %v1124_v25  ;;  %v619_v55 = vadd.f32 %v1525_v23, %v596_v51  ;;  %v628_v0 = vmax.f32 %v612_v60, 0.0 }
 0x141   : > { %v627_v58 = vmax.f32 %v611_v54, 0.0  ;;  %v636_v1 = vmax.f32 %v620_v61, 0.0  ;;  %v591_v4 = vld [vmem:[#allocation2 + $0x38] sm:$0xff] }
 0x142   : > { %v635_v59 = vmax.f32 %v619_v55, 0.0  ;;  %v590_v62 = vld [vmem:[#allocation2 + $0x30] sm:$0xff]  ;;  %v599_v5 = vld [vmem:[#allocation2 + $0x78] sm:$0xff]  ;;  %v614_v8 = vadd.f32 %v1525_v23, %v591_v4 }
 0x143   : > { %1127 = vmatpush1.bf16.msra.mxu0 %v1126_v30  ;;  %1159 = vmatpush1.bf16.msra.mxu1 %v1126_v30  ;;  %v598_v63 = vld [vmem:[#allocation2 + $0x70] sm:$0xff]  ;;  %v613_v2 = vadd.f32 %v1525_v23, %v590_v62  ;;  %v622_v9 = vadd.f32 %v1525_v23, %v599_v5 }
 0x144   : > { %v621_v3 = vadd.f32 %v1525_v23, %v598_v63  ;;  %v630_v10 = vmax.f32 %v614_v8, 0.0 }
 0x145   : > { %v629_v6 = vmax.f32 %v613_v2, 0.0  ;;  %v638_v11 = vmax.f32 %v622_v9, 0.0 }
 0x146   : > { %736 = vmatmul.mubr.f32.vlgmr.msra.gmra.mrb[0].mxu0 %v623_v33  ;;  %784 = vmatmul.mubr.f32.vlgmr.msra.gmra.mrb[0].mxu1 %v631_v34  ;;  %v637_v7 = vmax.f32 %v621_v3, 0.0 }
 0x147   : > { %741 = vmatprep.mubr.f32.mxu0 %v1275_v48  ;;  %789 = vmatprep.mubr.f32.mxu1 %v1275_v48 }
 0x14a   : > { %742 = vmatmul.mubr.f32.gmra.mrb[2].mxu0 %v624_v39  ;;  %790 = vmatmul.mubr.f32.gmra.mrb[2].mxu1 %v632_v40 }
 0x14b   : > { %747 = vmatprep.mubr.f32.mxu0 %v1275_v48  ;;  %795 = vmatprep.mubr.f32.mxu1 %v1275_v48 }
 0x14e   : > { %748 = vmatmul.mubr.f32.gmra.mrb[4].mxu0 %v625_v45  ;;  %796 = vmatmul.mubr.f32.gmra.mrb[4].mxu1 %v633_v46 }
 0x14f   : > { %753 = vmatprep.mubr.f32.mxu0 %v1275_v48  ;;  %801 = vmatprep.mubr.f32.mxu1 %v1275_v48 }
 0x152   : > { %754 = vmatmul.mubr.f32.gmra.mrb[6].mxu0 %v626_v52  ;;  %802 = vmatmul.mubr.f32.gmra.mrb[6].mxu1 %v634_v53 }
 0x153   : > { %759 = vmatprep.mubr.f32.mxu0 %v1275_v48  ;;  %807 = vmatprep.mubr.f32.mxu1 %v1275_v48 }
 0x156   : > { %760 = vmatmul.mubr.f32.gmra.mrb[8].mxu0 %v627_v58  ;;  %808 = vmatmul.mubr.f32.gmra.mrb[8].mxu1 %v635_v59 }
 0x157   : > { %765 = vmatprep.mubr.f32.mxu0 %v1275_v48  ;;  %813 = vmatprep.mubr.f32.mxu1 %v1275_v48 }
 0x15a   : > { %766 = vmatmul.mubr.f32.gmra.mrb[10].mxu0 %v628_v0  ;;  %814 = vmatmul.mubr.f32.gmra.mrb[10].mxu1 %v636_v1 }
 0x15b   : > { %771 = vmatprep.mubr.f32.mxu0 %v1275_v48  ;;  %819 = vmatprep.mubr.f32.mxu1 %v1275_v48 }
 0x15e   : > { %772 = vmatmul.mubr.f32.gmra.mrb[12].mxu0 %v629_v6  ;;  %820 = vmatmul.mubr.f32.gmra.mrb[12].mxu1 %v637_v7 }
 0x15f   : > { %777 = vmatprep.mubr.f32.mxu0 %v1275_v48  ;;  %825 = vmatprep.mubr.f32.mxu1 %v1275_v48 }
 0x162   : > { %778 = vmatmul.mubr.f32.gmra.mrb[14].mxu0 %v630_v10  ;;  %826 = vmatmul.mubr.f32.gmra.mrb[14].mxu1 %v638_v11 }
 0x219   : > { %v737_v12 = vpop.f32.mrb[0].mxu0  ;;  %v785_v13 = vpop.f32.mrb[0].mxu1 }
 0x21a   : > { %832 = vst [vmem:[%s1392_s7] sm:$0xff] %v737_v12  ;;  %848 = vst [vmem:[%s1392_s7 + $0x80] sm:$0xff] %v785_v13  ;;  %v739_v14 = vpop.f32.mrb[1].mxu0  ;;  %v787_v15 = vpop.f32.mrb[1].mxu1 }
 0x21b   : > { %833 = vst [vmem:[%s1392_s7 + $0x8] sm:$0xff] %v739_v14  ;;  %849 = vst [vmem:[%s1392_s7 + $0x88] sm:$0xff] %v787_v15 }
 0x21d   : > { %v743_v16 = vpop.f32.mrb[2].mxu0  ;;  %v791_v17 = vpop.f32.mrb[2].mxu1 }
 0x21e   : > { %834 = vst [vmem:[%s1392_s7 + $0x10] sm:$0xff] %v743_v16  ;;  %850 = vst [vmem:[%s1392_s7 + $0x90] sm:$0xff] %v791_v17  ;;  %v745_v48 = vpop.f32.mrb[3].mxu0  ;;  %v793_v18 = vpop.f32.mrb[3].mxu1 }
 0x21f   : > { %835 = vst [vmem:[%s1392_s7 + $0x18] sm:$0xff] %v745_v48  ;;  %851 = vst [vmem:[%s1392_s7 + $0x98] sm:$0xff] %v793_v18 }
 0x221   : > { %v749_v19 = vpop.f32.mrb[4].mxu0  ;;  %v797_v20 = vpop.f32.mrb[4].mxu1 }
 0x222   : > { %836 = vst [vmem:[%s1392_s7 + $0x20] sm:$0xff] %v749_v19  ;;  %852 = vst [vmem:[%s1392_s7 + $0xa0] sm:$0xff] %v797_v20  ;;  %v751_v21 = vpop.f32.mrb[5].mxu0  ;;  %v799_v22 = vpop.f32.mrb[5].mxu1 }
 0x223   : > { %837 = vst [vmem:[%s1392_s7 + $0x28] sm:$0xff] %v751_v21  ;;  %853 = vst [vmem:[%s1392_s7 + $0xa8] sm:$0xff] %v799_v22 }
 0x225   : > { %v755_v23 = vpop.f32.mrb[6].mxu0  ;;  %v803_v24 = vpop.f32.mrb[6].mxu1 }
 0x226   : > { %838 = vst [vmem:[%s1392_s7 + $0x30] sm:$0xff] %v755_v23  ;;  %854 = vst [vmem:[%s1392_s7 + $0xb0] sm:$0xff] %v803_v24  ;;  %v757_v25 = vpop.f32.mrb[7].mxu0  ;;  %v805_v26 = vpop.f32.mrb[7].mxu1 }
 0x227   : > { %839 = vst [vmem:[%s1392_s7 + $0x38] sm:$0xff] %v757_v25  ;;  %855 = vst [vmem:[%s1392_s7 + $0xb8] sm:$0xff] %v805_v26 }
 0x229   : > { %v761_v27 = vpop.f32.mrb[8].mxu0  ;;  %v809_v28 = vpop.f32.mrb[8].mxu1 }
 0x22a   : > { %840 = vst [vmem:[%s1392_s7 + $0x40] sm:$0xff] %v761_v27  ;;  %856 = vst [vmem:[%s1392_s7 + $0xc0] sm:$0xff] %v809_v28  ;;  %v763_v29 = vpop.f32.mrb[9].mxu0  ;;  %v811_v30 = vpop.f32.mrb[9].mxu1 }
 0x22b   : > { %841 = vst [vmem:[%s1392_s7 + $0x48] sm:$0xff] %v763_v29  ;;  %857 = vst [vmem:[%s1392_s7 + $0xc8] sm:$0xff] %v811_v30 }
 0x22d   : > { %v767_v31 = vpop.f32.mrb[10].mxu0  ;;  %v815_v32 = vpop.f32.mrb[10].mxu1 }
 0x22e   : > { %842 = vst [vmem:[%s1392_s7 + $0x50] sm:$0xff] %v767_v31  ;;  %858 = vst [vmem:[%s1392_s7 + $0xd0] sm:$0xff] %v815_v32  ;;  %v769_v33 = vpop.f32.mrb[11].mxu0  ;;  %v817_v34 = vpop.f32.mrb[11].mxu1 }
 0x22f   : > { %843 = vst [vmem:[%s1392_s7 + $0x58] sm:$0xff] %v769_v33  ;;  %859 = vst [vmem:[%s1392_s7 + $0xd8] sm:$0xff] %v817_v34 }
 0x231   : > { %v773_v35 = vpop.f32.mrb[12].mxu0  ;;  %v821_v36 = vpop.f32.mrb[12].mxu1 }
 0x232   : > { %844 = vst [vmem:[%s1392_s7 + $0x60] sm:$0xff] %v773_v35  ;;  %860 = vst [vmem:[%s1392_s7 + $0xe0] sm:$0xff] %v821_v36  ;;  %v775_v37 = vpop.f32.mrb[13].mxu0  ;;  %v823_v38 = vpop.f32.mrb[13].mxu1 }
 0x233   : > { %845 = vst [vmem:[%s1392_s7 + $0x68] sm:$0xff] %v775_v37  ;;  %861 = vst [vmem:[%s1392_s7 + $0xe8] sm:$0xff] %v823_v38 }
 0x235   : > { %v779_v39 = vpop.f32.mrb[14].mxu0  ;;  %v827_v40 = vpop.f32.mrb[14].mxu1 }
 0x236   : > { %846 = vst [vmem:[%s1392_s7 + $0x70] sm:$0xff] %v779_v39  ;;  %862 = vst [vmem:[%s1392_s7 + $0xf0] sm:$0xff] %v827_v40  ;;  %v781_v41 = vpop.f32.mrb[15].mxu0  ;;  %v829_v42 = vpop.f32.mrb[15].mxu1 }
 0x237   : > { %847 = vst [vmem:[%s1392_s7 + $0x78] sm:$0xff] %v781_v41  ;;  %863 = vst [vmem:[%s1392_s7 + $0xf8] sm:$0xff] %v829_v42 }
 0x238 PF: > { %s14_s21 = sadd.s32 1, %s1272_s21   ;;  %s1621_s15 = smov %s1252_s16 }
 0x239   : > { %p11_p0 = scmp.ge.s32.totalorder %s14_s21, 6   ;;  %s1622_s16 = smov %s1352_s28 }
 0x23a   : > { %s1623_s17 = smov %s1264_s19  ;;  %s1624_s18 = smov %s1268_s20 }
 0x23b   : > { %s1625_s19 = smov %s1628_s22  ;;  %s1626_s20 = smov %s1632_s23 }
 0x23c   :  { %13 = sbr.rel (!%p11_p0) target bundleno = 4 (0x4), region = 120 }

// kernel: dominant_forward.11
= control target key start
LH: loop header
LB: loop body
LE: loop exit
PB: predicated region body
PF: predicated region fallthrough
CT: control target
= control target key end

     0   :  { %7 = vsyncpa [#allocation3], 0  ;;  %s1019_s0 = inlined_call_operand.vmem [shape: f32[256,128], index: 0, kind: input, shape index: {}, may-alias: {0,1}]   ;;  %s1020_s1 = inlined_call_operand.vmem [shape: f32[256,128], index: 1, kind: input, shape index: {}, may-alias: {0,1}]   ;;  %s1021_s2 = inlined_call_operand.hbm [shape: f32[256,256], index: 2, kind: output, shape index: {}]  }
   0x1   :  { %9 = vsyncpa [#allocation3 + $0x1], 0  ;;  %s819_s9 = smov 0   ;;  %s821_s10 = smov 0  }
   0x2   :  { %s823_s11 = smov 0   ;;  %s825_s12 = smov 0  }
   0x3   :  { %s827_s13 = smov 0   ;;  %s829_s14 = smov 0  }
   0x4   :  { %s831_s15 = smov 0   ;;  %s833_s16 = smov 0  }
   0x5 LB: > { %s477_s17 = sadd.s32 4294967295, %s798_s16   ;;  %s478_s18 = sadd.s32 4294967294, %s798_s16   ;;  %s798_s16 = sphi %s833_s16, %s15_s16   ;;  %s794_s15 = sphi %s831_s15, %s1030_s15   ;;  %s790_s14 = sphi %s829_s14, %s1029_s14   ;;  %s786_s13 = sphi %s827_s13, %s1028_s13   ;;  %s782_s12 = sphi %s825_s12, %s1027_s12   ;;  %s778_s11 = sphi %s823_s11, %s1026_s11   ;;  %s774_s10 = sphi %s821_s10, %s1025_s10   ;;  %s770_s9 = sphi %s819_s9, %s1024_s9  }
   0x6   : > { %s24_s19 = sadd.s32 1, %s790_s14  ;;  %s27_s20 = sadd.s32 1, %s794_s15 }
   0x7   : > { %p25_p0 = scmp.ge.s32.totalorder %s24_s19, 2  ;;  %p98_p1 = scmp.ne.s32.totalorder %s778_s11, %s774_s10 }
   0x8   : > { %p99_p2 = scmp.eq.s32.totalorder %s477_s17, 3  ;;  %p104_p5 = scmp.ne.s32.totalorder %s774_s10, %s770_s9 }
   0x9   : > { %s1032_s19 = smov (%p25_p0, %s24_s19), 0  ;;  %s1034_s20 = smov (!%p25_p0, %s27_s20), %s794_s15 }
   0xa   : > { %s84_s21 = ssub.s32 %s790_s14, %s1032_s19  ;;  %p870_p3 = por %p99_p2, %p98_p1 }
   0xb   : > { %p29_p4 = scmp.ge.s32.totalorder %s1034_s20, 2  ;;  %p105_p6 = scmp.eq.s32.totalorder %s478_s18, 3 }
   0xc   : > { %p481_p7 = scmp.ge.s32.totalorder %s798_s16, 1  ;;  %p141_p9 = scmp.lt.s32.totalorder %s798_s16, 5 }
   0xd   : > { %s1036_s20 = smov (%p29_p4, %s1034_s20), 0  ;;  %p879_p8 = por %p105_p6, %p104_p5 }
   0xe   : > { %s83_s24 = ssub.s32 %s794_s15, %s1036_s20  ;;  %s88_s25 = sadd.s32 1, %s778_s11 }
   0xf   : > { %s85_s26 = sor.u32 %s84_s21, %s83_s24  ;;  %p142_p10 = pnand %p481_p7, %p141_p9 }
  0x10   : > { %p86_p11 = scmp.eq.s32.totalorder %s85_s26, 0  ;;  %s485_s28 = sshll.u32 (!%p142_p10), %s782_s12, 4 }
  0x11   : > { %145 = sbr.rel (%p142_p10) target bundleno = 335 (0x14f), region = 28  ;;  %s483_s29 = sshll.u32 (!%p142_p10), %s786_s13, 4 }
  0x12   : > { %s888_s27 = scalar_select %p86_p11, %s778_s11, %s88_s25  }
  0x13   : > { %p175_p12 = scmp.lt.s32.totalorder (!%p142_p10), %s485_s28, 31  ;;  %p169_p13 = scmp.lt.s32.totalorder (!%p142_p10), %s483_s29, 31 }
  0x14   : > { %s165_s18 = sand.u32 (!%p142_p10), 1, %s774_s10   ;;  %s493_s25 = sshll.u32 (!%p142_p10), %s786_s13, 5 }
  0x15   : > { %s482_s21 = sshll.u32 (!%p142_p10), %s165_s18, 7  ;;  %s387_s26 = sadd.s32 (!%p142_p10), %s782_s12, %s493_s25 }
  0x16   : > { %s937_s24 = scalar_lea.vmem (!%p142_p10), [#allocation2], %s482_s21  ;;  %s967_s3 = scalar_lea.sflag (!%p142_p10), [#allocation3], %s165_s18 }
  0x17   : > { %s390_s13 = sshll.u32 (!%p142_p10), %s937_s24, 4  ;;  %s959_s13 = int_to_ptr.vmem [resolvable:$true] %s390_s13 }
  0x18   : > { %s1038_s28 = smov (!%p175_p12, %s485_s28), 31  ;;  %s1040_s29 = smov (!%p169_p13, %s483_s29), 31 }
  0x19   : > { %s486_s30 = sshll.u32 %s1038_s28, 3  ;;  %s484_s6 = sshll.u32 %s1040_s29, 3 }
  0x1a   : > { %s895_s5 = scalar_lea.vmem %s1020_s1, %s486_s30  ;;  %s904_s17 = scalar_lea.vmem %s1019_s0, %s484_s6 }
  0x1b   : > { %v197_v0 = vld [vmem:[%s895_s5] sm:$0xff]  ;;  %v198_v1 = vld [vmem:[%s895_s5 + $0x8] sm:$0xff]  ;;  %v199_v2 = vld [vmem:[%s895_s5 + $0x10] sm:$0xff]  ;;  %s490_s28 = sshll.u32 %s387_s26, 7  ;;  %s704_s4 = scalar_lea.vmem %s959_s13, 2048 }
  0x1c   : > { %v582_v3 = vpack.c.bf16 %v198_v1, %v197_v0  ;;  %v200_v4 = vld [vmem:[%s895_s5 + $0x18] sm:$0xff]  ;;  %v181_v6 = vld [vmem:[%s904_s17] sm:$0xff]  ;;  %v202_v9 = vld [vmem:[%s895_s5 + $0x28] sm:$0xff]  ;;  %s957_s30 = scalar_lea.hbm %s1021_s2, %s490_s28  ;;  %p705_p0 = scmp.ne.s32.totalorder %s959_s13, %s704_s4 }
  0x1d   : > { %v586_v5 = vpack.c.bf16 %v200_v4, %v199_v2  ;;  %v189_v7 = vld [vmem:[%s904_s17 + $0x40] sm:$0xff]  ;;  %558 = vmatprep.mubr.f32.mxu0 %v181_v6  ;;  %v203_v11 = vld [vmem:[%s895_s5 + $0x30] sm:$0xff]  ;;  %v204_v12 = vld [vmem:[%s895_s5 + $0x38] sm:$0xff] }
  0x1e   : > { %583 = vmatprep.subr.bf16.mxu0 %v582_v3  ;;  %614 = vmatprep.subr.bf16.mxu1 %v582_v3  ;;  %v201_v8 = vld [vmem:[%s895_s5 + $0x20] sm:$0xff]  ;;  %v594_v13 = vpack.c.bf16 %v204_v12, %v203_v11  ;;  %v206_v15 = vld [vmem:[%s895_s5 + $0x48] sm:$0xff]  ;;  %v207_v17 = vld [vmem:[%s895_s5 + $0x50] sm:$0xff]  ;;  %p706_p1 = pnand %p705_p0, %p870_p3 }
  0x1f   : > { %585 = vmatpush3.bf16.xpose.msra.mxu0 %v582_v3  ;;  %622 = vmatpush3.bf16.xpose.msra.mxu1 %v582_v3  ;;  %v590_v10 = vpack.c.bf16 %v202_v9, %v201_v8  ;;  %v205_v14 = vld [vmem:[%s895_s5 + $0x40] sm:$0xff]  ;;  %v208_v18 = vld [vmem:[%s895_s5 + $0x58] sm:$0xff]  ;;  %v210_v21 = vld [vmem:[%s895_s5 + $0x68] sm:$0xff] }
  0x20   : > { %587 = vmatprep.subr.bf16.mxu0 %v586_v5  ;;  %615 = vmatprep.subr.bf16.mxu1 %v586_v5  ;;  %v598_v16 = vpack.c.bf16 %v206_v15, %v205_v14  ;;  %v602_v19 = vpack.c.bf16 %v208_v18, %v207_v17  ;;  %v209_v20 = vld [vmem:[%s895_s5 + $0x60] sm:$0xff]  ;;  %v211_v23 = vld [vmem:[%s895_s5 + $0x70] sm:$0xff]  ;;  %v212_v24 = vld [vmem:[%s895_s5 + $0x78] sm:$0xff]  ;;  %p707_p2 = pneg %p706_p1  ;;  %s800_s5 = smov [#allocation2]  }
  0x21   : > { %570 = vmatprep.mubr.f32.mxu1 %v189_v7  ;;  %v606_v22 = vpack.c.bf16 %v210_v21, %v209_v20  ;;  %v610_v25 = vpack.c.bf16 %v212_v24, %v211_v23  ;;  %v182_v26 = vld [vmem:[%s904_s17 + $0x8] sm:$0xff]  ;;  %v183_v28 = vld [vmem:[%s904_s17 + $0x10] sm:$0xff]  ;;  %v184_v30 = vld [vmem:[%s904_s17 + $0x18] sm:$0xff]  ;;  %s708_s6 = sshll.u32 %s800_s5, 4  ;;  %s709_s6 = int_to_ptr.vmem [resolvable:$false] %s708_s6 }
  0x22   : > { %v190_v27 = vld [vmem:[%s904_s17 + $0x48] sm:$0xff]  ;;  %v191_v29 = vld [vmem:[%s904_s17 + $0x50] sm:$0xff]  ;;  %v192_v31 = vld [vmem:[%s904_s17 + $0x58] sm:$0xff]  ;;  %s710_s7 = scalar_lea.vmem %s709_s6, 4096  ;;  %p711_p4 = scmp.lt.s32.totalorder %s959_s13, %s709_s6 }
  0x23   : > { %v185_v32 = vld [vmem:[%s904_s17 + $0x20] sm:$0xff]  ;;  %v186_v34 = vld [vmem:[%s904_s17 + $0x28] sm:$0xff]  ;;  %v187_v36 = vld [vmem:[%s904_s17 + $0x30] sm:$0xff]  ;;  %p712_p5 = scmp.lt.s32.totalorder %s710_s7, %s704_s4 }
  0x24   : > { %v193_v33 = vld [vmem:[%s904_s17 + $0x60] sm:$0xff]  ;;  %v194_v35 = vld [vmem:[%s904_s17 + $0x68] sm:$0xff]  ;;  %v195_v37 = vld [vmem:[%s904_s17 + $0x70] sm:$0xff] }
  0x25   : > { %v188_v38 = vld [vmem:[%s904_s17 + $0x38] sm:$0xff]  ;;  %p713_p6 = por %p712_p5, %p711_p4 }
  0x26   : > { %v196_v39 = vld [vmem:[%s904_s17 + $0x78] sm:$0xff] }
  0x27   : > { %589 = vmatpush3.bf16.xpose.msra.mxu0 %v586_v5  ;;  %623 = vmatpush3.bf16.xpose.msra.mxu1 %v586_v5  ;;  %p714_p7 = pnand %p713_p6, %p707_p2 }
  0x28   : > { %591 = vmatprep.subr.bf16.mxu0 %v590_v10  ;;  %616 = vmatprep.subr.bf16.mxu1 %v590_v10 }
  0x2f   : > { %593 = vmatpush3.bf16.xpose.msra.mxu0 %v590_v10  ;;  %624 = vmatpush3.bf16.xpose.msra.mxu1 %v590_v10 }
  0x30   : > { %595 = vmatprep.subr.bf16.mxu0 %v594_v13  ;;  %617 = vmatprep.subr.bf16.mxu1 %v594_v13 }
  0x37   : > { %597 = vmatpush3.bf16.xpose.msra.mxu0 %v594_v13  ;;  %625 = vmatpush3.bf16.xpose.msra.mxu1 %v594_v13 }
  0x38   : > { %599 = vmatprep.subr.bf16.mxu0 %v598_v16  ;;  %618 = vmatprep.subr.bf16.mxu1 %v598_v16 }
  0x3f   : > { %601 = vmatpush3.bf16.xpose.msra.mxu0 %v598_v16  ;;  %626 = vmatpush3.bf16.xpose.msra.mxu1 %v598_v16 }
  0x40   : > { %603 = vmatprep.subr.bf16.mxu0 %v602_v19  ;;  %619 = vmatprep.subr.bf16.mxu1 %v602_v19 }
  0x47   : > { %605 = vmatpush3.bf16.xpose.msra.mxu0 %v602_v19  ;;  %627 = vmatpush3.bf16.xpose.msra.mxu1 %v602_v19 }
  0x48   : > { %607 = vmatprep.subr.bf16.mxu0 %v606_v22  ;;  %620 = vmatprep.subr.bf16.mxu1 %v606_v22 }
  0x4f   : > { %609 = vmatpush3.bf16.xpose.msra.mxu0 %v606_v22  ;;  %628 = vmatpush3.bf16.xpose.msra.mxu1 %v606_v22 }
  0x50   : > { %611 = vmatprep.subr.bf16.mxu0 %v610_v25  ;;  %621 = vmatprep.subr.bf16.mxu1 %v610_v25 }
  0x57   : > { %613 = vmatpush3.bf16.xpose.msra.mxu0 %v610_v25  ;;  %629 = vmatpush3.bf16.xpose.msra.mxu1 %v610_v25 }
  0x5e   : > { %559 = vmatmul.mubr.f32.vlgmr.msra.gmra.mrb[0].mxu0 %v182_v26  ;;  %571 = vmatmul.mubr.f32.vlgmr.msra.gmra.mrb[0].mxu1 %v190_v27 }
  0x5f   : > { %561 = vmatprep.mubr.f32.mxu0 %v183_v28  ;;  %573 = vmatprep.mubr.f32.mxu1 %v191_v29 }
  0x62   : > { %562 = vmatmul.mubr.f32.gmra.mrb[2].mxu0 %v184_v30  ;;  %574 = vmatmul.mubr.f32.gmra.mrb[2].mxu1 %v192_v31 }
  0x63   : > { %564 = vmatprep.mubr.f32.mxu0 %v185_v32  ;;  %576 = vmatprep.mubr.f32.mxu1 %v193_v33 }
  0x66   : > { %565 = vmatmul.mubr.f32.gmra.mrb[4].mxu0 %v186_v34  ;;  %577 = vmatmul.mubr.f32.gmra.mrb[4].mxu1 %v194_v35 }
  0x67   : > { %567 = vmatprep.mubr.f32.mxu0 %v187_v36  ;;  %579 = vmatprep.mubr.f32.mxu1 %v195_v37 }
  0x6a   : > { %568 = vmatmul.mubr.f32.gmra.mrb[6].mxu0 %v188_v38  ;;  %580 = vmatmul.mubr.f32.gmra.mrb[6].mxu1 %v196_v39 }
 0x131   : > { %v560_v40 = vpop.f32.mrb[0].mxu0  ;;  %v572_v41 = vpop.f32.mrb[0].mxu1 }
 0x132   : > { %359 = vst [vmem:[%s937_s24 + $0x8] sm:$0xff] %v560_v40  ;;  %367 = vst [vmem:[%s937_s24 + $0x48] sm:$0xff] %v572_v41  ;;  %v279_v42 = vpop.f32.mrb[1].mxu0  ;;  %v319_v43 = vpop.f32.mrb[1].mxu1 }
 0x133   : > { %358 = vst [vmem:[%s937_s24] sm:$0xff] %v279_v42  ;;  %366 = vst [vmem:[%s937_s24 + $0x40] sm:$0xff] %v319_v43 }
 0x135   : > { %v563_v44 = vpop.f32.mrb[2].mxu0  ;;  %v575_v45 = vpop.f32.mrb[2].mxu1 }
 0x136   : > { %361 = vst [vmem:[%s937_s24 + $0x18] sm:$0xff] %v563_v44  ;;  %369 = vst [vmem:[%s937_s24 + $0x58] sm:$0xff] %v575_v45  ;;  %v289_v46 = vpop.f32.mrb[3].mxu0  ;;  %v329_v47 = vpop.f32.mrb[3].mxu1 }
 0x137   : > { %360 = vst [vmem:[%s937_s24 + $0x10] sm:$0xff] %v289_v46  ;;  %368 = vst [vmem:[%s937_s24 + $0x50] sm:$0xff] %v329_v47 }
 0x139   : > { %v566_v48 = vpop.f32.mrb[4].mxu0  ;;  %v578_v49 = vpop.f32.mrb[4].mxu1 }
 0x13a   : > { %363 = vst [vmem:[%s937_s24 + $0x28] sm:$0xff] %v566_v48  ;;  %371 = vst [vmem:[%s937_s24 + $0x68] sm:$0xff] %v578_v49  ;;  %v299_v50 = vpop.f32.mrb[5].mxu0  ;;  %v339_v51 = vpop.f32.mrb[5].mxu1 }
 0x13b   : > { %362 = vst [vmem:[%s937_s24 + $0x20] sm:$0xff] %v299_v50  ;;  %370 = vst [vmem:[%s937_s24 + $0x60] sm:$0xff] %v339_v51 }
 0x13d   : > { %v569_v52 = vpop.f32.mrb[6].mxu0  ;;  %v581_v53 = vpop.f32.mrb[6].mxu1 }
 0x13e   : > { %365 = vst [vmem:[%s937_s24 + $0x38] sm:$0xff] %v569_v52  ;;  %373 = vst [vmem:[%s937_s24 + $0x78] sm:$0xff] %v581_v53  ;;  %v309_v54 = vpop.f32.mrb[7].mxu0  ;;  %v349_v55 = vpop.f32.mrb[7].mxu1 }
 0x13f   : > { %364 = vst [vmem:[%s937_s24 + $0x30] sm:$0xff] %v309_v54  ;;  %372 = vst [vmem:[%s937_s24 + $0x70] sm:$0xff] %v349_v55 }
 0x140   : > { %717 = shalt.err (!%p714_p7)
}
 0x141   : > { %s718_s8 = scalar_lea.hbm %s957_s30, 2048  ;;  %s722_s21 = scalar_lea.hbm %s1021_s2, 8192 }
 0x142   : > { %p719_p9 = scmp.ne.s32.totalorder %s957_s30, %s718_s8  ;;  %p723_p12 = scmp.lt.u32.totalorder %s957_s30, %s1021_s2 }
 0x143   : > { %p724_p13 = scmp.lt.u32.totalorder %s722_s21, %s718_s8  ;;  %p726_p1 = scmp.lt.u32.totalorder %s718_s8, %s957_s30 }
 0x144   : > { %p720_p10 = pnand %p719_p9, %p870_p3 }
 0x145   : > { %p725_p0 = por %p724_p13, %p723_p12 }
 0x146   : > { %p721_p11 = pneg %p720_p10 }
 0x147   : > { %p727_p2 = por %p726_p1, %p725_p0 }
 0x149   : > { %p728_p4 = pnand %p727_p2, %p721_p11 }
 0x14b   : > { %731 = shalt.err (!%p728_p4)
}
 0x14c   : > { %s801_s26 = smov 128   ;;  %s802_s28 = smov 256  }
 0x14d   : > { %s803_s12 = smov 8  }
 0x14e   : > { %630 = dma.vmem_to_hbm [thread:$0]  (%p870_p3), %s959_s13, 2048, %s957_s30, %s967_s3, %s801_s26, %s802_s28, %s803_s12  }
 0x14f PF: > { %p636_p5 = scmp.ge.s32.totalorder %s798_s16, 2  ;;  %s405_s29 = sand.u32 1, %s770_s9  }
 0x150   : > { %s406_s4 = scalar_lea.sflag [#allocation3], %s405_s29 }
 0x151   : > { %p633_p6 = pnand %p636_p5, %p879_p8 }
 0x153   : > { %765 = dma.done.wait (!%p633_p6), %s406_s4, 2048  }
 0x154   : > { %767 = vsyncadd (!%p633_p6), %s406_s4, 4294965248  ;;  %s15_s16 = sadd.s32 1, %s798_s16   ;;  %s1024_s9 = smov %s774_s10 }
 0x155   : > { %p12_p7 = scmp.ge.s32.totalorder %s15_s16, 6   ;;  %s1025_s10 = smov %s778_s11 }
 0x156   : > { %s1026_s11 = smov %s888_s27  ;;  %s1027_s12 = smov %s790_s14 }
 0x157   : > { %s1028_s13 = smov %s794_s15  ;;  %s1029_s14 = smov %s1032_s19 }
 0x158   : > { %s1030_s15 = smov %s1036_s20  ;;  %14 = sbr.rel (!%p12_p7) target bundleno = 5 (0x5), region = 66 }
 0x15f   :  { %411 = vsyncpa [#allocation3], 1 }
 0x160   :  { %413 = vsyncpa [#allocation3 + $0x1], 1 }

// kernel: dominant_forward.9
= control target key start
LH: loop header
LB: loop body
LE: loop exit
PB: predicated region body
PF: predicated region fallthrough
CT: control target
= control target key end

     0   :  { %s1498_s18 = smov 0   ;;  %s1500_s19 = smov 0   ;;  %s1798_s0 = inlined_call_operand.vmem [shape: f32[256,256], index: 0, kind: input, shape index: {}]   ;;  %s1799_s1 = inlined_call_operand.vmem [shape: f32[256,256], index: 1, kind: input, shape index: {}]   ;;  %s1800_s2 = inlined_call_operand.vmem [shape: f32[1,256], index: 2, kind: input, shape index: {}]   ;;  %s1801_s3 = inlined_call_operand.vmem [shape: f32[128,128], index: 3, kind: input, shape index: {}]   ;;  %s1802_s4 = inlined_call_operand.vmem [shape: f32[256,128], index: 4, kind: output, shape index: {0}]   ;;  %s1803_s5 = inlined_call_operand.vmem [shape: f32[256,128], index: 5, kind: output, shape index: {1}]  }
   0x1   :  { %s1502_s20 = smov 0   ;;  %s1504_s21 = smov 0  }
   0x2   :  { %s1506_s22 = smov 0   ;;  %s1508_s23 = smov 0  }
   0x3   :  { %s1510_s24 = smov 0  }
   0x4 LB: > { %s25_s25 = sadd.s32 1, %s1456_s22  ;;  %s28_s26 = sadd.s32 1, %s1460_s23  ;;  %s1464_s24 = sphi %s1510_s24, %s16_s24   ;;  %s1460_s23 = sphi %s1508_s23, %s1809_s23   ;;  %s1456_s22 = sphi %s1506_s22, %s1808_s22   ;;  %s1452_s21 = sphi %s1504_s21, %s1807_s21   ;;  %s1448_s20 = sphi %s1502_s20, %s1806_s20   ;;  %s1444_s19 = sphi %s1500_s19, %s1805_s19   ;;  %s1440_s18 = sphi %s1498_s18, %s1804_s18  }
   0x5   : > { %p26_p0 = scmp.ge.s32.totalorder %s25_s25, 2  ;;  %p44_p1 = scmp.ne.s32.totalorder %s1444_s19, %s1440_s18 }
   0x6   : > { %p45_p2 = scmp.eq.s32.totalorder %s1464_s24, 0  ;;  %s37_s30 = sadd.s32 1, %s1444_s19 }
   0x7   : > { %s1811_s25 = smov (%p26_p0, %s25_s25), 0  ;;  %s1813_s26 = smov (!%p26_p0, %s28_s26), %s1460_s23 }
   0x8   : > { %p46_p3 = por %p45_p2, %p44_p1  ;;  %p30_p4 = scmp.ge.s32.totalorder %s1813_s26, 2 }
   0x9   : > { %s33_s27 = ssub.s32 %s1456_s22, %s1811_s25  ;;  %p1148_p6 = scmp.ge.s32.totalorder %s1464_s24, 4 }
   0xa   : > { %s1815_s26 = smov (%p30_p4, %s1813_s26), 0 }
   0xb   : > { %s32_s28 = ssub.s32 %s1460_s23, %s1815_s26  ;;  %196 = sbr.rel (%p1148_p6) target bundleno = 32 (0x20), region = 24 }
   0xc   : > { %s34_s29 = sor.u32 %s33_s27, %s32_s28 }
   0xd   : > { %p35_p5 = scmp.eq.s32.totalorder %s34_s29, 0 }
   0xf   : > { %s1549_s6 = scalar_select %p35_p5, %s1444_s19, %s37_s30  }
  0x12   : > { %199 = sbr.rel (!%p46_p3) target bundleno = 32 (0x20), region = 28  ;;  %s201_s7 = sand.u32 (%p46_p3), 1, %s1444_s19  }
  0x13   : > { %s1166_s8 = sshll.u32 (%p46_p3), %s1460_s23, 5  ;;  %s1149_s9 = sshll.u32 (%p46_p3), %s201_s7, 7 }
  0x14   : > { %s206_s10 = sadd.s32 (%p46_p3), %s1456_s22, %s1166_s8  ;;  %s203_s15 = scalar_lea.vmem (%p46_p3), [#allocation3], %s1149_s9 }
  0x15   : > { %s1152_s11 = sshll.u32 (%p46_p3), %s206_s10, 3 }
  0x16   : > { %s1558_s14 = scalar_lea.vmem (%p46_p3), %s1798_s0, %s1152_s11 }
  0x17   : > { %v266_v0 = vld [vmem:[%s1558_s14] sm:$0xff] (%p46_p3)  ;;  %v268_v1 = vld [vmem:[%s1558_s14 + $0x10] sm:$0xff] (%p46_p3) }
  0x18   : > { %v270_v2 = vld [vmem:[%s1558_s14 + $0x20] sm:$0xff] (%p46_p3)  ;;  %267 = vst [vmem:[%s203_s15] sm:$0xff] (%p46_p3), %v266_v0  ;;  %269 = vst [vmem:[%s203_s15 + $0x8] sm:$0xff] (%p46_p3), %v268_v1  ;;  %v272_v3 = vld [vmem:[%s1558_s14 + $0x30] sm:$0xff] (%p46_p3) }
  0x19   : > { %271 = vst [vmem:[%s203_s15 + $0x10] sm:$0xff] %v270_v2  ;;  %v274_v4 = vld [vmem:[%s1558_s14 + $0x40] sm:$0xff]  ;;  %v276_v5 = vld [vmem:[%s1558_s14 + $0x50] sm:$0xff]  ;;  %273 = vst [vmem:[%s203_s15 + $0x18] sm:$0xff] %v272_v3 }
  0x1a   : > { %275 = vst [vmem:[%s203_s15 + $0x20] sm:$0xff] %v274_v4  ;;  %277 = vst [vmem:[%s203_s15 + $0x28] sm:$0xff] %v276_v5  ;;  %v278_v6 = vld [vmem:[%s1558_s14 + $0x60] sm:$0xff]  ;;  %v280_v7 = vld [vmem:[%s1558_s14 + $0x70] sm:$0xff] }
  0x1b   : > { %v282_v8 = vld [vmem:[%s1558_s14 + $0x80] sm:$0xff]  ;;  %279 = vst [vmem:[%s203_s15 + $0x30] sm:$0xff] %v278_v6  ;;  %281 = vst [vmem:[%s203_s15 + $0x38] sm:$0xff] %v280_v7  ;;  %v284_v9 = vld [vmem:[%s1558_s14 + $0x90] sm:$0xff] }
  0x1c   : > { %283 = vst [vmem:[%s203_s15 + $0x40] sm:$0xff] %v282_v8  ;;  %v286_v10 = vld [vmem:[%s1558_s14 + $0xa0] sm:$0xff]  ;;  %v288_v11 = vld [vmem:[%s1558_s14 + $0xb0] sm:$0xff]  ;;  %285 = vst [vmem:[%s203_s15 + $0x48] sm:$0xff] %v284_v9 }
  0x1d   : > { %287 = vst [vmem:[%s203_s15 + $0x50] sm:$0xff] %v286_v10  ;;  %289 = vst [vmem:[%s203_s15 + $0x58] sm:$0xff] %v288_v11  ;;  %v290_v12 = vld [vmem:[%s1558_s14 + $0xc0] sm:$0xff]  ;;  %v292_v13 = vld [vmem:[%s1558_s14 + $0xd0] sm:$0xff] }
  0x1e   : > { %v294_v14 = vld [vmem:[%s1558_s14 + $0xe0] sm:$0xff]  ;;  %291 = vst [vmem:[%s203_s15 + $0x60] sm:$0xff] %v290_v12  ;;  %293 = vst [vmem:[%s203_s15 + $0x68] sm:$0xff] %v292_v13  ;;  %v296_v15 = vld [vmem:[%s1558_s14 + $0xf0] sm:$0xff] }
  0x1f   : > { %295 = vst [vmem:[%s203_s15 + $0x70] sm:$0xff] %v294_v14  ;;  %297 = vst [vmem:[%s203_s15 + $0x78] sm:$0xff] %v296_v15 }
  0x20 PF: > { %p1153_p7 = scmp.ge.s32.totalorder %s1464_s24, 1  ;;  %p312_p8 = scmp.lt.s32.totalorder %s1464_s24, 5 }
  0x22   : > { %p313_p9 = pnand %p1153_p7, %p312_p8 }
  0x23   : > { %s319_s16 = sand.u32 (!%p313_p9), 1, %s1440_s18   ;;  %s1155_s17 = sshll.u32 (!%p313_p9), %s1448_s20, 4 }
  0x24   : > { %316 = sbr.rel (%p313_p9) target bundleno = 580 (0x244), region = 70  ;;  %s1154_s27 = sshll.u32 (!%p313_p9), %s319_s16, 7 }
  0x25   : > { %p359_p10 = scmp.lt.s32.totalorder (!%p313_p9), %s1155_s17, 31  ;;  %s1158_s28 = sshll.u32 (!%p313_p9), %s1452_s21, 4 }
  0x26   : > { %p366_p11 = scmp.lt.s32.totalorder (!%p313_p9), %s1158_s28, 31  ;;  %s1596_s21 = scalar_lea.vmem (!%p313_p9), [#allocation3], %s1154_s27 }
  0x27   : > { %p1162_p12 = scmp.ne.s32.totalorder (!%p313_p9), %s1448_s20, 0 }
  0x2b   : > { %s1817_s17 = smov (!%p359_p10, %s1155_s17), 31  ;;  %s1819_s28 = smov (!%p366_p11, %s1158_s28), 31 }
  0x2c   : > { %s1167_s29 = sshll.u32 %s1817_s17, 4  ;;  %s1159_s9 = sshll.u32 %s1819_s28, 3  ;;  %v1466_v16 = vmov (!%p1162_p12), 0.0  }
  0x2d   : > { %s1584_s8 = scalar_lea.vmem %s1799_s1, %s1167_s29  ;;  %s1589_s12 = scalar_lea.vmem %s1802_s4, %s1159_s9  ;;  %381 = vst [vmem:[#allocation2] sm:$0xff] (!%p1162_p12), %v1466_v16  ;;  %382 = vst [vmem:[#allocation2 + $0x8] sm:$0xff] (!%p1162_p12), %v1466_v16 }
  0x2e   : > { %s1594_s14 = scalar_lea.vmem %s1803_s5, %s1159_s9  ;;  %380 = sbr.rel (%p1162_p12) target bundleno = 61 (0x3d), region = 78  ;;  %383 = vst [vmem:[#allocation2 + $0x10] sm:$0xff] (!%p1162_p12), %v1466_v16  ;;  %384 = vst [vmem:[#allocation2 + $0x18] sm:$0xff] (!%p1162_p12), %v1466_v16 }
  0x2f   : > { %385 = vst [vmem:[#allocation2 + $0x20] sm:$0xff] (!%p1162_p12), %v1466_v16  ;;  %386 = vst [vmem:[#allocation2 + $0x28] sm:$0xff] (!%p1162_p12), %v1466_v16 }
  0x30   : > { %387 = vst [vmem:[#allocation2 + $0x30] sm:$0xff] (!%p1162_p12), %v1466_v16  ;;  %388 = vst [vmem:[#allocation2 + $0x38] sm:$0xff] (!%p1162_p12), %v1466_v16 }
  0x31   : > { %389 = vst [vmem:[#allocation2 + $0x40] sm:$0xff] (!%p1162_p12), %v1466_v16  ;;  %390 = vst [vmem:[#allocation2 + $0x48] sm:$0xff] (!%p1162_p12), %v1466_v16 }
  0x32   : > { %391 = vst [vmem:[#allocation2 + $0x50] sm:$0xff] (!%p1162_p12), %v1466_v16  ;;  %392 = vst [vmem:[#allocation2 + $0x58] sm:$0xff] (!%p1162_p12), %v1466_v16 }
  0x33   : > { %393 = vst [vmem:[#allocation2 + $0x60] sm:$0xff] (!%p1162_p12), %v1466_v16  ;;  %394 = vst [vmem:[#allocation2 + $0x68] sm:$0xff] (!%p1162_p12), %v1466_v16 }
  0x34   : > { %395 = vst [vmem:[#allocation2 + $0x70] sm:$0xff] (!%p1162_p12), %v1466_v16  ;;  %396 = vst [vmem:[#allocation2 + $0x78] sm:$0xff] (!%p1162_p12), %v1466_v16 }
  0x35   : > { %397 = vst [vmem:[#allocation2 + $0x80] sm:$0xff] %v1466_v16  ;;  %398 = vst [vmem:[#allocation2 + $0x88] sm:$0xff] %v1466_v16 }
  0x36   : > { %399 = vst [vmem:[#allocation2 + $0x90] sm:$0xff] %v1466_v16  ;;  %400 = vst [vmem:[#allocation2 + $0x98] sm:$0xff] %v1466_v16 }
  0x37   : > { %401 = vst [vmem:[#allocation2 + $0xa0] sm:$0xff] %v1466_v16  ;;  %402 = vst [vmem:[#allocation2 + $0xa8] sm:$0xff] %v1466_v16 }
  0x38   : > { %403 = vst [vmem:[#allocation2 + $0xb0] sm:$0xff] %v1466_v16  ;;  %404 = vst [vmem:[#allocation2 + $0xb8] sm:$0xff] %v1466_v16 }
  0x39   : > { %405 = vst [vmem:[#allocation2 + $0xc0] sm:$0xff] %v1466_v16  ;;  %406 = vst [vmem:[#allocation2 + $0xc8] sm:$0xff] %v1466_v16 }
  0x3a   : > { %407 = vst [vmem:[#allocation2 + $0xd0] sm:$0xff] %v1466_v16  ;;  %408 = vst [vmem:[#allocation2 + $0xd8] sm:$0xff] %v1466_v16 }
  0x3b   : > { %409 = vst [vmem:[#allocation2 + $0xe0] sm:$0xff] %v1466_v16  ;;  %410 = vst [vmem:[#allocation2 + $0xe8] sm:$0xff] %v1466_v16 }
  0x3c   : > { %411 = vst [vmem:[#allocation2 + $0xf0] sm:$0xff] %v1466_v16  ;;  %412 = vst [vmem:[#allocation2 + $0xf8] sm:$0xff] %v1466_v16 }
  0x3d PF: > { %v462_v17 = vld [vmem:[%s1584_s8 + $0x8] sm:$0xff]  ;;  %v464_v18 = vld [vmem:[%s1584_s8 + $0x18] sm:$0xff]  ;;  %v461_v19 = vld [vmem:[%s1584_s8] sm:$0xff]  ;;  %v1467_v24 = vmov 0.0   ;;  %p1163_p13 = scmp.ne.s32.totalorder %s1448_s20, 1 }
  0x3e   : > { %v1256_v20 = vpack.c.bf16 %v464_v18, %v462_v17  ;;  %v463_v21 = vld [vmem:[%s1584_s8 + $0x10] sm:$0xff]  ;;  %v466_v22 = vld [vmem:[%s1584_s8 + $0x28] sm:$0xff]  ;;  %v468_v23 = vld [vmem:[%s1584_s8 + $0x38] sm:$0xff]  ;;  %557 = vmatprep.mubr.f32.mxu0 %v1467_v24  ;;  %605 = vmatprep.mubr.f32.mxu1 %v1467_v24 }
  0x3f   : > { %v1258_v25 = vpack.c.bf16 %v463_v21, %v461_v19  ;;  %v1260_v26 = vpack.c.bf16 %v468_v23, %v466_v22  ;;  %v465_v27 = vld [vmem:[%s1584_s8 + $0x20] sm:$0xff]  ;;  %v467_v28 = vld [vmem:[%s1584_s8 + $0x30] sm:$0xff]  ;;  %v470_v29 = vld [vmem:[%s1584_s8 + $0x48] sm:$0xff] }
  0x40   : > { %1257 = vmatprep.subr.bf16.mxu0 %v1256_v20  ;;  %1320 = vmatprep.subr.bf16.mxu1 %v1256_v20  ;;  %v472_v30 = vld [vmem:[%s1584_s8 + $0x58] sm:$0xff]  ;;  %v1262_v31 = vpack.c.bf16 %v467_v28, %v465_v27  ;;  %v469_v33 = vld [vmem:[%s1584_s8 + $0x40] sm:$0xff]  ;;  %v471_v34 = vld [vmem:[%s1584_s8 + $0x50] sm:$0xff] }
  0x41   : > { %1259 = vmatpush1.bf16.msra.mxu0 %v1258_v25  ;;  %1328 = vmatpush1.bf16.msra.mxu1 %v1258_v25  ;;  %v1264_v32 = vpack.c.bf16 %v472_v30, %v470_v29  ;;  %v474_v35 = vld [vmem:[%s1584_s8 + $0x68] sm:$0xff]  ;;  %v476_v36 = vld [vmem:[%s1584_s8 + $0x78] sm:$0xff]  ;;  %v1266_v37 = vpack.c.bf16 %v471_v34, %v469_v33  ;;  %v473_v39 = vld [vmem:[%s1584_s8 + $0x60] sm:$0xff] }
  0x42   : > { %1261 = vmatprep.subr.bf16.mxu0 %v1260_v26  ;;  %1321 = vmatprep.subr.bf16.mxu1 %v1260_v26  ;;  %v1268_v38 = vpack.c.bf16 %v476_v36, %v474_v35  ;;  %v475_v40 = vld [vmem:[%s1584_s8 + $0x70] sm:$0xff]  ;;  %v478_v41 = vld [vmem:[%s1584_s8 + $0x88] sm:$0xff]  ;;  %v480_v42 = vld [vmem:[%s1584_s8 + $0x98] sm:$0xff] }
  0x43   : > { %v1270_v43 = vpack.c.bf16 %v475_v40, %v473_v39  ;;  %v1272_v44 = vpack.c.bf16 %v480_v42, %v478_v41  ;;  %v477_v45 = vld [vmem:[%s1584_s8 + $0x80] sm:$0xff]  ;;  %v479_v46 = vld [vmem:[%s1584_s8 + $0x90] sm:$0xff]  ;;  %v482_v47 = vld [vmem:[%s1584_s8 + $0xa8] sm:$0xff] }
  0x44   : > { %v484_v48 = vld [vmem:[%s1584_s8 + $0xb8] sm:$0xff]  ;;  %v1274_v49 = vpack.c.bf16 %v479_v46, %v477_v45  ;;  %v481_v51 = vld [vmem:[%s1584_s8 + $0xa0] sm:$0xff]  ;;  %v483_v52 = vld [vmem:[%s1584_s8 + $0xb0] sm:$0xff] }
  0x45   : > { %1263 = vmatpush1.bf16.msra.mxu0 %v1262_v31  ;;  %1329 = vmatpush1.bf16.msra.mxu1 %v1262_v31  ;;  %v1276_v50 = vpack.c.bf16 %v484_v48, %v482_v47  ;;  %v486_v53 = vld [vmem:[%s1584_s8 + $0xc8] sm:$0xff]  ;;  %v488_v54 = vld [vmem:[%s1584_s8 + $0xd8] sm:$0xff]  ;;  %v1278_v55 = vpack.c.bf16 %v483_v52, %v481_v51  ;;  %v485_v57 = vld [vmem:[%s1584_s8 + $0xc0] sm:$0xff] }
  0x46   : > { %1265 = vmatprep.subr.bf16.mxu0 %v1264_v32  ;;  %1322 = vmatprep.subr.bf16.mxu1 %v1264_v32  ;;  %v1280_v56 = vpack.c.bf16 %v488_v54, %v486_v53  ;;  %v487_v58 = vld [vmem:[%s1584_s8 + $0xd0] sm:$0xff]  ;;  %v490_v59 = vld [vmem:[%s1584_s8 + $0xe8] sm:$0xff]  ;;  %v492_v60 = vld [vmem:[%s1584_s8 + $0xf8] sm:$0xff] }
  0x47   : > { %v1282_v61 = vpack.c.bf16 %v487_v58, %v485_v57  ;;  %v1284_v62 = vpack.c.bf16 %v492_v60, %v490_v59  ;;  %v489_v63 = vld [vmem:[%s1584_s8 + $0xe0] sm:$0xff]  ;;  %v491_v0 = vld [vmem:[%s1584_s8 + $0xf0] sm:$0xff]  ;;  %v446_v4 = vld [vmem:[%s1596_s21 + $0x8] sm:$0xff] }
  0x48   : > { %v1286_v1 = vpack.c.bf16 %v491_v0, %v489_v63  ;;  %v445_v2 = vld [vmem:[%s1596_s21] sm:$0xff]  ;;  %v454_v5 = vld [vmem:[%s1596_s21 + $0x48] sm:$0xff]  ;;  %v447_v6 = vld [vmem:[%s1596_s21 + $0x10] sm:$0xff] }
  0x49   : > { %1267 = vmatpush1.bf16.msra.mxu0 %v1266_v37  ;;  %1330 = vmatpush1.bf16.msra.mxu1 %v1266_v37  ;;  %v453_v3 = vld [vmem:[%s1596_s21 + $0x40] sm:$0xff]  ;;  %v455_v7 = vld [vmem:[%s1596_s21 + $0x50] sm:$0xff]  ;;  %v448_v8 = vld [vmem:[%s1596_s21 + $0x18] sm:$0xff] }
  0x4a   : > { %1269 = vmatprep.subr.bf16.mxu0 %v1268_v38  ;;  %1323 = vmatprep.subr.bf16.mxu1 %v1268_v38  ;;  %v456_v9 = vld [vmem:[%s1596_s21 + $0x58] sm:$0xff]  ;;  %v449_v10 = vld [vmem:[%s1596_s21 + $0x20] sm:$0xff]  ;;  %v450_v12 = vld [vmem:[%s1596_s21 + $0x28] sm:$0xff] }
  0x4b   : > { %v457_v11 = vld [vmem:[%s1596_s21 + $0x60] sm:$0xff]  ;;  %v458_v13 = vld [vmem:[%s1596_s21 + $0x68] sm:$0xff]  ;;  %v451_v14 = vld [vmem:[%s1596_s21 + $0x30] sm:$0xff] }
  0x4c   : > { %v459_v15 = vld [vmem:[%s1596_s21 + $0x70] sm:$0xff]  ;;  %v452_v16 = vld [vmem:[%s1596_s21 + $0x38] sm:$0xff]  ;;  %v413_v18 = vld [vmem:[#allocation2] sm:$0xff] }
  0x4d   : > { %1271 = vmatpush1.bf16.msra.mxu0 %v1270_v43  ;;  %1331 = vmatpush1.bf16.msra.mxu1 %v1270_v43  ;;  %v460_v17 = vld [vmem:[%s1596_s21 + $0x78] sm:$0xff]  ;;  %v429_v19 = vld [vmem:[#allocation2 + $0x80] sm:$0xff]  ;;  %v414_v20 = vld [vmem:[#allocation2 + $0x8] sm:$0xff] }
  0x4e   : > { %1273 = vmatprep.subr.bf16.mxu0 %v1272_v44  ;;  %1324 = vmatprep.subr.bf16.mxu1 %v1272_v44  ;;  %v430_v21 = vld [vmem:[#allocation2 + $0x88] sm:$0xff]  ;;  %v415_v31 = vld [vmem:[#allocation2 + $0x10] sm:$0xff]  ;;  %v432_v33 = vld [vmem:[#allocation2 + $0x98] sm:$0xff] }
  0x4f   : > { %v431_v32 = vld [vmem:[#allocation2 + $0x90] sm:$0xff]  ;;  %v417_v42 = vld [vmem:[#allocation2 + $0x20] sm:$0xff]  ;;  %v418_v44 = vld [vmem:[#allocation2 + $0x28] sm:$0xff] }
  0x50   : > { %v433_v43 = vld [vmem:[#allocation2 + $0xa0] sm:$0xff]  ;;  %v434_v45 = vld [vmem:[#allocation2 + $0xa8] sm:$0xff]  ;;  %v419_v54 = vld [vmem:[#allocation2 + $0x30] sm:$0xff] }
  0x51   : > { %1275 = vmatpush1.bf16.msra.mxu0 %v1274_v49  ;;  %1332 = vmatpush1.bf16.msra.mxu1 %v1274_v49  ;;  %v436_v57 = vld [vmem:[#allocation2 + $0xb8] sm:$0xff] }
  0x52   : > { %1277 = vmatprep.subr.bf16.mxu0 %v1276_v50  ;;  %1325 = vmatprep.subr.bf16.mxu1 %v1276_v50 }
  0x55   : > { %1279 = vmatpush1.bf16.msra.mxu0 %v1278_v55  ;;  %1333 = vmatpush1.bf16.msra.mxu1 %v1278_v55  ;;  %v435_v55 = vld [vmem:[#allocation2 + $0xb0] sm:$0xff] }
  0x56   : > { %1281 = vmatprep.subr.bf16.mxu0 %v1280_v56  ;;  %1326 = vmatprep.subr.bf16.mxu1 %v1280_v56  ;;  %v420_v56 = vld [vmem:[#allocation2 + $0x38] sm:$0xff] }
  0x59   : > { %1283 = vmatpush1.bf16.msra.mxu0 %v1282_v61  ;;  %1334 = vmatpush1.bf16.msra.mxu1 %v1282_v61 }
  0x5a   : > { %1285 = vmatprep.subr.bf16.mxu0 %v1284_v62  ;;  %1327 = vmatprep.subr.bf16.mxu1 %v1284_v62 }
  0x5d   : > { %1287 = vmatpush1.bf16.msra.mxu0 %v1286_v1  ;;  %1335 = vmatpush1.bf16.msra.mxu1 %v1286_v1 }
  0x60   : > { %558 = vmatmul.mubr.f32.vlgmr.msra.gmra.mrb[0].mxu0 %v445_v2  ;;  %606 = vmatmul.mubr.f32.vlgmr.msra.gmra.mrb[0].mxu1 %v453_v3  ;;  %v421_v2 = vld [vmem:[#allocation2 + $0x40] sm:$0xff] }
  0x61   : > { %563 = vmatprep.mubr.f32.mxu0 %v1467_v24  ;;  %611 = vmatprep.mubr.f32.mxu1 %v1467_v24  ;;  %v437_v3 = vld [vmem:[#allocation2 + $0xc0] sm:$0xff] }
  0x64   : > { %564 = vmatmul.mubr.f32.gmra.mrb[2].mxu0 %v446_v4  ;;  %612 = vmatmul.mubr.f32.gmra.mrb[2].mxu1 %v454_v5  ;;  %v422_v4 = vld [vmem:[#allocation2 + $0x48] sm:$0xff] }
  0x65   : > { %569 = vmatprep.mubr.f32.mxu0 %v1467_v24  ;;  %617 = vmatprep.mubr.f32.mxu1 %v1467_v24  ;;  %v438_v5 = vld [vmem:[#allocation2 + $0xc8] sm:$0xff] }
  0x68   : > { %570 = vmatmul.mubr.f32.gmra.mrb[4].mxu0 %v447_v6  ;;  %618 = vmatmul.mubr.f32.gmra.mrb[4].mxu1 %v455_v7 }
  0x69   : > { %575 = vmatprep.mubr.f32.mxu0 %v1467_v24  ;;  %623 = vmatprep.mubr.f32.mxu1 %v1467_v24 }
  0x6c   : > { %576 = vmatmul.mubr.f32.gmra.mrb[6].mxu0 %v448_v8  ;;  %624 = vmatmul.mubr.f32.gmra.mrb[6].mxu1 %v456_v9 }
  0x6d   : > { %581 = vmatprep.mubr.f32.mxu0 %v1467_v24  ;;  %629 = vmatprep.mubr.f32.mxu1 %v1467_v24 }
  0x70   : > { %582 = vmatmul.mubr.f32.gmra.mrb[8].mxu0 %v449_v10  ;;  %630 = vmatmul.mubr.f32.gmra.mrb[8].mxu1 %v457_v11 }
  0x71   : > { %587 = vmatprep.mubr.f32.mxu0 %v1467_v24  ;;  %635 = vmatprep.mubr.f32.mxu1 %v1467_v24 }
  0x74   : > { %588 = vmatmul.mubr.f32.gmra.mrb[10].mxu0 %v450_v12  ;;  %636 = vmatmul.mubr.f32.gmra.mrb[10].mxu1 %v458_v13 }
  0x75   : > { %593 = vmatprep.mubr.f32.mxu0 %v1467_v24  ;;  %641 = vmatprep.mubr.f32.mxu1 %v1467_v24 }
  0x78   : > { %594 = vmatmul.mubr.f32.gmra.mrb[12].mxu0 %v451_v14  ;;  %642 = vmatmul.mubr.f32.gmra.mrb[12].mxu1 %v459_v15  ;;  %v423_v14 = vld [vmem:[#allocation2 + $0x50] sm:$0xff] }
  0x79   : > { %599 = vmatprep.mubr.f32.mxu0 %v1467_v24  ;;  %647 = vmatprep.mubr.f32.mxu1 %v1467_v24  ;;  %v416_v24 = vld [vmem:[#allocation2 + $0x18] sm:$0xff]  ;;  %v439_v15 = vld [vmem:[#allocation2 + $0xd0] sm:$0xff] }
  0x7c   : > { %600 = vmatmul.mubr.f32.gmra.mrb[14].mxu0 %v452_v16  ;;  %648 = vmatmul.mubr.f32.gmra.mrb[14].mxu1 %v460_v17  ;;  %v424_v16 = vld [vmem:[#allocation2 + $0x58] sm:$0xff] }
  0x7d   : > { %v440_v17 = vld [vmem:[#allocation2 + $0xd8] sm:$0xff] }
 0x133   : > { %v559_v22 = vpop.f32.mrb[0].mxu0  ;;  %v607_v23 = vpop.f32.mrb[0].mxu1 }
 0x134   : > { %v654_v25 = vadd.f32 %v559_v22, %v413_v18  ;;  %v670_v26 = vadd.f32 %v607_v23, %v429_v19  ;;  %v561_v27 = vpop.f32.mrb[1].mxu0  ;;  %v609_v28 = vpop.f32.mrb[1].mxu1 }
 0x135   : > { %v655_v29 = vadd.f32 %v561_v27, %v414_v20  ;;  %v671_v30 = vadd.f32 %v609_v28, %v430_v21  ;;  %v425_v27 = vld [vmem:[#allocation2 + $0x60] sm:$0xff] }
 0x136   : > { %686 = vst [vmem:[#allocation2] sm:$0xff] %v654_v25  ;;  %702 = vst [vmem:[#allocation2 + $0x80] sm:$0xff] %v670_v26  ;;  %v441_v28 = vld [vmem:[#allocation2 + $0xe0] sm:$0xff] }
 0x137   : > { %687 = vst [vmem:[#allocation2 + $0x8] sm:$0xff] %v655_v29  ;;  %703 = vst [vmem:[#allocation2 + $0x88] sm:$0xff] %v671_v30  ;;  %v565_v34 = vpop.f32.mrb[2].mxu0  ;;  %v613_v35 = vpop.f32.mrb[2].mxu1  ;;  %v426_v29 = vld [vmem:[#allocation2 + $0x68] sm:$0xff] }
 0x138   : > { %v656_v36 = vadd.f32 %v565_v34, %v415_v31  ;;  %v672_v37 = vadd.f32 %v613_v35, %v431_v32  ;;  %v567_v38 = vpop.f32.mrb[3].mxu0  ;;  %v615_v39 = vpop.f32.mrb[3].mxu1  ;;  %v442_v30 = vld [vmem:[#allocation2 + $0xe8] sm:$0xff] }
 0x139   : > { %v657_v40 = vadd.f32 %v567_v38, %v416_v24  ;;  %v673_v41 = vadd.f32 %v615_v39, %v432_v33  ;;  %v427_v38 = vld [vmem:[#allocation2 + $0x70] sm:$0xff] }
 0x13a   : > { %688 = vst [vmem:[#allocation2 + $0x10] sm:$0xff] %v656_v36  ;;  %704 = vst [vmem:[#allocation2 + $0x90] sm:$0xff] %v672_v37  ;;  %v443_v39 = vld [vmem:[#allocation2 + $0xf0] sm:$0xff] }
 0x13b   : > { %689 = vst [vmem:[#allocation2 + $0x18] sm:$0xff] %v657_v40  ;;  %705 = vst [vmem:[#allocation2 + $0x98] sm:$0xff] %v673_v41  ;;  %v571_v46 = vpop.f32.mrb[4].mxu0  ;;  %v619_v47 = vpop.f32.mrb[4].mxu1  ;;  %v428_v40 = vld [vmem:[#allocation2 + $0x78] sm:$0xff] }
 0x13c   : > { %v658_v48 = vadd.f32 %v571_v46, %v417_v42  ;;  %v674_v49 = vadd.f32 %v619_v47, %v433_v43  ;;  %v573_v50 = vpop.f32.mrb[5].mxu0  ;;  %v621_v51 = vpop.f32.mrb[5].mxu1  ;;  %v444_v41 = vld [vmem:[#allocation2 + $0xf8] sm:$0xff] }
 0x13d   : > { %v659_v52 = vadd.f32 %v573_v50, %v418_v44  ;;  %v675_v53 = vadd.f32 %v621_v51, %v434_v45  ;;  %v846_v50 = vld [vmem:[%s1801_s3] sm:$0xff] (!%p1163_p13)  ;;  %v847_v51 = vld [vmem:[%s1801_s3 + $0x8] sm:$0xff] (!%p1163_p13) }
 0x13e   : > { %690 = vst [vmem:[#allocation2 + $0x20] sm:$0xff] %v658_v48  ;;  %706 = vst [vmem:[#allocation2 + $0xa0] sm:$0xff] %v674_v49 }
 0x13f   : > { %691 = vst [vmem:[#allocation2 + $0x28] sm:$0xff] %v659_v52  ;;  %707 = vst [vmem:[#allocation2 + $0xa8] sm:$0xff] %v675_v53  ;;  %v577_v58 = vpop.f32.mrb[6].mxu0  ;;  %v625_v59 = vpop.f32.mrb[6].mxu1  ;;  %v848_v52 = vld [vmem:[%s1801_s3 + $0x10] sm:$0xff] (!%p1163_p13)  ;;  %v756_v53 = vlaneseq (!%p1163_p13) }
 0x140   : > { %v660_v60 = vadd.f32 %v577_v58, %v419_v54  ;;  %v676_v61 = vadd.f32 %v625_v59, %v435_v55  ;;  %v579_v62 = vpop.f32.mrb[7].mxu0  ;;  %v627_v63 = vpop.f32.mrb[7].mxu1  ;;  %v1288_v54 = vpack.c.bf16 (!%p1163_p13), %v847_v51, %v846_v50  ;;  %v849_v55 = vld [vmem:[%s1801_s3 + $0x18] sm:$0xff] (!%p1163_p13)  ;;  %v851_v58 = vld [vmem:[%s1801_s3 + $0x28] sm:$0xff] (!%p1163_p13) }
 0x141   : > { %v661_v0 = vadd.f32 %v579_v62, %v420_v56  ;;  %v677_v1 = vadd.f32 %v627_v63, %v436_v57  ;;  %v1292_v56 = vpack.c.bf16 (!%p1163_p13), %v849_v55, %v848_v52  ;;  %v850_v57 = vld [vmem:[%s1801_s3 + $0x20] sm:$0xff] (!%p1163_p13)  ;;  %v757_v59 = vshrl.u32 (!%p1163_p13), %v756_v53, 7  ;;  %v853_v62 = vld [vmem:[%s1801_s3 + $0x38] sm:$0xff] (!%p1163_p13) }
 0x142   : > { %692 = vst [vmem:[#allocation2 + $0x30] sm:$0xff] %v660_v60  ;;  %708 = vst [vmem:[#allocation2 + $0xb0] sm:$0xff] %v676_v61  ;;  %1289 = vmatprep.subr.bf16.mxu0 (!%p1163_p13), %v1288_v54  ;;  %1336 = vmatprep.subr.bf16.mxu1 (!%p1163_p13), %v1288_v54  ;;  %v1296_v60 = vpack.c.bf16 (!%p1163_p13), %v851_v58, %v850_v57  ;;  %v852_v61 = vld [vmem:[%s1801_s3 + $0x30] sm:$0xff] (!%p1163_p13)  ;;  %v854_v63 = vld [vmem:[%s1801_s3 + $0x40] sm:$0xff] (!%p1163_p13) }
 0x143   : > { %693 = vst [vmem:[#allocation2 + $0x38] sm:$0xff] %v661_v0  ;;  %709 = vst [vmem:[#allocation2 + $0xb8] sm:$0xff] %v677_v1  ;;  %v583_v6 = vpop.f32.mrb[8].mxu0  ;;  %v631_v7 = vpop.f32.mrb[8].mxu1  ;;  %1291 = vmatpush3.bf16.msra.mxu0 (!%p1163_p13), %v1288_v54  ;;  %1344 = vmatpush3.bf16.msra.mxu1 (!%p1163_p13), %v1288_v54  ;;  %v855_v0 = vld [vmem:[%s1801_s3 + $0x48] sm:$0xff] (!%p1163_p13)  ;;  %v856_v1 = vld [vmem:[%s1801_s3 + $0x50] sm:$0xff] (!%p1163_p13) }
 0x144   : > { %v662_v8 = vadd.f32 %v583_v6, %v421_v2  ;;  %v678_v9 = vadd.f32 %v631_v7, %v437_v3  ;;  %v585_v10 = vpop.f32.mrb[9].mxu0  ;;  %v633_v11 = vpop.f32.mrb[9].mxu1  ;;  %1293 = vmatprep.subr.bf16.mxu0 (!%p1163_p13), %v1292_v56  ;;  %1337 = vmatprep.subr.bf16.mxu1 (!%p1163_p13), %v1292_v56  ;;  %v758_v2 = vsub.s32 (!%p1163_p13), 0, %v757_v59  ;;  %v762_v3 = vsub.s32 (!%p1163_p13), 1, %v757_v59  ;;  %v858_v6 = vld [vmem:[%s1801_s3 + $0x60] sm:$0xff] (!%p1163_p13)  ;;  %v859_v7 = vld [vmem:[%s1801_s3 + $0x68] sm:$0xff] (!%p1163_p13) }
 0x145   : > { %v663_v12 = vadd.f32 %v585_v10, %v422_v4  ;;  %v679_v13 = vadd.f32 %v633_v11, %v438_v5  ;;  %v1300_v4 = vpack.c.bf16 (!%p1163_p13), %v853_v62, %v852_v61  ;;  %v857_v5 = vld [vmem:[%s1801_s3 + $0x58] sm:$0xff] (!%p1163_p13)  ;;  %v738_v55 = vld [vmem:[#allocation2 + $0x80] sm:$0xff] (!%p1163_p13) }
 0x146   : > { %694 = vst [vmem:[#allocation2 + $0x40] sm:$0xff] %v662_v8  ;;  %710 = vst [vmem:[#allocation2 + $0xc0] sm:$0xff] %v678_v9  ;;  %v722_v8 = vld [vmem:[#allocation2] sm:$0xff] (!%p1163_p13)  ;;  %v723_v9 = vld [vmem:[#allocation2 + $0x8] sm:$0xff] (!%p1163_p13) }
 0x147   : > { %695 = vst [vmem:[#allocation2 + $0x48] sm:$0xff] %v663_v12  ;;  %711 = vst [vmem:[#allocation2 + $0xc8] sm:$0xff] %v679_v13  ;;  %v589_v18 = vpop.f32.mrb[10].mxu0  ;;  %v637_v19 = vpop.f32.mrb[10].mxu1  ;;  %1295 = vmatpush3.bf16.msra.mxu0 (!%p1163_p13), %v1292_v56  ;;  %1345 = vmatpush3.bf16.msra.mxu1 (!%p1163_p13), %v1292_v56  ;;  %v725_v10 = vld [vmem:[#allocation2 + $0x18] sm:$0xff] (!%p1163_p13)  ;;  %v727_v11 = vld [vmem:[#allocation2 + $0x28] sm:$0xff] (!%p1163_p13) }
 0x148   : > { %v664_v20 = vadd.f32 %v589_v18, %v423_v14  ;;  %v680_v21 = vadd.f32 %v637_v19, %v439_v15  ;;  %v591_v22 = vpop.f32.mrb[11].mxu0  ;;  %v639_v23 = vpop.f32.mrb[11].mxu1  ;;  %1297 = vmatprep.subr.bf16.mxu0 (!%p1163_p13), %v1296_v60  ;;  %1338 = vmatprep.subr.bf16.mxu1 (!%p1163_p13), %v1296_v60  ;;  %v754_v13 = vld [vmem:[%s1800_s2] sm:$0x3] (!%p1163_p13)  ;;  %v1304_v19 = vpack.c.bf16 (!%p1163_p13), %v855_v0, %v854_v63  ;;  %v860_v0 = vld [vmem:[%s1801_s3 + $0x70] sm:$0xff] (!%p1163_p13) }
 0x149   : > { %v665_v25 = vadd.f32 %v591_v22, %v424_v16  ;;  %v681_v26 = vadd.f32 %v639_v23, %v440_v17  ;;  %v1709_v17 = vrot.slane (!%p1163_p13), %v754_v13, %v758_v2  ;;  %v763_v18 = vrot.slane (!%p1163_p13), %v754_v13, %v762_v3  ;;  %v739_v23 = vld [vmem:[#allocation2 + $0x88] sm:$0xff] (!%p1163_p13) }
 0x14a   : > { %696 = vst [vmem:[#allocation2 + $0x50] sm:$0xff] %v664_v20  ;;  %712 = vst [vmem:[#allocation2 + $0xd0] sm:$0xff] %v680_v21  ;;  %v729_v12 = vld [vmem:[#allocation2 + $0x38] sm:$0xff] (!%p1163_p13)  ;;  %v1711_v20 = vpack.c.bf16 (!%p1163_p13), %v857_v5, %v856_v1  ;;  %v1713_v21 = vpack.c.bf16 (!%p1163_p13), %v859_v7, %v858_v6  ;;  %v724_v6 = vld [vmem:[#allocation2 + $0x10] sm:$0xff] (!%p1163_p13) }
 0x14b   : > { %697 = vst [vmem:[#allocation2 + $0x58] sm:$0xff] %v665_v25  ;;  %713 = vst [vmem:[#allocation2 + $0xd8] sm:$0xff] %v681_v26  ;;  %v595_v31 = vpop.f32.mrb[12].mxu0  ;;  %v643_v32 = vpop.f32.mrb[12].mxu1  ;;  %1299 = vmatpush3.bf16.msra.mxu0 (!%p1163_p13), %v1296_v60  ;;  %1346 = vmatpush3.bf16.msra.mxu1 (!%p1163_p13), %v1296_v60  ;;  %v741_v25 = vld [vmem:[#allocation2 + $0x98] sm:$0xff] (!%p1163_p13)  ;;  %v743_v26 = vld [vmem:[#allocation2 + $0xa8] sm:$0xff] (!%p1163_p13) }
 0x14c   : > { %v666_v24 = vadd.f32 %v595_v31, %v425_v27  ;;  %v682_v33 = vadd.f32 %v643_v32, %v441_v28  ;;  %v597_v34 = vpop.f32.mrb[13].mxu0  ;;  %v645_v35 = vpop.f32.mrb[13].mxu1  ;;  %1301 = vmatprep.subr.bf16.mxu0 (!%p1163_p13), %v1300_v4  ;;  %1339 = vmatprep.subr.bf16.mxu1 (!%p1163_p13), %v1300_v4  ;;  %v745_v27 = vld [vmem:[#allocation2 + $0xb8] sm:$0xff] (!%p1163_p13)  ;;  %v769_v31 = vadd.f32 (!%p1163_p13), %v763_v18, %v725_v10  ;;  %v740_v7 = vld [vmem:[#allocation2 + $0x90] sm:$0xff] (!%p1163_p13)  ;;  %v742_v10 = vld [vmem:[#allocation2 + $0xa0] sm:$0xff] (!%p1163_p13) }
 0x14d   : > { %v667_v36 = vadd.f32 %v597_v34, %v426_v29  ;;  %v683_v37 = vadd.f32 %v645_v35, %v442_v30  ;;  %721 = sbr.rel (%p1163_p13) target bundleno = 580 (0x244), region = 82  ;;  %v766_v29 = vadd.f32 (!%p1163_p13), %v1709_v17, %v722_v8  ;;  %v767_v30 = vadd.f32 (!%p1163_p13), %v763_v18, %v723_v9  ;;  %v861_v1 = vld [vmem:[%s1801_s3 + $0x78] sm:$0xff] (!%p1163_p13)  ;;  %v726_v9 = vld [vmem:[#allocation2 + $0x20] sm:$0xff] (!%p1163_p13) }
 0x14e   : > { %698 = vst [vmem:[#allocation2 + $0x60] sm:$0xff] %v666_v24  ;;  %714 = vst [vmem:[#allocation2 + $0xe0] sm:$0xff] %v682_v33  ;;  %v731_v14 = vld [vmem:[#allocation2 + $0x48] sm:$0xff] (!%p1163_p13)  ;;  %v771_v32 = vadd.f32 (!%p1163_p13), %v763_v18, %v727_v11  ;;  %v773_v35 = vadd.f32 (!%p1163_p13), %v763_v18, %v729_v12  ;;  %v801_v50 = vmax.f32 (!%p1163_p13), %v769_v31, 0.0  ;;  %v1316_v8 = vpack.c.bf16 (!%p1163_p13), %v861_v1, %v860_v0 }
 0x14f   : > { %699 = vst [vmem:[#allocation2 + $0x68] sm:$0xff] %v667_v36  ;;  %715 = vst [vmem:[#allocation2 + $0xe8] sm:$0xff] %v683_v37  ;;  %v601_v42 = vpop.f32.mrb[14].mxu0  ;;  %v649_v43 = vpop.f32.mrb[14].mxu1  ;;  %v747_v28 = vld [vmem:[#allocation2 + $0xc8] sm:$0xff] (!%p1163_p13)  ;;  %v775_v36 = vadd.f32 (!%p1163_p13), %v763_v18, %v731_v14  ;;  %1303 = vmatpush3.bf16.msra.mxu0 (!%p1163_p13), %v1300_v4  ;;  %1347 = vmatpush3.bf16.msra.mxu1 (!%p1163_p13), %v1300_v4  ;;  %v782_v4 = vadd.f32 (!%p1163_p13), %v1709_v17, %v738_v55 }
 0x150   : > { %v668_v44 = vadd.f32 %v601_v42, %v427_v38  ;;  %v684_v45 = vadd.f32 %v649_v43, %v443_v39  ;;  %v603_v46 = vpop.f32.mrb[15].mxu0  ;;  %v651_v47 = vpop.f32.mrb[15].mxu1  ;;  %v798_v42 = vmax.f32 (!%p1163_p13), %v766_v29, 0.0  ;;  %1305 = vmatprep.subr.bf16.mxu0 (!%p1163_p13), %v1304_v19  ;;  %1340 = vmatprep.subr.bf16.mxu1 (!%p1163_p13), %v1304_v19  ;;  %v787_v43 = vadd.f32 (!%p1163_p13), %v763_v18, %v743_v26 }
 0x151   : > { %v669_v48 = vadd.f32 %v603_v46, %v428_v40  ;;  %v685_v49 = vadd.f32 %v651_v47, %v444_v41  ;;  %v783_v40 = vadd.f32 (!%p1163_p13), %v763_v18, %v739_v23  ;;  %v785_v41 = vadd.f32 (!%p1163_p13), %v763_v18, %v741_v25  ;;  %831 = vst [vmem:[%s1594_s14 + $0x8] sm:$0xff] (!%p1163_p13), %v801_v50  ;;  %v732_v29 = vld [vmem:[#allocation2 + $0x50] sm:$0xff] (!%p1163_p13) }
 0x152   : > { %700 = vst [vmem:[#allocation2 + $0x70] sm:$0xff] %v668_v44  ;;  %716 = vst [vmem:[#allocation2 + $0xf0] sm:$0xff] %v684_v45  ;;  %v733_v15 = vld [vmem:[#allocation2 + $0x58] sm:$0xff] (!%p1163_p13)  ;;  %v789_v44 = vadd.f32 (!%p1163_p13), %v763_v18, %v745_v27  ;;  %v791_v45 = vadd.f32 (!%p1163_p13), %v763_v18, %v747_v28  ;;  %v799_v46 = vmax.f32 (!%p1163_p13), %v767_v30, 0.0  ;;  %1232 = vmatprep.mubr.f32.mxu0 (!%p1163_p13), %v798_v42  ;;  %v803_v51 = vmax.f32 (!%p1163_p13), %v771_v32, 0.0  ;;  %v748_v30 = vld [vmem:[#allocation2 + $0xd0] sm:$0xff] (!%p1163_p13) }
 0x153   : > { %701 = vst [vmem:[#allocation2 + $0x78] sm:$0xff] %v669_v48  ;;  %717 = vst [vmem:[#allocation2 + $0xf8] sm:$0xff] %v685_v49  ;;  %v749_v24 = vld [vmem:[#allocation2 + $0xd8] sm:$0xff] (!%p1163_p13)  ;;  %v777_v37 = vadd.f32 (!%p1163_p13), %v763_v18, %v733_v15  ;;  %v805_v52 = vmax.f32 (!%p1163_p13), %v773_v35, 0.0  ;;  %v807_v53 = vmax.f32 (!%p1163_p13), %v775_v36, 0.0  ;;  %1307 = vmatpush3.bf16.msra.mxu0 (!%p1163_p13), %v1304_v19  ;;  %1348 = vmatpush3.bf16.msra.mxu1 (!%p1163_p13), %v1304_v19  ;;  %v815_v58 = vmax.f32 (!%p1163_p13), %v783_v40, 0.0 }
 0x154   : > { %v793_v47 = vadd.f32 %v763_v18, %v749_v24  ;;  %830 = vst [vmem:[%s1594_s14] sm:$0xff] %v799_v46  ;;  %v817_v59 = vmax.f32 %v785_v41, 0.0  ;;  %1309 = vmatprep.subr.bf16.mxu0 %v1711_v20  ;;  %1341 = vmatprep.subr.bf16.mxu1 %v1711_v20  ;;  %v819_v60 = vmax.f32 %v787_v43, 0.0  ;;  %v821_v61 = vmax.f32 %v789_v44, 0.0  ;;  %832 = vst [vmem:[%s1594_s14 + $0x10] sm:$0xff] %v803_v51  ;;  %v728_v15 = vld [vmem:[#allocation2 + $0x30] sm:$0xff]  ;;  %v746_v19 = vld [vmem:[#allocation2 + $0xc0] sm:$0xff] }
 0x155   : > { %v809_v54 = vmax.f32 %v777_v37, 0.0  ;;  %v823_v62 = vmax.f32 %v791_v45, 0.0  ;;  %833 = vst [vmem:[%s1594_s14 + $0x18] sm:$0xff] %v805_v52  ;;  %834 = vst [vmem:[%s1594_s14 + $0x20] sm:$0xff] %v807_v53  ;;  %v814_v5 = vmax.f32 %v782_v4, 0.0  ;;  %v768_v11 = vadd.f32 %v1709_v17, %v724_v6  ;;  %v734_v31 = vld [vmem:[#allocation2 + $0x60] sm:$0xff] }
 0x156   : > { %v735_v16 = vld [vmem:[#allocation2 + $0x68] sm:$0xff]  ;;  %v825_v63 = vmax.f32 %v793_v47, 0.0  ;;  %838 = vst [vmem:[%s1594_s14 + $0x40] sm:$0xff] %v815_v58  ;;  %839 = vst [vmem:[%s1594_s14 + $0x48] sm:$0xff] %v817_v59  ;;  %v784_v12 = vadd.f32 %v1709_v17, %v740_v7  ;;  %v770_v13 = vadd.f32 %v1709_v17, %v726_v9  ;;  %v786_v14 = vadd.f32 %v1709_v17, %v742_v10  ;;  %v750_v32 = vld [vmem:[#allocation2 + $0xe0] sm:$0xff] }
 0x157   : > { %v751_v33 = vld [vmem:[#allocation2 + $0xe8] sm:$0xff]  ;;  %v779_v38 = vadd.f32 %v763_v18, %v735_v16  ;;  %835 = vst [vmem:[%s1594_s14 + $0x28] sm:$0xff] %v809_v54  ;;  %840 = vst [vmem:[%s1594_s14 + $0x50] sm:$0xff] %v819_v60  ;;  %1311 = vmatpush3.bf16.msra.mxu0 %v1711_v20  ;;  %1349 = vmatpush3.bf16.msra.mxu1 %v1711_v20  ;;  %v744_v16 = vld [vmem:[#allocation2 + $0xb0] sm:$0xff]  ;;  %v800_v20 = vmax.f32 %v768_v11, 0.0  ;;  %v772_v23 = vadd.f32 %v1709_v17, %v728_v15 }
 0x158   : > { %v795_v48 = vadd.f32 %v763_v18, %v751_v33  ;;  %841 = vst [vmem:[%s1594_s14 + $0x58] sm:$0xff] %v821_v61  ;;  %842 = vst [vmem:[%s1594_s14 + $0x60] sm:$0xff] %v823_v62  ;;  %1313 = vmatprep.subr.bf16.mxu0 %v1713_v21  ;;  %1342 = vmatprep.subr.bf16.mxu1 %v1713_v21  ;;  %v788_v25 = vadd.f32 %v1709_v17, %v744_v16  ;;  %v802_v26 = vmax.f32 %v770_v13, 0.0 }
 0x159   : > { %v811_v56 = vmax.f32 %v779_v38, 0.0  ;;  %843 = vst [vmem:[%s1594_s14 + $0x68] sm:$0xff] %v825_v63  ;;  %1244 = vmatprep.mubr.f32.mxu1 %v814_v5  ;;  %v790_v28 = vadd.f32 %v1709_v17, %v746_v19  ;;  %v804_v24 = vmax.f32 %v772_v23, 0.0  ;;  %v792_v35 = vadd.f32 %v1709_v17, %v748_v30  ;;  %v736_v40 = vld [vmem:[#allocation2 + $0x70] sm:$0xff] }
 0x15a   : > { %v737_v22 = vld [vmem:[#allocation2 + $0x78] sm:$0xff]  ;;  %v827_v2 = vmax.f32 %v795_v48, 0.0  ;;  %v820_v33 = vmax.f32 %v788_v25, 0.0  ;;  %v778_v38 = vadd.f32 %v1709_v17, %v734_v31  ;;  %v752_v41 = vld [vmem:[#allocation2 + $0xf0] sm:$0xff]  ;;  %v780_v44 = vadd.f32 %v1709_v17, %v736_v40 }
 0x15b   : > { %v753_v34 = vld [vmem:[#allocation2 + $0xf8] sm:$0xff]  ;;  %v781_v39 = vadd.f32 %v763_v18, %v737_v22  ;;  %836 = vst [vmem:[%s1594_s14 + $0x30] sm:$0xff] %v811_v56  ;;  %1315 = vmatpush3.bf16.msra.mxu0 %v1713_v21  ;;  %1350 = vmatpush3.bf16.msra.mxu1 %v1713_v21  ;;  %v816_v22 = vmax.f32 %v784_v12, 0.0  ;;  %v818_v21 = vmax.f32 %v786_v14, 0.0  ;;  %v822_v37 = vmax.f32 %v790_v28, 0.0 }
 0x15c   : > { %v797_v49 = vadd.f32 %v763_v18, %v753_v34  ;;  %844 = vst [vmem:[%s1594_s14 + $0x70] sm:$0xff] %v827_v2  ;;  %1317 = vmatprep.subr.bf16.mxu0 %v1316_v8  ;;  %1343 = vmatprep.subr.bf16.mxu1 %v1316_v8  ;;  %v730_v18 = vld [vmem:[#allocation2 + $0x40] sm:$0xff]  ;;  %v776_v34 = vadd.f32 %v1709_v17, %v732_v29  ;;  %v824_v43 = vmax.f32 %v792_v35, 0.0  ;;  %v810_v46 = vmax.f32 %v778_v38, 0.0 }
 0x15d   : > { %v813_v57 = vmax.f32 %v781_v39, 0.0  ;;  %v774_v27 = vadd.f32 %v1709_v17, %v730_v18  ;;  %v794_v39 = vadd.f32 %v1709_v17, %v750_v32  ;;  %v796_v45 = vadd.f32 %v1709_v17, %v752_v41 }
 0x15e   : > { %v829_v3 = vmax.f32 %v797_v49, 0.0  ;;  %v808_v42 = vmax.f32 %v776_v34, 0.0  ;;  %v812_v48 = vmax.f32 %v780_v44, 0.0 }
 0x15f   : > { %837 = vst [vmem:[%s1594_s14 + $0x38] sm:$0xff] %v813_v57  ;;  %1319 = vmatpush3.bf16.msra.mxu0 %v1316_v8  ;;  %1351 = vmatpush3.bf16.msra.mxu1 %v1316_v8  ;;  %v806_v36 = vmax.f32 %v774_v27, 0.0  ;;  %v826_v47 = vmax.f32 %v794_v39, 0.0  ;;  %v828_v49 = vmax.f32 %v796_v45, 0.0 }
 0x160   : > { %845 = vst [vmem:[%s1594_s14 + $0x78] sm:$0xff] %v829_v3 }
 0x162   : > { %1233 = vmatmul.mubr.f32.vlgmr.msra.gmra.mrb[0].mxu0 %v800_v20  ;;  %1245 = vmatmul.mubr.f32.vlgmr.msra.gmra.mrb[0].mxu1 %v816_v22 }
 0x163   : > { %1235 = vmatprep.mubr.f32.mxu0 %v802_v26  ;;  %1247 = vmatprep.mubr.f32.mxu1 %v818_v21 }
 0x166   : > { %1236 = vmatmul.mubr.f32.gmra.mrb[2].mxu0 %v804_v24  ;;  %1248 = vmatmul.mubr.f32.gmra.mrb[2].mxu1 %v820_v33 }
 0x167   : > { %1238 = vmatprep.mubr.f32.mxu0 %v806_v36  ;;  %1250 = vmatprep.mubr.f32.mxu1 %v822_v37 }
 0x16a   : > { %1239 = vmatmul.mubr.f32.gmra.mrb[4].mxu0 %v808_v42  ;;  %1251 = vmatmul.mubr.f32.gmra.mrb[4].mxu1 %v824_v43 }
 0x16b   : > { %1241 = vmatprep.mubr.f32.mxu0 %v810_v46  ;;  %1253 = vmatprep.mubr.f32.mxu1 %v826_v47 }
 0x16e   : > { %1242 = vmatmul.mubr.f32.gmra.mrb[6].mxu0 %v812_v48  ;;  %1254 = vmatmul.mubr.f32.gmra.mrb[6].mxu1 %v828_v49 }
 0x235   : > { %v1234_v17 = vpop.f32.mrb[0].mxu0  ;;  %v1246_v50 = vpop.f32.mrb[0].mxu1 }
 0x236   : > { %1008 = vst [vmem:[%s1589_s12 + $0x8] sm:$0xff] %v1234_v17  ;;  %1016 = vst [vmem:[%s1589_s12 + $0x48] sm:$0xff] %v1246_v50  ;;  %v928_v51 = vpop.f32.mrb[1].mxu0  ;;  %v968_v52 = vpop.f32.mrb[1].mxu1 }
 0x237   : > { %1007 = vst [vmem:[%s1589_s12] sm:$0xff] %v928_v51  ;;  %1015 = vst [vmem:[%s1589_s12 + $0x40] sm:$0xff] %v968_v52 }
 0x239   : > { %v1237_v53 = vpop.f32.mrb[2].mxu0  ;;  %v1249_v54 = vpop.f32.mrb[2].mxu1 }
 0x23a   : > { %1010 = vst [vmem:[%s1589_s12 + $0x18] sm:$0xff] %v1237_v53  ;;  %1018 = vst [vmem:[%s1589_s12 + $0x58] sm:$0xff] %v1249_v54  ;;  %v938_v55 = vpop.f32.mrb[3].mxu0  ;;  %v978_v56 = vpop.f32.mrb[3].mxu1 }
 0x23b   : > { %1009 = vst [vmem:[%s1589_s12 + $0x10] sm:$0xff] %v938_v55  ;;  %1017 = vst [vmem:[%s1589_s12 + $0x50] sm:$0xff] %v978_v56 }
 0x23d   : > { %v1240_v57 = vpop.f32.mrb[4].mxu0  ;;  %v1252_v58 = vpop.f32.mrb[4].mxu1 }
 0x23e   : > { %1012 = vst [vmem:[%s1589_s12 + $0x28] sm:$0xff] %v1240_v57  ;;  %1020 = vst [vmem:[%s1589_s12 + $0x68] sm:$0xff] %v1252_v58  ;;  %v948_v59 = vpop.f32.mrb[5].mxu0  ;;  %v988_v60 = vpop.f32.mrb[5].mxu1 }
 0x23f   : > { %1011 = vst [vmem:[%s1589_s12 + $0x20] sm:$0xff] %v948_v59  ;;  %1019 = vst [vmem:[%s1589_s12 + $0x60] sm:$0xff] %v988_v60 }
 0x241   : > { %v1243_v61 = vpop.f32.mrb[6].mxu0  ;;  %v1255_v62 = vpop.f32.mrb[6].mxu1 }
 0x242   : > { %1014 = vst [vmem:[%s1589_s12 + $0x38] sm:$0xff] %v1243_v61  ;;  %1022 = vst [vmem:[%s1589_s12 + $0x78] sm:$0xff] %v1255_v62  ;;  %v958_v63 = vpop.f32.mrb[7].mxu0  ;;  %v998_v0 = vpop.f32.mrb[7].mxu1 }
 0x243   : > { %1013 = vst [vmem:[%s1589_s12 + $0x30] sm:$0xff] %v958_v63  ;;  %1021 = vst [vmem:[%s1589_s12 + $0x70] sm:$0xff] %v998_v0 }
 0x244 PF: > { %s16_s24 = sadd.s32 1, %s1464_s24   ;;  %s1804_s18 = smov %s1444_s19 }
 0x245   : > { %p13_p0 = scmp.ge.s32.totalorder %s16_s24, 6   ;;  %s1805_s19 = smov %s1549_s6 }
 0x246   : > { %s1806_s20 = smov %s1456_s22  ;;  %s1807_s21 = smov %s1460_s23 }
 0x247   : > { %s1808_s22 = smov %s1811_s25  ;;  %s1809_s23 = smov %s1815_s26 }
 0x248   :  { %15 = sbr.rel (!%p13_p0) target bundleno = 4 (0x4), region = 132 }

// kernel: dominant_forward.10
= control target key start
LH: loop header
LB: loop body
LE: loop exit
PB: predicated region body
PF: predicated region fallthrough
CT: control target
= control target key end

     0   :  { %s1004_s12 = smov 0   ;;  %s1006_s13 = smov 0   ;;  %s1173_s0 = inlined_call_operand.vmem [shape: f32[256,256], index: 0, kind: input, shape index: {}]   ;;  %s1174_s1 = inlined_call_operand.vmem [shape: f32[256,128], index: 1, kind: input, shape index: {}]   ;;  %s1175_s2 = inlined_call_operand.vmem [shape: f32[1,128], index: 2, kind: input, shape index: {}]   ;;  %s1176_s3 = inlined_call_operand.vmem [shape: f32[256,128], index: 3, kind: output, shape index: {}]  }
   0x1   :  { %s1008_s14 = smov 0   ;;  %s1010_s15 = smov 0  }
   0x2   :  { %s1012_s16 = smov 0   ;;  %s1014_s17 = smov 0  }
   0x3   :  { %s1016_s18 = smov 0  }
   0x4 LB: > { %s22_s19 = sadd.s32 1, %s973_s16  ;;  %s25_s20 = sadd.s32 1, %s977_s17  ;;  %s981_s18 = sphi %s1016_s18, %s13_s18   ;;  %s977_s17 = sphi %s1014_s17, %s1182_s17   ;;  %s973_s16 = sphi %s1012_s16, %s1181_s16   ;;  %s969_s15 = sphi %s1010_s15, %s1180_s15   ;;  %s965_s14 = sphi %s1008_s14, %s1179_s14   ;;  %s961_s13 = sphi %s1006_s13, %s1178_s13   ;;  %s957_s12 = sphi %s1004_s12, %s1177_s12  }
   0x5   : > { %p23_p0 = scmp.ge.s32.totalorder %s22_s19, 2  ;;  %p41_p1 = scmp.ne.s32.totalorder %s961_s13, %s957_s12 }
   0x6   : > { %p42_p2 = scmp.eq.s32.totalorder %s981_s18, 0  ;;  %s34_s24 = sadd.s32 1, %s961_s13 }
   0x7   : > { %s1184_s19 = smov (%p23_p0, %s22_s19), 0  ;;  %s1186_s20 = smov (!%p23_p0, %s25_s20), %s977_s17 }
   0x8   : > { %p43_p3 = por %p42_p2, %p41_p1  ;;  %p27_p4 = scmp.ge.s32.totalorder %s1186_s20, 2 }
   0x9   : > { %s30_s21 = ssub.s32 %s973_s16, %s1184_s19  ;;  %p717_p6 = scmp.ge.s32.totalorder %s981_s18, 4 }
   0xa   : > { %s1188_s20 = smov (%p27_p4, %s1186_s20), 0 }
   0xb   : > { %s29_s22 = ssub.s32 %s977_s17, %s1188_s20  ;;  %143 = sbr.rel (%p717_p6) target bundleno = 32 (0x20), region = 20 }
   0xc   : > { %s31_s23 = sor.u32 %s30_s21, %s29_s22 }
   0xd   : > { %p32_p5 = scmp.eq.s32.totalorder %s31_s23, 0 }
   0xf   : > { %s1055_s25 = scalar_select %p32_p5, %s961_s13, %s34_s24  }
  0x12   : > { %146 = sbr.rel (!%p43_p3) target bundleno = 32 (0x20), region = 24  ;;  %s148_s26 = sand.u32 (%p43_p3), 1, %s961_s13  }
  0x13   : > { %s733_s27 = sshll.u32 (%p43_p3), %s977_s17, 5  ;;  %s718_s28 = sshll.u32 (%p43_p3), %s148_s26, 7 }
  0x14   : > { %s153_s29 = sadd.s32 (%p43_p3), %s973_s16, %s733_s27  ;;  %s150_s7 = scalar_lea.vmem (%p43_p3), [#allocation3], %s718_s28 }
  0x15   : > { %s721_s30 = sshll.u32 (%p43_p3), %s153_s29, 3 }
  0x16   : > { %s1064_s6 = scalar_lea.vmem (%p43_p3), %s1173_s0, %s721_s30 }
  0x17   : > { %v213_v0 = vld [vmem:[%s1064_s6] sm:$0xff] (%p43_p3)  ;;  %v215_v1 = vld [vmem:[%s1064_s6 + $0x10] sm:$0xff] (%p43_p3) }
  0x18   : > { %v217_v2 = vld [vmem:[%s1064_s6 + $0x20] sm:$0xff] (%p43_p3)  ;;  %214 = vst [vmem:[%s150_s7] sm:$0xff] (%p43_p3), %v213_v0  ;;  %216 = vst [vmem:[%s150_s7 + $0x8] sm:$0xff] (%p43_p3), %v215_v1  ;;  %v219_v3 = vld [vmem:[%s1064_s6 + $0x30] sm:$0xff] (%p43_p3) }
  0x19   : > { %218 = vst [vmem:[%s150_s7 + $0x10] sm:$0xff] %v217_v2  ;;  %v221_v4 = vld [vmem:[%s1064_s6 + $0x40] sm:$0xff]  ;;  %v223_v5 = vld [vmem:[%s1064_s6 + $0x50] sm:$0xff]  ;;  %220 = vst [vmem:[%s150_s7 + $0x18] sm:$0xff] %v219_v3 }
  0x1a   : > { %222 = vst [vmem:[%s150_s7 + $0x20] sm:$0xff] %v221_v4  ;;  %224 = vst [vmem:[%s150_s7 + $0x28] sm:$0xff] %v223_v5  ;;  %v225_v6 = vld [vmem:[%s1064_s6 + $0x60] sm:$0xff]  ;;  %v227_v7 = vld [vmem:[%s1064_s6 + $0x70] sm:$0xff] }
  0x1b   : > { %v229_v8 = vld [vmem:[%s1064_s6 + $0x80] sm:$0xff]  ;;  %226 = vst [vmem:[%s150_s7 + $0x30] sm:$0xff] %v225_v6  ;;  %228 = vst [vmem:[%s150_s7 + $0x38] sm:$0xff] %v227_v7  ;;  %v231_v9 = vld [vmem:[%s1064_s6 + $0x90] sm:$0xff] }
  0x1c   : > { %230 = vst [vmem:[%s150_s7 + $0x40] sm:$0xff] %v229_v8  ;;  %v233_v10 = vld [vmem:[%s1064_s6 + $0xa0] sm:$0xff]  ;;  %v235_v11 = vld [vmem:[%s1064_s6 + $0xb0] sm:$0xff]  ;;  %232 = vst [vmem:[%s150_s7 + $0x48] sm:$0xff] %v231_v9 }
  0x1d   : > { %234 = vst [vmem:[%s150_s7 + $0x50] sm:$0xff] %v233_v10  ;;  %236 = vst [vmem:[%s150_s7 + $0x58] sm:$0xff] %v235_v11  ;;  %v237_v12 = vld [vmem:[%s1064_s6 + $0xc0] sm:$0xff]  ;;  %v239_v13 = vld [vmem:[%s1064_s6 + $0xd0] sm:$0xff] }
  0x1e   : > { %v241_v14 = vld [vmem:[%s1064_s6 + $0xe0] sm:$0xff]  ;;  %238 = vst [vmem:[%s150_s7 + $0x60] sm:$0xff] %v237_v12  ;;  %240 = vst [vmem:[%s150_s7 + $0x68] sm:$0xff] %v239_v13  ;;  %v243_v15 = vld [vmem:[%s1064_s6 + $0xf0] sm:$0xff] }
  0x1f   : > { %242 = vst [vmem:[%s150_s7 + $0x70] sm:$0xff] %v241_v14  ;;  %244 = vst [vmem:[%s150_s7 + $0x78] sm:$0xff] %v243_v15 }
  0x20 PF: > { %p722_p7 = scmp.ge.s32.totalorder %s981_s18, 1  ;;  %p258_p8 = scmp.lt.s32.totalorder %s981_s18, 5 }
  0x22   : > { %p259_p9 = pnand %p722_p7, %p258_p8 }
  0x23   : > { %s265_s8 = sand.u32 (!%p259_p9), 1, %s957_s12   ;;  %s724_s9 = sshll.u32 (!%p259_p9), %s965_s14, 4 }
  0x24   : > { %262 = sbr.rel (%p259_p9) target bundleno = 329 (0x149), region = 66  ;;  %s723_s10 = sshll.u32 (!%p259_p9), %s265_s8, 7 }
  0x25   : > { %p295_p10 = scmp.lt.s32.totalorder (!%p259_p9), %s724_s9, 31  ;;  %s726_s11 = sshll.u32 (!%p259_p9), %s969_s15, 4 }
  0x26   : > { %p301_p11 = scmp.lt.s32.totalorder (!%p259_p9), %s726_s11, 31  ;;  %s1097_s12 = scalar_lea.vmem (!%p259_p9), [#allocation3], %s723_s10 }
  0x27   : > { %p728_p12 = scmp.ne.s32.totalorder (!%p259_p9), %s965_s14, 0 }
  0x2b   : > { %s1190_s9 = smov (!%p295_p10, %s724_s9), 31  ;;  %s1192_s11 = smov (!%p301_p11, %s726_s11), 31 }
  0x2c   : > { %s725_s21 = sshll.u32 %s1190_s9, 3  ;;  %s727_s26 = sshll.u32 %s1192_s11, 3  ;;  %v983_v16 = vmov (!%p728_p12), 0.0  }
  0x2d   : > { %s1090_s24 = scalar_lea.vmem %s1174_s1, %s725_s21  ;;  %s1095_s29 = scalar_lea.vmem %s1176_s3, %s727_s26  ;;  %310 = vst [vmem:[#allocation2] sm:$0xff] (!%p728_p12), %v983_v16  ;;  %311 = vst [vmem:[#allocation2 + $0x8] sm:$0xff] (!%p728_p12), %v983_v16 }
  0x2e   : > { %309 = sbr.rel (%p728_p12) target bundleno = 53 (0x35), region = 74  ;;  %312 = vst [vmem:[#allocation2 + $0x10] sm:$0xff] (!%p728_p12), %v983_v16  ;;  %313 = vst [vmem:[#allocation2 + $0x18] sm:$0xff] (!%p728_p12), %v983_v16 }
  0x2f   : > { %314 = vst [vmem:[#allocation2 + $0x20] sm:$0xff] (!%p728_p12), %v983_v16  ;;  %315 = vst [vmem:[#allocation2 + $0x28] sm:$0xff] (!%p728_p12), %v983_v16 }
  0x30   : > { %316 = vst [vmem:[#allocation2 + $0x30] sm:$0xff] (!%p728_p12), %v983_v16  ;;  %317 = vst [vmem:[#allocation2 + $0x38] sm:$0xff] (!%p728_p12), %v983_v16 }
  0x31   : > { %318 = vst [vmem:[#allocation2 + $0x40] sm:$0xff] (!%p728_p12), %v983_v16  ;;  %319 = vst [vmem:[#allocation2 + $0x48] sm:$0xff] (!%p728_p12), %v983_v16 }
  0x32   : > { %320 = vst [vmem:[#allocation2 + $0x50] sm:$0xff] (!%p728_p12), %v983_v16  ;;  %321 = vst [vmem:[#allocation2 + $0x58] sm:$0xff] (!%p728_p12), %v983_v16 }
  0x33   : > { %322 = vst [vmem:[#allocation2 + $0x60] sm:$0xff] (!%p728_p12), %v983_v16  ;;  %323 = vst [vmem:[#allocation2 + $0x68] sm:$0xff] (!%p728_p12), %v983_v16 }
  0x34   : > { %324 = vst [vmem:[#allocation2 + $0x70] sm:$0xff] (!%p728_p12), %v983_v16  ;;  %325 = vst [vmem:[#allocation2 + $0x78] sm:$0xff] (!%p728_p12), %v983_v16 }
  0x35 PF: > { %v358_v17 = vld [vmem:[%s1090_s24] sm:$0xff]  ;;  %v359_v18 = vld [vmem:[%s1090_s24 + $0x8] sm:$0xff]  ;;  %v360_v19 = vld [vmem:[%s1090_s24 + $0x10] sm:$0xff]  ;;  %p729_p13 = scmp.ne.s32.totalorder %s965_s14, 1 }
  0x36   : > { %v822_v20 = vpack.c.bf16 %v359_v18, %v358_v17  ;;  %v361_v21 = vld [vmem:[%s1090_s24 + $0x18] sm:$0xff]  ;;  %v362_v23 = vld [vmem:[%s1090_s24 + $0x20] sm:$0xff]  ;;  %v363_v24 = vld [vmem:[%s1090_s24 + $0x28] sm:$0xff] }
  0x37   : > { %v826_v22 = vpack.c.bf16 %v361_v21, %v360_v19  ;;  %v830_v25 = vpack.c.bf16 %v363_v24, %v362_v23  ;;  %v342_v26 = vld [vmem:[%s1097_s12] sm:$0xff]  ;;  %v364_v28 = vld [vmem:[%s1090_s24 + $0x30] sm:$0xff]  ;;  %v365_v29 = vld [vmem:[%s1090_s24 + $0x38] sm:$0xff] }
  0x38   : > { %823 = vmatprep.subr.bf16.mxu0 %v822_v20  ;;  %854 = vmatprep.subr.bf16.mxu1 %v822_v20  ;;  %v350_v27 = vld [vmem:[%s1097_s12 + $0x40] sm:$0xff]  ;;  %v834_v30 = vpack.c.bf16 %v365_v29, %v364_v28  ;;  %v367_v32 = vld [vmem:[%s1090_s24 + $0x48] sm:$0xff]  ;;  %v368_v34 = vld [vmem:[%s1090_s24 + $0x50] sm:$0xff] }
  0x39   : > { %825 = vmatpush3.bf16.msra.mxu0 %v822_v20  ;;  %862 = vmatpush3.bf16.msra.mxu1 %v822_v20  ;;  %v366_v31 = vld [vmem:[%s1090_s24 + $0x40] sm:$0xff]  ;;  %v369_v35 = vld [vmem:[%s1090_s24 + $0x58] sm:$0xff]  ;;  %v371_v38 = vld [vmem:[%s1090_s24 + $0x68] sm:$0xff] }
  0x3a   : > { %827 = vmatprep.subr.bf16.mxu0 %v826_v22  ;;  %855 = vmatprep.subr.bf16.mxu1 %v826_v22  ;;  %v838_v33 = vpack.c.bf16 %v367_v32, %v366_v31  ;;  %v842_v36 = vpack.c.bf16 %v369_v35, %v368_v34  ;;  %v370_v37 = vld [vmem:[%s1090_s24 + $0x60] sm:$0xff]  ;;  %v372_v40 = vld [vmem:[%s1090_s24 + $0x70] sm:$0xff]  ;;  %v373_v41 = vld [vmem:[%s1090_s24 + $0x78] sm:$0xff] }
  0x3b   : > { %798 = vmatprep.mubr.f32.mxu0 %v342_v26  ;;  %810 = vmatprep.mubr.f32.mxu1 %v350_v27  ;;  %v846_v39 = vpack.c.bf16 %v371_v38, %v370_v37  ;;  %v850_v42 = vpack.c.bf16 %v373_v41, %v372_v40  ;;  %v343_v43 = vld [vmem:[%s1097_s12 + $0x8] sm:$0xff]  ;;  %v344_v45 = vld [vmem:[%s1097_s12 + $0x10] sm:$0xff]  ;;  %v345_v47 = vld [vmem:[%s1097_s12 + $0x18] sm:$0xff] }
  0x3c   : > { %v351_v44 = vld [vmem:[%s1097_s12 + $0x48] sm:$0xff]  ;;  %v352_v46 = vld [vmem:[%s1097_s12 + $0x50] sm:$0xff]  ;;  %v353_v48 = vld [vmem:[%s1097_s12 + $0x58] sm:$0xff] }
  0x3d   : > { %829 = vmatpush3.bf16.msra.mxu0 %v826_v22  ;;  %863 = vmatpush3.bf16.msra.mxu1 %v826_v22  ;;  %v346_v49 = vld [vmem:[%s1097_s12 + $0x20] sm:$0xff]  ;;  %v347_v51 = vld [vmem:[%s1097_s12 + $0x28] sm:$0xff]  ;;  %v348_v53 = vld [vmem:[%s1097_s12 + $0x30] sm:$0xff] }
  0x3e   : > { %831 = vmatprep.subr.bf16.mxu0 %v830_v25  ;;  %856 = vmatprep.subr.bf16.mxu1 %v830_v25  ;;  %v354_v50 = vld [vmem:[%s1097_s12 + $0x60] sm:$0xff]  ;;  %v355_v52 = vld [vmem:[%s1097_s12 + $0x68] sm:$0xff]  ;;  %v356_v54 = vld [vmem:[%s1097_s12 + $0x70] sm:$0xff] }
  0x3f   : > { %v349_v55 = vld [vmem:[%s1097_s12 + $0x38] sm:$0xff]  ;;  %v327_v57 = vld [vmem:[#allocation2 + $0x8] sm:$0xff]  ;;  %v326_v59 = vld [vmem:[#allocation2] sm:$0xff] }
  0x40   : > { %v357_v56 = vld [vmem:[%s1097_s12 + $0x78] sm:$0xff]  ;;  %v335_v58 = vld [vmem:[#allocation2 + $0x48] sm:$0xff]  ;;  %v334_v60 = vld [vmem:[#allocation2 + $0x40] sm:$0xff] }
  0x41   : > { %833 = vmatpush3.bf16.msra.mxu0 %v830_v25  ;;  %864 = vmatpush3.bf16.msra.mxu1 %v830_v25  ;;  %v329_v5 = vld [vmem:[#allocation2 + $0x18] sm:$0xff]  ;;  %v328_v7 = vld [vmem:[#allocation2 + $0x10] sm:$0xff]  ;;  %v331_v17 = vld [vmem:[#allocation2 + $0x28] sm:$0xff] }
  0x42   : > { %835 = vmatprep.subr.bf16.mxu0 %v834_v30  ;;  %857 = vmatprep.subr.bf16.mxu1 %v834_v30  ;;  %v337_v6 = vld [vmem:[#allocation2 + $0x58] sm:$0xff]  ;;  %v336_v8 = vld [vmem:[#allocation2 + $0x50] sm:$0xff]  ;;  %v339_v18 = vld [vmem:[#allocation2 + $0x68] sm:$0xff] }
  0x43   : > { %v330_v19 = vld [vmem:[#allocation2 + $0x20] sm:$0xff]  ;;  %v333_v29 = vld [vmem:[#allocation2 + $0x38] sm:$0xff]  ;;  %v332_v31 = vld [vmem:[#allocation2 + $0x30] sm:$0xff] }
  0x44   : > { %v338_v20 = vld [vmem:[#allocation2 + $0x60] sm:$0xff]  ;;  %v340_v32 = vld [vmem:[#allocation2 + $0x70] sm:$0xff] }
  0x45   : > { %837 = vmatpush3.bf16.msra.mxu0 %v834_v30  ;;  %865 = vmatpush3.bf16.msra.mxu1 %v834_v30  ;;  %v341_v30 = vld [vmem:[#allocation2 + $0x78] sm:$0xff] }
  0x46   : > { %839 = vmatprep.subr.bf16.mxu0 %v838_v33  ;;  %858 = vmatprep.subr.bf16.mxu1 %v838_v33 }
  0x49   : > { %841 = vmatpush3.bf16.msra.mxu0 %v838_v33  ;;  %866 = vmatpush3.bf16.msra.mxu1 %v838_v33 }
  0x4a   : > { %843 = vmatprep.subr.bf16.mxu0 %v842_v36  ;;  %859 = vmatprep.subr.bf16.mxu1 %v842_v36 }
  0x4d   : > { %845 = vmatpush3.bf16.msra.mxu0 %v842_v36  ;;  %867 = vmatpush3.bf16.msra.mxu1 %v842_v36 }
  0x4e   : > { %847 = vmatprep.subr.bf16.mxu0 %v846_v39  ;;  %860 = vmatprep.subr.bf16.mxu1 %v846_v39 }
  0x51   : > { %849 = vmatpush3.bf16.msra.mxu0 %v846_v39  ;;  %868 = vmatpush3.bf16.msra.mxu1 %v846_v39 }
  0x52   : > { %851 = vmatprep.subr.bf16.mxu0 %v850_v42  ;;  %861 = vmatprep.subr.bf16.mxu1 %v850_v42 }
  0x55   : > { %853 = vmatpush3.bf16.msra.mxu0 %v850_v42  ;;  %869 = vmatpush3.bf16.msra.mxu1 %v850_v42  ;;  %v730_v42 = vld [vmem:[%s1175_s2] ss:$0 sm:$0xff] (!%p729_p13) }
  0x58   : > { %799 = vmatmul.mubr.f32.vlgmr.msra.gmra.mrb[0].mxu0 %v343_v43  ;;  %811 = vmatmul.mubr.f32.vlgmr.msra.gmra.mrb[0].mxu1 %v351_v44 }
  0x59   : > { %801 = vmatprep.mubr.f32.mxu0 %v344_v45  ;;  %813 = vmatprep.mubr.f32.mxu1 %v352_v46 }
  0x5c   : > { %802 = vmatmul.mubr.f32.gmra.mrb[2].mxu0 %v345_v47  ;;  %814 = vmatmul.mubr.f32.gmra.mrb[2].mxu1 %v353_v48 }
  0x5d   : > { %804 = vmatprep.mubr.f32.mxu0 %v346_v49  ;;  %816 = vmatprep.mubr.f32.mxu1 %v354_v50 }
  0x60   : > { %805 = vmatmul.mubr.f32.gmra.mrb[4].mxu0 %v347_v51  ;;  %817 = vmatmul.mubr.f32.gmra.mrb[4].mxu1 %v355_v52 }
  0x61   : > { %807 = vmatprep.mubr.f32.mxu0 %v348_v53  ;;  %819 = vmatprep.mubr.f32.mxu1 %v356_v54 }
  0x64   : > { %808 = vmatmul.mubr.f32.gmra.mrb[6].mxu0 %v349_v55  ;;  %820 = vmatmul.mubr.f32.gmra.mrb[6].mxu1 %v357_v56 }
 0x12b   : > { %v800_v61 = vpop.f32.mrb[0].mxu0  ;;  %v812_v62 = vpop.f32.mrb[0].mxu1 }
 0x12c   : > { %v520_v63 = vadd.f32 %v800_v61, %v327_v57  ;;  %v528_v0 = vadd.f32 %v812_v62, %v335_v58  ;;  %v440_v1 = vpop.f32.mrb[1].mxu0  ;;  %v480_v2 = vpop.f32.mrb[1].mxu1 }
 0x12d   : > { %v519_v3 = vadd.f32 %v440_v1, %v326_v59  ;;  %v527_v4 = vadd.f32 %v480_v2, %v334_v60 }
 0x12e   : > { %536 = vst [vmem:[#allocation2 + $0x8] sm:$0xff] %v520_v63  ;;  %544 = vst [vmem:[#allocation2 + $0x48] sm:$0xff] %v528_v0 }
 0x12f   : > { %535 = vst [vmem:[#allocation2] sm:$0xff] %v519_v3  ;;  %543 = vst [vmem:[#allocation2 + $0x40] sm:$0xff] %v527_v4  ;;  %v803_v9 = vpop.f32.mrb[2].mxu0  ;;  %v815_v10 = vpop.f32.mrb[2].mxu1 }
 0x130   : > { %v522_v11 = vadd.f32 %v803_v9, %v329_v5  ;;  %v530_v12 = vadd.f32 %v815_v10, %v337_v6  ;;  %v450_v13 = vpop.f32.mrb[3].mxu0  ;;  %v490_v14 = vpop.f32.mrb[3].mxu1 }
 0x131   : > { %v521_v15 = vadd.f32 %v450_v13, %v328_v7  ;;  %v529_v16 = vadd.f32 %v490_v14, %v336_v8 }
 0x132   : > { %538 = vst [vmem:[#allocation2 + $0x18] sm:$0xff] %v522_v11  ;;  %546 = vst [vmem:[#allocation2 + $0x58] sm:$0xff] %v530_v12 }
 0x133   : > { %537 = vst [vmem:[#allocation2 + $0x10] sm:$0xff] %v521_v15  ;;  %545 = vst [vmem:[#allocation2 + $0x50] sm:$0xff] %v529_v16  ;;  %v806_v21 = vpop.f32.mrb[4].mxu0  ;;  %v818_v22 = vpop.f32.mrb[4].mxu1 }
 0x134   : > { %v524_v23 = vadd.f32 %v806_v21, %v331_v17  ;;  %v532_v24 = vadd.f32 %v818_v22, %v339_v18  ;;  %v460_v25 = vpop.f32.mrb[5].mxu0  ;;  %v500_v26 = vpop.f32.mrb[5].mxu1 }
 0x135   : > { %v523_v27 = vadd.f32 %v460_v25, %v330_v19  ;;  %v531_v28 = vadd.f32 %v500_v26, %v338_v20  ;;  %554 = sbr.rel (%p729_p13) target bundleno = 329 (0x149), region = 78  ;;  %v556_v43 = vld [vmem:[#allocation2 + $0x8] sm:$0xff] (!%p729_p13) }
 0x136   : > { %540 = vst [vmem:[#allocation2 + $0x28] sm:$0xff] %v524_v23  ;;  %548 = vst [vmem:[#allocation2 + $0x68] sm:$0xff] %v532_v24  ;;  %v555_v41 = vld [vmem:[#allocation2] sm:$0xff] (!%p729_p13)  ;;  %v579_v45 = vadd.f32 (!%p729_p13), %v730_v42, %v556_v43  ;;  %v564_v60 = vld [vmem:[#allocation2 + $0x48] sm:$0xff] (!%p729_p13) }
 0x137   : > { %539 = vst [vmem:[#allocation2 + $0x20] sm:$0xff] %v523_v27  ;;  %547 = vst [vmem:[#allocation2 + $0x60] sm:$0xff] %v531_v28  ;;  %v809_v33 = vpop.f32.mrb[6].mxu0  ;;  %v821_v34 = vpop.f32.mrb[6].mxu1  ;;  %v578_v44 = vadd.f32 (!%p729_p13), %v730_v42, %v555_v41  ;;  %v563_v59 = vld [vmem:[#allocation2 + $0x40] sm:$0xff] (!%p729_p13)  ;;  %v587_v8 = vadd.f32 (!%p729_p13), %v730_v42, %v564_v60 }
 0x138   : > { %v526_v35 = vadd.f32 %v809_v33, %v333_v29  ;;  %v534_v36 = vadd.f32 %v821_v34, %v341_v30  ;;  %v470_v37 = vpop.f32.mrb[7].mxu0  ;;  %v510_v38 = vpop.f32.mrb[7].mxu1  ;;  %v595_v56 = vmax.f32 (!%p729_p13), %v579_v45, 0.0  ;;  %v586_v7 = vadd.f32 (!%p729_p13), %v730_v42, %v563_v59 }
 0x139   : > { %v525_v39 = vadd.f32 %v470_v37, %v332_v31  ;;  %v533_v40 = vadd.f32 %v510_v38, %v340_v32  ;;  %v558_v47 = vld [vmem:[#allocation2 + $0x18] sm:$0xff] (!%p729_p13)  ;;  %v594_v55 = vmax.f32 (!%p729_p13), %v578_v44, 0.0  ;;  %v603_v16 = vmax.f32 (!%p729_p13), %v587_v8, 0.0 }
 0x13a   : > { %542 = vst [vmem:[#allocation2 + $0x38] sm:$0xff] %v526_v35  ;;  %550 = vst [vmem:[#allocation2 + $0x78] sm:$0xff] %v534_v36  ;;  %v557_v46 = vld [vmem:[#allocation2 + $0x10] sm:$0xff] (!%p729_p13)  ;;  %v581_v50 = vadd.f32 (!%p729_p13), %v730_v42, %v558_v47  ;;  %v566_v2 = vld [vmem:[#allocation2 + $0x58] sm:$0xff] (!%p729_p13)  ;;  %v602_v15 = vmax.f32 (!%p729_p13), %v586_v7, 0.0 }
 0x13b   : > { %541 = vst [vmem:[#allocation2 + $0x30] sm:$0xff] %v525_v39  ;;  %549 = vst [vmem:[#allocation2 + $0x70] sm:$0xff] %v533_v40  ;;  %v580_v49 = vadd.f32 (!%p729_p13), %v730_v42, %v557_v46  ;;  %v565_v61 = vld [vmem:[#allocation2 + $0x50] sm:$0xff] (!%p729_p13)  ;;  %v589_v13 = vadd.f32 (!%p729_p13), %v730_v42, %v566_v2 }
 0x13c   : > { %v597_v63 = vmax.f32 %v581_v50, 0.0  ;;  %610 = vst [vmem:[%s1095_s29] sm:$0xff] %v594_v55  ;;  %611 = vst [vmem:[%s1095_s29 + $0x8] sm:$0xff] %v595_v56  ;;  %v588_v12 = vadd.f32 %v730_v42, %v565_v61 }
 0x13d   : > { %v560_v52 = vld [vmem:[#allocation2 + $0x28] sm:$0xff]  ;;  %v596_v62 = vmax.f32 %v580_v49, 0.0  ;;  %v605_v20 = vmax.f32 %v589_v13, 0.0  ;;  %618 = vst [vmem:[%s1095_s29 + $0x40] sm:$0xff] %v602_v15  ;;  %619 = vst [vmem:[%s1095_s29 + $0x48] sm:$0xff] %v603_v16 }
 0x13e   : > { %v559_v48 = vld [vmem:[#allocation2 + $0x20] sm:$0xff]  ;;  %v583_v57 = vadd.f32 %v730_v42, %v560_v52  ;;  %v568_v4 = vld [vmem:[#allocation2 + $0x68] sm:$0xff]  ;;  %613 = vst [vmem:[%s1095_s29 + $0x18] sm:$0xff] %v597_v63  ;;  %v604_v19 = vmax.f32 %v588_v12, 0.0 }
 0x13f   : > { %v582_v51 = vadd.f32 %v730_v42, %v559_v48  ;;  %v567_v3 = vld [vmem:[#allocation2 + $0x60] sm:$0xff]  ;;  %612 = vst [vmem:[%s1095_s29 + $0x10] sm:$0xff] %v596_v62  ;;  %v591_v17 = vadd.f32 %v730_v42, %v568_v4  ;;  %621 = vst [vmem:[%s1095_s29 + $0x58] sm:$0xff] %v605_v20 }
 0x140   : > { %v599_v5 = vmax.f32 %v583_v57, 0.0  ;;  %v590_v14 = vadd.f32 %v730_v42, %v567_v3  ;;  %620 = vst [vmem:[%s1095_s29 + $0x50] sm:$0xff] %v604_v19 }
 0x141   : > { %v562_v54 = vld [vmem:[#allocation2 + $0x38] sm:$0xff]  ;;  %v598_v0 = vmax.f32 %v582_v51, 0.0  ;;  %v607_v23 = vmax.f32 %v591_v17, 0.0 }
 0x142   : > { %v561_v53 = vld [vmem:[#allocation2 + $0x30] sm:$0xff]  ;;  %v585_v1 = vadd.f32 %v730_v42, %v562_v54  ;;  %v570_v10 = vld [vmem:[#allocation2 + $0x78] sm:$0xff]  ;;  %615 = vst [vmem:[%s1095_s29 + $0x28] sm:$0xff] %v599_v5  ;;  %v606_v21 = vmax.f32 %v590_v14, 0.0 }
 0x143   : > { %v584_v58 = vadd.f32 %v730_v42, %v561_v53  ;;  %v569_v9 = vld [vmem:[#allocation2 + $0x70] sm:$0xff]  ;;  %614 = vst [vmem:[%s1095_s29 + $0x20] sm:$0xff] %v598_v0  ;;  %v593_v22 = vadd.f32 %v730_v42, %v570_v10  ;;  %623 = vst [vmem:[%s1095_s29 + $0x68] sm:$0xff] %v607_v23 }
 0x144   : > { %v601_v11 = vmax.f32 %v585_v1, 0.0  ;;  %v592_v18 = vadd.f32 %v730_v42, %v569_v9  ;;  %622 = vst [vmem:[%s1095_s29 + $0x60] sm:$0xff] %v606_v21 }
 0x145   : > { %v600_v6 = vmax.f32 %v584_v58, 0.0  ;;  %v609_v25 = vmax.f32 %v593_v22, 0.0 }
 0x146   : > { %617 = vst [vmem:[%s1095_s29 + $0x38] sm:$0xff] %v601_v11  ;;  %v608_v24 = vmax.f32 %v592_v18, 0.0 }
 0x147   : > { %616 = vst [vmem:[%s1095_s29 + $0x30] sm:$0xff] %v600_v6  ;;  %625 = vst [vmem:[%s1095_s29 + $0x78] sm:$0xff] %v609_v25 }
 0x148   : > { %624 = vst [vmem:[%s1095_s29 + $0x70] sm:$0xff] %v608_v24 }
 0x149 PF: > { %s13_s18 = sadd.s32 1, %s981_s18   ;;  %s1177_s12 = smov %s961_s13 }
 0x14a   : > { %p10_p0 = scmp.ge.s32.totalorder %s13_s18, 6   ;;  %s1178_s13 = smov %s1055_s25 }
 0x14b   : > { %s1179_s14 = smov %s973_s16  ;;  %s1180_s15 = smov %s977_s17 }
 0x14c   : > { %s1181_s16 = smov %s1184_s19  ;;  %s1182_s17 = smov %s1188_s20 }
 0x14d   :  { %12 = sbr.rel (!%p10_p0) target bundleno = 4 (0x4), region = 116 }

</bundles_post_ra>
